<compile_context>
chip_gen: v5e
topology: v5e:2x2
jax: 0.10.0
libtpu: 0.0.40
codegen_flags: <defaults>
</compile_context>

<pallas_src>
import numpy as np
import jax
import jax.numpy as jnp
from jax.experimental import pallas as pl
from jax.experimental.pallas import tpu as pltpu

# ----- static config (mirrors DeformableFeatureAggregation.__init__, small sizes) -----
EMBED_DIMS = 32
NUM_GROUPS = 4
GROUP_DIMS = EMBED_DIMS // NUM_GROUPS       # 8
NUM_LEVELS = 2
NUM_CAMS = 2
NUM_PTS = 8                                 # num_pts from the (simplified) kps generator
BS = 2
NUM_ANCHOR = 8
H_IMG, W_IMG = 32, 32
LEVEL_HW = ((16, 16), (8, 8))

CL = NUM_CAMS * NUM_LEVELS                  # 4
CLP = CL * NUM_PTS                          # 32 : softmax axis size per group
FC_OUT = NUM_GROUPS * CLP                   # 128: weights_fc output features
NAP = NUM_ANCHOR * NUM_PTS                  # 64 : anchors * keypoints
CLD = CL * EMBED_DIMS                       # 128: per-(cam,level) channel-expanded cols
HW_LVL = tuple(h * w for h, w in LEVEL_HW)  # (256, 64)
HW_TOTAL = sum(HW_LVL)                      # 320
LVL_OFF = tuple(int(sum(HW_LVL[:i])) for i in range(NUM_LEVELS))
# lane-aligned (multiple-of-128) padded spatial extent per level for the fused gather
HW_PAD = tuple(int(-(-hw // 128) * 128) for hw in HW_LVL)        # (256, 128)
K_TOTAL = NUM_CAMS * sum(HW_PAD)                                  # 768
SEG_OFF = tuple(cam * sum(HW_PAD) + int(sum(HW_PAD[:l]))
                for cam in range(NUM_CAMS) for l in range(NUM_LEVELS))  # (0,256,384,640)

# static layout asserts (review: tie the hard-wired layouts to the config)
assert EMBED_DIMS % NUM_GROUPS == 0, "embed_dims must be divisible by num_groups"
assert FC_OUT == NUM_GROUPS * NUM_CAMS * NUM_LEVELS * NUM_PTS
assert CLD == CL * NUM_GROUPS * GROUP_DIMS
assert all(off % 128 == 0 for off in SEG_OFF) and K_TOTAL % 128 == 0
assert LVL_OFF == tuple(int(sum(HW_LVL[:i])) for i in range(NUM_LEVELS))

# TODO(synk): SparseBox3DKeyPointsGenerator source was not provided; use a
# deterministic fixed-scale keypoint generator (center + fix_scale * exp(size)).
FIX_SCALE = np.array(
    [[0.0, 0.0, 0.0],
     [0.5, 0.0, 0.0], [-0.5, 0.0, 0.0],
     [0.0, 0.5, 0.0], [0.0, -0.5, 0.0],
     [0.0, 0.0, 0.5], [0.0, 0.0, -0.5],
     [0.5, 0.5, 0.5]], dtype=np.float32)


# --------------------- trace-time constant tables (hoisted out of kernel) ---------------------
def _build_constants():
    col = np.arange(FC_OUT)
    cl = col // (NUM_GROUPS * NUM_PTS)
    g = (col // NUM_PTS) % NUM_GROUPS
    p = col % NUM_PTS
    # kernel column (cam,level,group,pt ordering) -> torch weights_fc out index (clp*G + g)
    perm = (cl * NUM_PTS + p) * NUM_GROUPS + g
    assert np.array_equal(np.sort(perm), col), "perm is not a permutation"

    # softmax: same-group segment-sum matrix
    seg = (g[:, None] == g[None, :]).astype(np.float32)                        # (128,128)
    # rows r = anchor*P + pt
    row = np.arange(NAP)
    repmat = (row[:, None] // NUM_PTS
              == np.arange(NUM_ANCHOR)[None, :]).astype(np.float32)            # (64, A)
    pmask = (col[None, :] % NUM_PTS == row[:, None] % NUM_PTS).astype(np.float32)  # (64,128)
    dst = np.arange(CLD)
    bcast = (col[:, None] // NUM_PTS == dst[None, :] // GROUP_DIMS).astype(np.float32)  # (128,128)
    red = repmat.T.copy()                                                      # (A, 64)
    colred = (dst[:, None] % EMBED_DIMS
              == np.arange(EMBED_DIMS)[None, :]).astype(np.float32)            # (128, D)

    # float column-index tables per level (padded to a multiple of 128 lanes)
    colxy = []
    for (h, w), hwp in zip(LEVEL_HW, HW_PAD):
        c = np.arange(hwp)
        colxy.append(((c % w).astype(np.float32)[None, :],     # col_x (1, hwp)
                      (c // w).astype(np.float32)[None, :]))   # col_y (1, hwp)
    return perm, seg, repmat, pmask, bcast, red, colred, colxy


_CONSTS = _build_constants()


# ------------------------------ fused Pallas kernel ------------------------------
def _dfa_fused_kernel(inst_ref, emb_ref, pts_ref, fm_ref,
                      wfc_ref, bfc_ref, wout_ref, bout_ref,
                      seg_ref, repmat_ref, pmask_ref, bcast_ref,
                      red_ref, colred_ref,
                      cx0_ref, cy0_ref, cx1_ref, cy1_ref,
                      o_ref, fmbd_ref):
    f32 = jnp.float32
    inst = inst_ref[...]                                                   # (A, D)

    # --- stage 1: weights_fc matmul + per-group softmax (single lane-dense tile) ---
    feat = inst + emb_ref[...]
    logits = jnp.dot(feat, wfc_ref[...], preferred_element_type=f32) + bfc_ref[...]
    m = jnp.max(logits, axis=-1, keepdims=True)                            # per-group shift-invariant
    ex = jnp.exp(logits - m)                                               # (A, 128)
    denom = jnp.dot(ex, seg_ref[...], preferred_element_type=f32)          # group sums
    w_soft = ex * pl.reciprocal(denom, approx=True)                        # EUP reciprocal

    # --- stage 2: expand to per-(cam,level) channel weights, layout (NAP, CL*D) ---
    rep = jnp.dot(repmat_ref[...], w_soft, preferred_element_type=f32)     # (NAP, 128)
    w_all = jnp.dot(rep * pmask_ref[...], bcast_ref[...],
                    preferred_element_type=f32)                            # (NAP, CLD)

    # --- stage 3: fused bilinear gather -> ONE lane-dense (64,768)@(768,128) contraction ---
    # block-diagonal feature matrix, assembled into VMEM scratch (off-diag stays zero)
    fmbd_ref[...] = jnp.zeros_like(fmbd_ref)
    col_refs = ((cx0_ref, cy0_ref), (cx1_ref, cy1_ref))
    pieces = []
    for cam in range(NUM_CAMS):
        pc = pts_ref[cam]                               # (NAP, 2) in [-1, 1]
        fm_cam = fm_ref[cam]                            # (HW_TOTAL, D) channels-last
        x = pc[:, 0:1]
        y = pc[:, 1:2]
        for lvl, (hh, ww) in enumerate(LEVEL_HW):
            cl = cam * NUM_LEVELS + lvl
            hw = HW_LVL[lvl]
            r0 = SEG_OFF[cl]
            fmbd_ref[r0:r0 + hw, cl * EMBED_DIMS:(cl + 1) * EMBED_DIMS] = \
                fm_cam[LVL_OFF[lvl]:LVL_OFF[lvl] + hw, :]
            # unnormalize (align_corners=False)
            ix = ((x + 1.0) * ww - 1.0) * 0.5
            iy = ((y + 1.0) * hh - 1.0) * 0.5
            x0 = jnp.floor(ix)
            y0 = jnp.floor(iy)
            fx = ix - x0
            fy = iy - y0
            colx = col_refs[lvl][0][...]                # (1, hw_pad) float column table
            coly = col_refs[lvl][1][...]
            # separable one-hot bilinear factors; float equality against the column table
            # implements zeros padding (OOB / far out-of-frustum corners match nothing).
            gx = (jnp.where(colx == x0, 1.0 - fx, 0.0)
                  + jnp.where(colx == x0 + 1.0, fx, 0.0))
            gy = (jnp.where(coly == y0, 1.0 - fy, 0.0)
                  + jnp.where(coly == y0 + 1.0, fy, 0.0))
            pieces.append(gx * gy)                      # (NAP, hw_pad)
    gather_all = jnp.concatenate(pieces, axis=-1)       # (NAP, K_TOTAL) 128-aligned segments
    # TODO(synk): replace by scalar-prefetched DMA row gather at production Sparse4D sizes.
    sampled = jnp.dot(gather_all, fmbd_ref[...],
                      preferred_element_type=f32)       # (NAP, CLD), column-aligned with w_all

    # --- stage 4: weighted fusion + keypoint/column reductions + output_proj + residual ---
    weighted = w_all * sampled                                             # (NAP, CLD)
    per_anchor = jnp.dot(red_ref[...], weighted, preferred_element_type=f32)   # (A, CLD)
    fsum = jnp.dot(per_anchor, colred_ref[...], preferred_element_type=f32)    # (A, D)
    proj = jnp.dot(fsum, wout_ref[...], preferred_element_type=f32) + bout_ref[...]
    o_ref[...] = proj + inst


# ----------------------------- plain-JAX glue (geometry) -----------------------------
def make_key_points(anchor):
    # TODO(synk): simplified SparseBox3DKeyPointsGenerator (fixed-scale points only).
    centers = anchor[..., :3]
    sizes = jnp.exp(anchor[..., 3:6])
    fs = jnp.asarray(FIX_SCALE)
    return centers[:, :, None, :] + fs[None, None] * sizes[:, :, None, :]   # (B, A, P, 3)


def project_points(key_points, cams, img_hw):
    """Plain-JAX replica of DeformableFeatureAggregation.project_points."""
    h_img, w_img = img_hw
    c2l = cams["camera_to_lidar"]          # (B, N, 4, 4)
    intrins = cams["intrins"]              # (B, N, 3, 3)
    post_rots = cams["post_rots"]          # (B, N, 3, 3)
    post_trans = cams["post_trans"]        # (B, N, 3)
    ones = jnp.ones(key_points.shape[:-1] + (1,), key_points.dtype)
    homog = jnp.concatenate([key_points, ones], axis=-1)                  # (B, A, P, 4)
    ego2cam = jnp.linalg.inv(c2l)                                         # torch.inverse
    pc = jnp.einsum("bnij,bapj->bnapi", ego2cam, homog)                   # (B, N, A, P, 4)
    pc = pc[..., :3] / pc[..., 3:4]
    p2 = jnp.einsum("bnij,bnapj->bnapi", intrins, pc)
    xy = p2[..., :2] / jnp.maximum(p2[..., 2:3], 1e-5)                    # clamp(min=1e-5)
    homog2 = jnp.concatenate([xy, jnp.ones_like(xy[..., :1])], axis=-1)
    p3 = jnp.einsum("bnij,bnapj->bnapi", post_rots, homog2) + post_trans[:, :, None, None, :]
    wh = jnp.asarray([w_img, h_img], jnp.float32)
    return p3[..., :2] / wh                                               # (B, N, A, P, 2) ~[0,1]


# ----------------------------------- forward pass -----------------------------------
def dfa_forward(instance_feature, anchor, anchor_embed, feature_maps, cams, params):
    bs, na, d = instance_feature.shape

    # geometry glue (tiny): keypoints + camera projection -> grid_sample coords [-1,1]
    key_points = make_key_points(anchor)
    pts01 = project_points(key_points, cams, (H_IMG, W_IMG))
    grid2d = (pts01 * 2.0 - 1.0).reshape(bs, NUM_CAMS, NAP, 2)

    # channels-last feature maps (B, N, H, W, C): flatten H*W, concat levels (no transpose)
    fm_cat = jnp.concatenate(
        [fm.reshape(bs, NUM_CAMS, h * w, EMBED_DIMS)
         for fm, (h, w) in zip(feature_maps, LEVEL_HW)], axis=2)          # (B, N, 320, D)

    perm, seg, repmat, pmask, bcast, red, colred, colxy = _CONSTS
    # fold the weights_fc column permutation at trace time
    w_fc_t = params["w_fc"][perm, :].T                                    # (D, FC_OUT)
    b_fc_p = params["b_fc"][perm][None, :]                                # (1, FC_OUT)
    w_out_t = params["w_out"].T                                           # (D, D)
    b_out = params["b_out"][None, :]                                      # (1, D)

    consts = (jnp.asarray(seg), jnp.asarray(repmat), jnp.asarray(pmask),
              jnp.asarray(bcast), jnp.asarray(red), jnp.asarray(colred),
              jnp.asarray(colxy[0][0]), jnp.asarray(colxy[0][1]),
              jnp.asarray(colxy[1][0]), jnp.asarray(colxy[1][1]))

    const_specs = [
        pl.BlockSpec((FC_OUT, FC_OUT), lambda b: (0, 0)),                   # seg
        pl.BlockSpec((NAP, NUM_ANCHOR), lambda b: (0, 0)),                  # repmat
        pl.BlockSpec((NAP, FC_OUT), lambda b: (0, 0)),                      # pmask
        pl.BlockSpec((FC_OUT, CLD), lambda b: (0, 0)),                      # bcast
        pl.BlockSpec((NUM_ANCHOR, NAP), lambda b: (0, 0)),                  # red
        pl.BlockSpec((CLD, d), lambda b: (0, 0)),                           # colred
        pl.BlockSpec((1, HW_PAD[0]), lambda b: (0, 0)),                     # col_x lvl0
        pl.BlockSpec((1, HW_PAD[0]), lambda b: (0, 0)),                     # col_y lvl0
        pl.BlockSpec((1, HW_PAD[1]), lambda b: (0, 0)),                     # col_x lvl1
        pl.BlockSpec((1, HW_PAD[1]), lambda b: (0, 0)),                     # col_y lvl1
    ]

    # grid=(bs,) "parallel": one batch per TensorCore on v7x.
    # TODO(synk): on single-TC v5e/v6e, fold bs into the row dimension (grid=()) instead.
    return pl.pallas_call(
        _dfa_fused_kernel,
        out_shape=jax.ShapeDtypeStruct((bs, na, d), jnp.float32),
        grid=(bs,),
        in_specs=[
            pl.BlockSpec((None, na, d), lambda b: (b, 0, 0)),                       # inst
            pl.BlockSpec((None, na, d), lambda b: (b, 0, 0)),                       # embed
            pl.BlockSpec((None, NUM_CAMS, NAP, 2), lambda b: (b, 0, 0, 0)),         # points
            pl.BlockSpec((None, NUM_CAMS, HW_TOTAL, d), lambda b: (b, 0, 0, 0)),    # fmaps
            pl.BlockSpec((d, FC_OUT), lambda b: (0, 0)),                            # w_fc
            pl.BlockSpec((1, FC_OUT), lambda b: (0, 0)),                            # b_fc
            pl.BlockSpec((d, d), lambda b: (0, 0)),                                 # w_out
            pl.BlockSpec((1, d), lambda b: (0, 0)),                                 # b_out
        ] + const_specs,
        out_specs=pl.BlockSpec((None, na, d), lambda b: (b, 0, 0)),
        scratch_shapes=[pltpu.VMEM((K_TOTAL, CLD), jnp.float32)],                   # fm blockdiag
        compiler_params=pltpu.CompilerParams(dimension_semantics=("parallel",)),
    )(instance_feature, anchor_embed, grid2d, fm_cat,
      w_fc_t, b_fc_p, w_out_t, b_out, *consts)


# --------------------------- pure-JAX reference (for checking) ---------------------------
def _grid_sample_ref(fm, grid):
    # fm (M, C, H, W), grid (M, A, P, 2) in [-1,1]; bilinear / zeros / align_corners=False.
    M, C, H, W = fm.shape
    x = grid[..., 0]
    y = grid[..., 1]
    ix = ((x + 1.0) * W - 1.0) / 2.0
    iy = ((y + 1.0) * H - 1.0) / 2.0
    x0 = jnp.floor(ix)
    y0 = jnp.floor(iy)
    x1 = x0 + 1.0
    y1 = y0 + 1.0
    wx1 = ix - x0
    wx0 = 1.0 - wx1
    wy1 = iy - y0
    wy0 = 1.0 - wy1

    def gather(cx, cy):
        valid = ((cx >= 0) & (cx <= W - 1) & (cy >= 0) & (cy <= H - 1)).astype(fm.dtype)
        cxi = jnp.clip(cx, 0, W - 1).astype(jnp.int32)
        cyi = jnp.clip(cy, 0, H - 1).astype(jnp.int32)

        def one(fm_m, cx_m, cy_m, v_m):
            return fm_m[:, cy_m, cx_m] * v_m[None]
        return jax.vmap(one)(fm, cxi, cyi, valid)

    return (gather(x0, y0) * (wx0 * wy0)[:, None]
            + gather(x1, y0) * (wx1 * wy0)[:, None]
            + gather(x0, y1) * (wx0 * wy1)[:, None]
            + gather(x1, y1) * (wx1 * wy1)[:, None])                     # (M, C, A, P)


def reference_forward(instance_feature, anchor, anchor_embed, feature_maps, cams, params):
    bs, na, d = instance_feature.shape
    feat = instance_feature + anchor_embed
    logits = jnp.einsum("bad,od->bao", feat, params["w_fc"],
                        precision=jax.lax.Precision.HIGHEST) + params["b_fc"]
    w = jax.nn.softmax(logits.reshape(bs, na, CLP, NUM_GROUPS), axis=-2)
    w = w.reshape(bs, na, NUM_CAMS, NUM_LEVELS, NUM_PTS, NUM_GROUPS)
    key_points = make_key_points(anchor)
    pts01 = project_points(key_points, cams, (H_IMG, W_IMG))
    grid = (pts01 * 2.0 - 1.0).reshape(bs * NUM_CAMS, na, NUM_PTS, 2)
    sampled = []
    for fm in feature_maps:                                   # channels-last (B,N,H,W,C)
        fm_nchw = jnp.transpose(fm, (0, 1, 4, 2, 3))
        sampled.append(_grid_sample_ref(
            fm_nchw.reshape((bs * NUM_CAMS,) + fm_nchw.shape[2:]), grid))
    sampled = jnp.stack(sampled, axis=1)                                  # (B*N, L, D, A, P)
    sampled = sampled.reshape(bs, NUM_CAMS, NUM_LEVELS, d, na, NUM_PTS)
    sampled = sampled.transpose(0, 4, 1, 2, 5, 3)                         # (B, A, N, L, P, D)
    fused = w[..., None] * sampled.reshape(bs, na, NUM_CAMS, NUM_LEVELS, NUM_PTS,
                                           NUM_GROUPS, GROUP_DIMS)
    fused = fused.sum(axis=2).sum(axis=2).reshape(bs, na, NUM_PTS, d).sum(axis=2)
    out = jnp.einsum("bad,od->bao", fused, params["w_out"],
                     precision=jax.lax.Precision.HIGHEST) + params["b_out"]
    return out + instance_feature


# ----------------------------------------- main -----------------------------------------
if __name__ == "__main__":
    key = jax.random.PRNGKey(0)
    ks = jax.random.split(key, 16)

    instance_feature = jax.random.normal(ks[0], (BS, NUM_ANCHOR, EMBED_DIMS), jnp.float32)
    anchor_embed = 0.5 * jax.random.normal(ks[1], (BS, NUM_ANCHOR, EMBED_DIMS), jnp.float32)

    centers_xy = jax.random.uniform(ks[2], (BS, NUM_ANCHOR, 2), minval=-1.5, maxval=1.5)
    depth = jax.random.uniform(ks[3], (BS, NUM_ANCHOR, 1), minval=3.0, maxval=5.0)
    log_sizes = 0.1 * jax.random.normal(ks[4], (BS, NUM_ANCHOR, 3)) + jnp.log(0.8)
    anchor = jnp.concatenate(
        [centers_xy, depth, log_sizes, jnp.zeros((BS, NUM_ANCHOR, 5))],
        axis=-1).astype(jnp.float32)                                      # (B, A, 11)

    # channels-last feature maps at the API boundary: (B, N, H, W, C)
    feature_maps = tuple(
        jax.random.normal(k, (BS, NUM_CAMS, h, w, EMBED_DIMS), jnp.float32)
        for k, (h, w) in zip((ks[5], ks[6]), LEVEL_HW))

    c2l = jnp.tile(jnp.eye(4, dtype=jnp.float32), (BS, NUM_CAMS, 1, 1))
    c2l = c2l.at[..., :3, 3].set(
        jax.random.uniform(ks[7], (BS, NUM_CAMS, 3), minval=-0.3, maxval=0.3))
    intrins = jnp.tile(jnp.array([[8.0, 0.0, 16.0],
                                  [0.0, 8.0, 16.0],
                                  [0.0, 0.0, 1.0]], jnp.float32), (BS, NUM_CAMS, 1, 1))
    post_rots = jnp.tile(jnp.eye(3, dtype=jnp.float32), (BS, NUM_CAMS, 1, 1))
    post_trans = jax.random.uniform(ks[8], (BS, NUM_CAMS, 3), minval=-0.5, maxval=0.5)
    cams = {"camera_to_lidar": c2l, "intrins": intrins,
            "post_rots": post_rots, "post_trans": post_trans}

    params = {
        "w_fc": 0.1 * jax.random.normal(ks[9], (FC_OUT, EMBED_DIMS), jnp.float32),
        "b_fc": 0.1 * jax.random.normal(ks[10], (FC_OUT,), jnp.float32),
        "w_out": jax.random.normal(ks[11], (EMBED_DIMS, EMBED_DIMS), jnp.float32)
                 / jnp.sqrt(float(EMBED_DIMS)),
        "b_out": 0.1 * jax.random.normal(ks[12], (EMBED_DIMS,), jnp.float32),
    }

    out = jax.jit(dfa_forward)(instance_feature, anchor, anchor_embed,
                               feature_maps, cams, params)
    out = jax.block_until_ready(out)

    ref = reference_forward(instance_feature, anchor, anchor_embed,
                            feature_maps, cams, params)
    np.testing.assert_allclose(np.asarray(out), np.asarray(ref), rtol=2e-3, atol=2e-3)
    print("KERNEL_OK")
</pallas_src>

<mosaic_0001>
module attributes {stable_mosaic.version = 11 : i64} {
  func.func @_dfa_fused_kernel(%arg0: i32, %arg1: memref<1x8x32xf32, #tpu.memory_space<vmem>>, %arg2: memref<1x8x32xf32, #tpu.memory_space<vmem>>, %arg3: memref<1x2x64x2xf32, #tpu.memory_space<vmem>>, %arg4: memref<1x2x320x32xf32, #tpu.memory_space<vmem>>, %arg5: memref<32x128xf32, #tpu.memory_space<vmem>>, %arg6: memref<1x128xf32, #tpu.memory_space<vmem>>, %arg7: memref<32x32xf32, #tpu.memory_space<vmem>>, %arg8: memref<1x32xf32, #tpu.memory_space<vmem>>, %arg9: memref<128x128xf32, #tpu.memory_space<vmem>>, %arg10: memref<64x8xf32, #tpu.memory_space<vmem>>, %arg11: memref<64x128xf32, #tpu.memory_space<vmem>>, %arg12: memref<128x128xf32, #tpu.memory_space<vmem>>, %arg13: memref<8x64xf32, #tpu.memory_space<vmem>>, %arg14: memref<128x32xf32, #tpu.memory_space<vmem>>, %arg15: memref<1x256xf32, #tpu.memory_space<vmem>>, %arg16: memref<1x256xf32, #tpu.memory_space<vmem>>, %arg17: memref<1x128xf32, #tpu.memory_space<vmem>>, %arg18: memref<1x128xf32, #tpu.memory_space<vmem>>, %arg19: memref<1x8x32xf32, #tpu.memory_space<vmem>>, %arg20: memref<768x128xf32, #tpu.memory_space<vmem>>) attributes {dimension_semantics = [#tpu.dimension_semantics<parallel>], iteration_bounds = array<i64: 2>, scalar_prefetch = 0 : i64, scratch_operands = 1 : i64, tpu.core_type = #tpu.core_type<tc>, window_params = [{transform_indices = @transform_0, window_bounds = array<i64: 1, 8, 32>}, {transform_indices = @transform_1, window_bounds = array<i64: 1, 8, 32>}, {transform_indices = @transform_2, window_bounds = array<i64: 1, 2, 64, 2>}, {transform_indices = @transform_3, window_bounds = array<i64: 1, 2, 320, 32>}, {pipeline_mode = #tpu.pipeline_mode<synchronous>, transform_indices = @transform_4, window_bounds = array<i64: 32, 128>}, {pipeline_mode = #tpu.pipeline_mode<synchronous>, transform_indices = @transform_5, window_bounds = array<i64: 1, 128>}, {pipeline_mode = #tpu.pipeline_mode<synchronous>, transform_indices = @transform_6, window_bounds = array<i64: 32, 32>}, {pipeline_mode = #tpu.pipeline_mode<synchronous>, transform_indices = @transform_7, window_bounds = array<i64: 1, 32>}, {pipeline_mode = #tpu.pipeline_mode<synchronous>, transform_indices = @transform_8, window_bounds = array<i64: 128, 128>}, {pipeline_mode = #tpu.pipeline_mode<synchronous>, transform_indices = @transform_9, window_bounds = array<i64: 64, 8>}, {pipeline_mode = #tpu.pipeline_mode<synchronous>, transform_indices = @transform_10, window_bounds = array<i64: 64, 128>}, {pipeline_mode = #tpu.pipeline_mode<synchronous>, transform_indices = @transform_11, window_bounds = array<i64: 128, 128>}, {pipeline_mode = #tpu.pipeline_mode<synchronous>, transform_indices = @transform_12, window_bounds = array<i64: 8, 64>}, {pipeline_mode = #tpu.pipeline_mode<synchronous>, transform_indices = @transform_13, window_bounds = array<i64: 128, 32>}, {pipeline_mode = #tpu.pipeline_mode<synchronous>, transform_indices = @transform_14, window_bounds = array<i64: 1, 256>}, {pipeline_mode = #tpu.pipeline_mode<synchronous>, transform_indices = @transform_15, window_bounds = array<i64: 1, 256>}, {pipeline_mode = #tpu.pipeline_mode<synchronous>, transform_indices = @transform_16, window_bounds = array<i64: 1, 128>}, {pipeline_mode = #tpu.pipeline_mode<synchronous>, transform_indices = @transform_17, window_bounds = array<i64: 1, 128>}, {transform_indices = @transform_18, window_bounds = array<i64: 1, 8, 32>}]} {
    %c0 = arith.constant 0 : index
    %c0_0 = arith.constant 0 : index
    %c0_1 = arith.constant 0 : index
    %0 = vector.load %arg1[%c0, %c0_0, %c0_1] : memref<1x8x32xf32, #tpu.memory_space<vmem>>, vector<1x8x32xf32>
    %1 = vector.shape_cast %0 : vector<1x8x32xf32> to vector<8x32xf32>
    %c0_2 = arith.constant 0 : index
    %c0_3 = arith.constant 0 : index
    %c0_4 = arith.constant 0 : index
    %2 = vector.load %arg2[%c0_2, %c0_3, %c0_4] : memref<1x8x32xf32, #tpu.memory_space<vmem>>, vector<1x8x32xf32>
    %3 = vector.shape_cast %2 : vector<1x8x32xf32> to vector<8x32xf32>
    %4 = arith.addf %1, %3 : vector<8x32xf32>
    %c0_5 = arith.constant 0 : index
    %c0_6 = arith.constant 0 : index
    %5 = vector.load %arg5[%c0_5, %c0_6] : memref<32x128xf32, #tpu.memory_space<vmem>>, vector<32x128xf32>
    %cst = arith.constant dense<0.000000e+00> : vector<8x128xf32>
    %6 = tpu.matmul %4, %5, %cst {dimension_numbers = #tpu.dot_dimension_numbers<[1], [0], [0], [1], [0, 0, 1, 1], [], []>} : vector<8x32xf32>, vector<32x128xf32>, vector<8x128xf32> -> vector<8x128xf32>
    %c0_7 = arith.constant 0 : index
    %c0_8 = arith.constant 0 : index
    %7 = vector.load %arg6[%c0_7, %c0_8] : memref<1x128xf32, #tpu.memory_space<vmem>>, vector<1x128xf32>
    %8 = vector.broadcast %7 : vector<1x128xf32> to vector<8x128xf32>
    %9 = arith.addf %6, %8 : vector<8x128xf32>
    %cst_9 = arith.constant dense<0xFF800000> : vector<8xf32>
    %10 = vector.multi_reduction <maximumf>, %9, %cst_9 [1] : vector<8x128xf32> to vector<8xf32>
    %11 = vector.shape_cast %10 : vector<8xf32> to vector<8x1xf32>
    %12 = vector.broadcast %11 : vector<8x1xf32> to vector<8x128xf32>
    %13 = arith.subf %9, %12 : vector<8x128xf32>
    %14 = math.exp %13 : vector<8x128xf32>
    %c0_10 = arith.constant 0 : index
    %c0_11 = arith.constant 0 : index
    %15 = vector.load %arg9[%c0_10, %c0_11] : memref<128x128xf32, #tpu.memory_space<vmem>>, vector<128x128xf32>
    %cst_12 = arith.constant dense<0.000000e+00> : vector<8x128xf32>
    %16 = tpu.matmul %14, %15, %cst_12 {dimension_numbers = #tpu.dot_dimension_numbers<[1], [0], [0], [1], [0, 0, 1, 1], [], []>} : vector<8x128xf32>, vector<128x128xf32>, vector<8x128xf32> -> vector<8x128xf32>
    %17 = tpu.reciprocal %16 {approx = true} : vector<8x128xf32> -> vector<8x128xf32>
    %18 = arith.mulf %14, %17 : vector<8x128xf32>
    %c0_13 = arith.constant 0 : index
    %c0_14 = arith.constant 0 : index
    %19 = vector.load %arg10[%c0_13, %c0_14] : memref<64x8xf32, #tpu.memory_space<vmem>>, vector<64x8xf32>
    %cst_15 = arith.constant dense<0.000000e+00> : vector<64x128xf32>
    %20 = tpu.matmul %19, %18, %cst_15 {dimension_numbers = #tpu.dot_dimension_numbers<[1], [0], [0], [1], [0, 0, 1, 1], [], []>} : vector<64x8xf32>, vector<8x128xf32>, vector<64x128xf32> -> vector<64x128xf32>
    %c0_16 = arith.constant 0 : index
    %c0_17 = arith.constant 0 : index
    %21 = vector.load %arg11[%c0_16, %c0_17] : memref<64x128xf32, #tpu.memory_space<vmem>>, vector<64x128xf32>
    %22 = arith.mulf %20, %21 : vector<64x128xf32>
    %c0_18 = arith.constant 0 : index
    %c0_19 = arith.constant 0 : index
    %23 = vector.load %arg12[%c0_18, %c0_19] : memref<128x128xf32, #tpu.memory_space<vmem>>, vector<128x128xf32>
    %cst_20 = arith.constant dense<0.000000e+00> : vector<64x128xf32>
    %24 = tpu.matmul %22, %23, %cst_20 {dimension_numbers = #tpu.dot_dimension_numbers<[1], [0], [0], [1], [0, 0, 1, 1], [], []>} : vector<64x128xf32>, vector<128x128xf32>, vector<64x128xf32> -> vector<64x128xf32>
    %cst_21 = arith.constant 0.000000e+00 : f32
    %25 = vector.broadcast %cst_21 : f32 to vector<768x128xf32>
    %c0_22 = arith.constant 0 : index
    %c0_23 = arith.constant 0 : index
    %26 = vector.load %arg20[%c0_22, %c0_23] : memref<768x128xf32, #tpu.memory_space<vmem>>, vector<768x128xf32>
    tpu.vector_store %arg20[%c0_22, %c0_23], %25 {strides = array<i32>} : memref<768x128xf32, #tpu.memory_space<vmem>>, vector<768x128xf32>,
    %c0_24 = arith.constant 0 : index
    %c0_25 = arith.constant 0 : index
    %c0_26 = arith.constant 0 : index
    %c0_27 = arith.constant 0 : index
    %27 = vector.load %arg3[%c0_24, %c0_25, %c0_26, %c0_27] : memref<1x2x64x2xf32, #tpu.memory_space<vmem>>, vector<1x1x64x2xf32>
    %28 = vector.shape_cast %27 : vector<1x1x64x2xf32> to vector<64x2xf32>
    %c0_28 = arith.constant 0 : index
    %c0_29 = arith.constant 0 : index
    %c0_30 = arith.constant 0 : index
    %c0_31 = arith.constant 0 : index
    %29 = vector.load %arg4[%c0_28, %c0_29, %c0_30, %c0_31] : memref<1x2x320x32xf32, #tpu.memory_space<vmem>>, vector<1x1x320x32xf32>
    %30 = vector.shape_cast %29 : vector<1x1x320x32xf32> to vector<320x32xf32>
    %31 = vector.extract_strided_slice %28 {offsets = [0, 0], sizes = [64, 1], strides = [1, 1]} : vector<64x2xf32> to vector<64x1xf32>
    %32 = vector.extract_strided_slice %28 {offsets = [0, 1], sizes = [64, 1], strides = [1, 1]} : vector<64x2xf32> to vector<64x1xf32>
    %33 = vector.extract_strided_slice %30 {offsets = [0, 0], sizes = [256, 32], strides = [1, 1]} : vector<320x32xf32> to vector<256x32xf32>
    %c0_32 = arith.constant 0 : index
    %c0_33 = arith.constant 0 : index
    %34 = vector.load %arg20[%c0_32, %c0_33] : memref<768x128xf32, #tpu.memory_space<vmem>>, vector<256x32xf32>
    tpu.vector_store %arg20[%c0_32, %c0_33], %33 {strides = array<i32>} : memref<768x128xf32, #tpu.memory_space<vmem>>, vector<256x32xf32>,
    %cst_34 = arith.constant 1.000000e+00 : f32
    %35 = vector.broadcast %cst_34 : f32 to vector<64x1xf32>
    %36 = arith.addf %31, %35 : vector<64x1xf32>
    %cst_35 = arith.constant 1.600000e+01 : f32
    %37 = vector.broadcast %cst_35 : f32 to vector<64x1xf32>
    %38 = arith.mulf %36, %37 : vector<64x1xf32>
    %cst_36 = arith.constant 1.000000e+00 : f32
    %39 = vector.broadcast %cst_36 : f32 to vector<64x1xf32>
    %40 = arith.subf %38, %39 : vector<64x1xf32>
    %cst_37 = arith.constant 5.000000e-01 : f32
    %41 = vector.broadcast %cst_37 : f32 to vector<64x1xf32>
    %42 = arith.mulf %40, %41 : vector<64x1xf32>
    %cst_38 = arith.constant 1.000000e+00 : f32
    %43 = vector.broadcast %cst_38 : f32 to vector<64x1xf32>
    %44 = arith.addf %32, %43 : vector<64x1xf32>
    %cst_39 = arith.constant 1.600000e+01 : f32
    %45 = vector.broadcast %cst_39 : f32 to vector<64x1xf32>
    %46 = arith.mulf %44, %45 : vector<64x1xf32>
    %cst_40 = arith.constant 1.000000e+00 : f32
    %47 = vector.broadcast %cst_40 : f32 to vector<64x1xf32>
    %48 = arith.subf %46, %47 : vector<64x1xf32>
    %cst_41 = arith.constant 5.000000e-01 : f32
    %49 = vector.broadcast %cst_41 : f32 to vector<64x1xf32>
    %50 = arith.mulf %48, %49 : vector<64x1xf32>
    %51 = math.floor %42 : vector<64x1xf32>
    %52 = math.floor %50 : vector<64x1xf32>
    %53 = arith.subf %42, %51 : vector<64x1xf32>
    %54 = arith.subf %50, %52 : vector<64x1xf32>
    %c0_42 = arith.constant 0 : index
    %c0_43 = arith.constant 0 : index
    %55 = vector.load %arg15[%c0_42, %c0_43] : memref<1x256xf32, #tpu.memory_space<vmem>>, vector<1x256xf32>
    %c0_44 = arith.constant 0 : index
    %c0_45 = arith.constant 0 : index
    %56 = vector.load %arg16[%c0_44, %c0_45] : memref<1x256xf32, #tpu.memory_space<vmem>>, vector<1x256xf32>
    %57 = vector.broadcast %55 : vector<1x256xf32> to vector<64x256xf32>
    %58 = vector.broadcast %51 : vector<64x1xf32> to vector<64x256xf32>
    %59 = arith.cmpf oeq, %57, %58 : vector<64x256xf32>
    %cst_46 = arith.constant 1.000000e+00 : f32
    %60 = vector.broadcast %cst_46 : f32 to vector<64x1xf32>
    %61 = arith.subf %60, %53 : vector<64x1xf32>
    %cst_47 = arith.constant 0.000000e+00 : f32
    %62 = vector.shape_cast %61 : vector<64x1xf32> to vector<64x1xf32>
    %63 = vector.broadcast %62 : vector<64x1xf32> to vector<64x256xf32>
    %64 = vector.broadcast %cst_47 : f32 to vector<64x256xf32>
    %65 = arith.select %59, %63, %64 : vector<64x256xi1>, vector<64x256xf32>
    %cst_48 = arith.constant 1.000000e+00 : f32
    %66 = vector.broadcast %cst_48 : f32 to vector<64x1xf32>
    %67 = arith.addf %51, %66 : vector<64x1xf32>
    %68 = vector.broadcast %55 : vector<1x256xf32> to vector<64x256xf32>
    %69 = vector.broadcast %67 : vector<64x1xf32> to vector<64x256xf32>
    %70 = arith.cmpf oeq, %68, %69 : vector<64x256xf32>
    %cst_49 = arith.constant 0.000000e+00 : f32
    %71 = vector.shape_cast %53 : vector<64x1xf32> to vector<64x1xf32>
    %72 = vector.broadcast %71 : vector<64x1xf32> to vector<64x256xf32>
    %73 = vector.broadcast %cst_49 : f32 to vector<64x256xf32>
    %74 = arith.select %70, %72, %73 : vector<64x256xi1>, vector<64x256xf32>
    %75 = arith.addf %65, %74 : vector<64x256xf32>
    %76 = vector.broadcast %56 : vector<1x256xf32> to vector<64x256xf32>
    %77 = vector.broadcast %52 : vector<64x1xf32> to vector<64x256xf32>
    %78 = arith.cmpf oeq, %76, %77 : vector<64x256xf32>
    %cst_50 = arith.constant 1.000000e+00 : f32
    %79 = vector.broadcast %cst_50 : f32 to vector<64x1xf32>
    %80 = arith.subf %79, %54 : vector<64x1xf32>
    %cst_51 = arith.constant 0.000000e+00 : f32
    %81 = vector.shape_cast %80 : vector<64x1xf32> to vector<64x1xf32>
    %82 = vector.broadcast %81 : vector<64x1xf32> to vector<64x256xf32>
    %83 = vector.broadcast %cst_51 : f32 to vector<64x256xf32>
    %84 = arith.select %78, %82, %83 : vector<64x256xi1>, vector<64x256xf32>
    %cst_52 = arith.constant 1.000000e+00 : f32
    %85 = vector.broadcast %cst_52 : f32 to vector<64x1xf32>
    %86 = arith.addf %52, %85 : vector<64x1xf32>
    %87 = vector.broadcast %56 : vector<1x256xf32> to vector<64x256xf32>
    %88 = vector.broadcast %86 : vector<64x1xf32> to vector<64x256xf32>
    %89 = arith.cmpf oeq, %87, %88 : vector<64x256xf32>
    %cst_53 = arith.constant 0.000000e+00 : f32
    %90 = vector.shape_cast %54 : vector<64x1xf32> to vector<64x1xf32>
    %91 = vector.broadcast %90 : vector<64x1xf32> to vector<64x256xf32>
    %92 = vector.broadcast %cst_53 : f32 to vector<64x256xf32>
    %93 = arith.select %89, %91, %92 : vector<64x256xi1>, vector<64x256xf32>
    %94 = arith.addf %84, %93 : vector<64x256xf32>
    %95 = arith.mulf %75, %94 : vector<64x256xf32>
    %96 = vector.extract_strided_slice %30 {offsets = [256, 0], sizes = [64, 32], strides = [1, 1]} : vector<320x32xf32> to vector<64x32xf32>
    %c256 = arith.constant 256 : index
    %c32 = arith.constant 32 : index
    %97 = vector.load %arg20[%c256, %c32] : memref<768x128xf32, #tpu.memory_space<vmem>>, vector<64x32xf32>
    tpu.vector_store %arg20[%c256, %c32], %96 {strides = array<i32>} : memref<768x128xf32, #tpu.memory_space<vmem>>, vector<64x32xf32>,
    %cst_54 = arith.constant 1.000000e+00 : f32
    %98 = vector.broadcast %cst_54 : f32 to vector<64x1xf32>
    %99 = arith.addf %31, %98 : vector<64x1xf32>
    %cst_55 = arith.constant 8.000000e+00 : f32
    %100 = vector.broadcast %cst_55 : f32 to vector<64x1xf32>
    %101 = arith.mulf %99, %100 : vector<64x1xf32>
    %cst_56 = arith.constant 1.000000e+00 : f32
    %102 = vector.broadcast %cst_56 : f32 to vector<64x1xf32>
    %103 = arith.subf %101, %102 : vector<64x1xf32>
    %cst_57 = arith.constant 5.000000e-01 : f32
    %104 = vector.broadcast %cst_57 : f32 to vector<64x1xf32>
    %105 = arith.mulf %103, %104 : vector<64x1xf32>
    %cst_58 = arith.constant 1.000000e+00 : f32
    %106 = vector.broadcast %cst_58 : f32 to vector<64x1xf32>
    %107 = arith.addf %32, %106 : vector<64x1xf32>
    %cst_59 = arith.constant 8.000000e+00 : f32
    %108 = vector.broadcast %cst_59 : f32 to vector<64x1xf32>
    %109 = arith.mulf %107, %108 : vector<64x1xf32>
    %cst_60 = arith.constant 1.000000e+00 : f32
    %110 = vector.broadcast %cst_60 : f32 to vector<64x1xf32>
    %111 = arith.subf %109, %110 : vector<64x1xf32>
    %cst_61 = arith.constant 5.000000e-01 : f32
    %112 = vector.broadcast %cst_61 : f32 to vector<64x1xf32>
    %113 = arith.mulf %111, %112 : vector<64x1xf32>
    %114 = math.floor %105 : vector<64x1xf32>
    %115 = math.floor %113 : vector<64x1xf32>
    %116 = arith.subf %105, %114 : vector<64x1xf32>
    %117 = arith.subf %113, %115 : vector<64x1xf32>
    %c0_62 = arith.constant 0 : index
    %c0_63 = arith.constant 0 : index
    %118 = vector.load %arg17[%c0_62, %c0_63] : memref<1x128xf32, #tpu.memory_space<vmem>>, vector<1x128xf32>
    %c0_64 = arith.constant 0 : index
    %c0_65 = arith.constant 0 : index
    %119 = vector.load %arg18[%c0_64, %c0_65] : memref<1x128xf32, #tpu.memory_space<vmem>>, vector<1x128xf32>
    %120 = vector.broadcast %118 : vector<1x128xf32> to vector<64x128xf32>
    %121 = vector.broadcast %114 : vector<64x1xf32> to vector<64x128xf32>
    %122 = arith.cmpf oeq, %120, %121 : vector<64x128xf32>
    %cst_66 = arith.constant 1.000000e+00 : f32
    %123 = vector.broadcast %cst_66 : f32 to vector<64x1xf32>
    %124 = arith.subf %123, %116 : vector<64x1xf32>
    %cst_67 = arith.constant 0.000000e+00 : f32
    %125 = vector.shape_cast %124 : vector<64x1xf32> to vector<64x1xf32>
    %126 = vector.broadcast %125 : vector<64x1xf32> to vector<64x128xf32>
    %127 = vector.broadcast %cst_67 : f32 to vector<64x128xf32>
    %128 = arith.select %122, %126, %127 : vector<64x128xi1>, vector<64x128xf32>
    %cst_68 = arith.constant 1.000000e+00 : f32
    %129 = vector.broadcast %cst_68 : f32 to vector<64x1xf32>
    %130 = arith.addf %114, %129 : vector<64x1xf32>
    %131 = vector.broadcast %118 : vector<1x128xf32> to vector<64x128xf32>
    %132 = vector.broadcast %130 : vector<64x1xf32> to vector<64x128xf32>
    %133 = arith.cmpf oeq, %131, %132 : vector<64x128xf32>
    %cst_69 = arith.constant 0.000000e+00 : f32
    %134 = vector.shape_cast %116 : vector<64x1xf32> to vector<64x1xf32>
    %135 = vector.broadcast %134 : vector<64x1xf32> to vector<64x128xf32>
    %136 = vector.broadcast %cst_69 : f32 to vector<64x128xf32>
    %137 = arith.select %133, %135, %136 : vector<64x128xi1>, vector<64x128xf32>
    %138 = arith.addf %128, %137 : vector<64x128xf32>
    %139 = vector.broadcast %119 : vector<1x128xf32> to vector<64x128xf32>
    %140 = vector.broadcast %115 : vector<64x1xf32> to vector<64x128xf32>
    %141 = arith.cmpf oeq, %139, %140 : vector<64x128xf32>
    %cst_70 = arith.constant 1.000000e+00 : f32
    %142 = vector.broadcast %cst_70 : f32 to vector<64x1xf32>
    %143 = arith.subf %142, %117 : vector<64x1xf32>
    %cst_71 = arith.constant 0.000000e+00 : f32
    %144 = vector.shape_cast %143 : vector<64x1xf32> to vector<64x1xf32>
    %145 = vector.broadcast %144 : vector<64x1xf32> to vector<64x128xf32>
    %146 = vector.broadcast %cst_71 : f32 to vector<64x128xf32>
    %147 = arith.select %141, %145, %146 : vector<64x128xi1>, vector<64x128xf32>
    %cst_72 = arith.constant 1.000000e+00 : f32
    %148 = vector.broadcast %cst_72 : f32 to vector<64x1xf32>
    %149 = arith.addf %115, %148 : vector<64x1xf32>
    %150 = vector.broadcast %119 : vector<1x128xf32> to vector<64x128xf32>
    %151 = vector.broadcast %149 : vector<64x1xf32> to vector<64x128xf32>
    %152 = arith.cmpf oeq, %150, %151 : vector<64x128xf32>
    %cst_73 = arith.constant 0.000000e+00 : f32
    %153 = vector.shape_cast %117 : vector<64x1xf32> to vector<64x1xf32>
    %154 = vector.broadcast %153 : vector<64x1xf32> to vector<64x128xf32>
    %155 = vector.broadcast %cst_73 : f32 to vector<64x128xf32>
    %156 = arith.select %152, %154, %155 : vector<64x128xi1>, vector<64x128xf32>
    %157 = arith.addf %147, %156 : vector<64x128xf32>
    %158 = arith.mulf %138, %157 : vector<64x128xf32>
    %c0_74 = arith.constant 0 : index
    %c1 = arith.constant 1 : index
    %c0_75 = arith.constant 0 : index
    %c0_76 = arith.constant 0 : index
    %159 = vector.load %arg3[%c0_74, %c1, %c0_75, %c0_76] : memref<1x2x64x2xf32, #tpu.memory_space<vmem>>, vector<1x1x64x2xf32>
    %160 = vector.shape_cast %159 : vector<1x1x64x2xf32> to vector<64x2xf32>
    %c0_77 = arith.constant 0 : index
    %c1_78 = arith.constant 1 : index
    %c0_79 = arith.constant 0 : index
    %c0_80 = arith.constant 0 : index
    %161 = vector.load %arg4[%c0_77, %c1_78, %c0_79, %c0_80] : memref<1x2x320x32xf32, #tpu.memory_space<vmem>>, vector<1x1x320x32xf32>
    %162 = vector.shape_cast %161 : vector<1x1x320x32xf32> to vector<320x32xf32>
    %163 = vector.extract_strided_slice %160 {offsets = [0, 0], sizes = [64, 1], strides = [1, 1]} : vector<64x2xf32> to vector<64x1xf32>
    %164 = vector.extract_strided_slice %160 {offsets = [0, 1], sizes = [64, 1], strides = [1, 1]} : vector<64x2xf32> to vector<64x1xf32>
    %165 = vector.extract_strided_slice %162 {offsets = [0, 0], sizes = [256, 32], strides = [1, 1]} : vector<320x32xf32> to vector<256x32xf32>
    %c384 = arith.constant 384 : index
    %c64 = arith.constant 64 : index
    %166 = vector.load %arg20[%c384, %c64] : memref<768x128xf32, #tpu.memory_space<vmem>>, vector<256x32xf32>
    tpu.vector_store %arg20[%c384, %c64], %165 {strides = array<i32>} : memref<768x128xf32, #tpu.memory_space<vmem>>, vector<256x32xf32>,
    %cst_81 = arith.constant 1.000000e+00 : f32
    %167 = vector.broadcast %cst_81 : f32 to vector<64x1xf32>
    %168 = arith.addf %163, %167 : vector<64x1xf32>
    %cst_82 = arith.constant 1.600000e+01 : f32
    %169 = vector.broadcast %cst_82 : f32 to vector<64x1xf32>
    %170 = arith.mulf %168, %169 : vector<64x1xf32>
    %cst_83 = arith.constant 1.000000e+00 : f32
    %171 = vector.broadcast %cst_83 : f32 to vector<64x1xf32>
    %172 = arith.subf %170, %171 : vector<64x1xf32>
    %cst_84 = arith.constant 5.000000e-01 : f32
    %173 = vector.broadcast %cst_84 : f32 to vector<64x1xf32>
    %174 = arith.mulf %172, %173 : vector<64x1xf32>
    %cst_85 = arith.constant 1.000000e+00 : f32
    %175 = vector.broadcast %cst_85 : f32 to vector<64x1xf32>
    %176 = arith.addf %164, %175 : vector<64x1xf32>
    %cst_86 = arith.constant 1.600000e+01 : f32
    %177 = vector.broadcast %cst_86 : f32 to vector<64x1xf32>
    %178 = arith.mulf %176, %177 : vector<64x1xf32>
    %cst_87 = arith.constant 1.000000e+00 : f32
    %179 = vector.broadcast %cst_87 : f32 to vector<64x1xf32>
    %180 = arith.subf %178, %179 : vector<64x1xf32>
    %cst_88 = arith.constant 5.000000e-01 : f32
    %181 = vector.broadcast %cst_88 : f32 to vector<64x1xf32>
    %182 = arith.mulf %180, %181 : vector<64x1xf32>
    %183 = math.floor %174 : vector<64x1xf32>
    %184 = math.floor %182 : vector<64x1xf32>
    %185 = arith.subf %174, %183 : vector<64x1xf32>
    %186 = arith.subf %182, %184 : vector<64x1xf32>
    %c0_89 = arith.constant 0 : index
    %c0_90 = arith.constant 0 : index
    %187 = vector.load %arg15[%c0_89, %c0_90] : memref<1x256xf32, #tpu.memory_space<vmem>>, vector<1x256xf32>
    %c0_91 = arith.constant 0 : index
    %c0_92 = arith.constant 0 : index
    %188 = vector.load %arg16[%c0_91, %c0_92] : memref<1x256xf32, #tpu.memory_space<vmem>>, vector<1x256xf32>
    %189 = vector.broadcast %187 : vector<1x256xf32> to vector<64x256xf32>
    %190 = vector.broadcast %183 : vector<64x1xf32> to vector<64x256xf32>
    %191 = arith.cmpf oeq, %189, %190 : vector<64x256xf32>
    %cst_93 = arith.constant 1.000000e+00 : f32
    %192 = vector.broadcast %cst_93 : f32 to vector<64x1xf32>
    %193 = arith.subf %192, %185 : vector<64x1xf32>
    %cst_94 = arith.constant 0.000000e+00 : f32
    %194 = vector.shape_cast %193 : vector<64x1xf32> to vector<64x1xf32>
    %195 = vector.broadcast %194 : vector<64x1xf32> to vector<64x256xf32>
    %196 = vector.broadcast %cst_94 : f32 to vector<64x256xf32>
    %197 = arith.select %191, %195, %196 : vector<64x256xi1>, vector<64x256xf32>
    %cst_95 = arith.constant 1.000000e+00 : f32
    %198 = vector.broadcast %cst_95 : f32 to vector<64x1xf32>
    %199 = arith.addf %183, %198 : vector<64x1xf32>
    %200 = vector.broadcast %187 : vector<1x256xf32> to vector<64x256xf32>
    %201 = vector.broadcast %199 : vector<64x1xf32> to vector<64x256xf32>
    %202 = arith.cmpf oeq, %200, %201 : vector<64x256xf32>
    %cst_96 = arith.constant 0.000000e+00 : f32
    %203 = vector.shape_cast %185 : vector<64x1xf32> to vector<64x1xf32>
    %204 = vector.broadcast %203 : vector<64x1xf32> to vector<64x256xf32>
    %205 = vector.broadcast %cst_96 : f32 to vector<64x256xf32>
    %206 = arith.select %202, %204, %205 : vector<64x256xi1>, vector<64x256xf32>
    %207 = arith.addf %197, %206 : vector<64x256xf32>
    %208 = vector.broadcast %188 : vector<1x256xf32> to vector<64x256xf32>
    %209 = vector.broadcast %184 : vector<64x1xf32> to vector<64x256xf32>
    %210 = arith.cmpf oeq, %208, %209 : vector<64x256xf32>
    %cst_97 = arith.constant 1.000000e+00 : f32
    %211 = vector.broadcast %cst_97 : f32 to vector<64x1xf32>
    %212 = arith.subf %211, %186 : vector<64x1xf32>
    %cst_98 = arith.constant 0.000000e+00 : f32
    %213 = vector.shape_cast %212 : vector<64x1xf32> to vector<64x1xf32>
    %214 = vector.broadcast %213 : vector<64x1xf32> to vector<64x256xf32>
    %215 = vector.broadcast %cst_98 : f32 to vector<64x256xf32>
    %216 = arith.select %210, %214, %215 : vector<64x256xi1>, vector<64x256xf32>
    %cst_99 = arith.constant 1.000000e+00 : f32
    %217 = vector.broadcast %cst_99 : f32 to vector<64x1xf32>
    %218 = arith.addf %184, %217 : vector<64x1xf32>
    %219 = vector.broadcast %188 : vector<1x256xf32> to vector<64x256xf32>
    %220 = vector.broadcast %218 : vector<64x1xf32> to vector<64x256xf32>
    %221 = arith.cmpf oeq, %219, %220 : vector<64x256xf32>
    %cst_100 = arith.constant 0.000000e+00 : f32
    %222 = vector.shape_cast %186 : vector<64x1xf32> to vector<64x1xf32>
    %223 = vector.broadcast %222 : vector<64x1xf32> to vector<64x256xf32>
    %224 = vector.broadcast %cst_100 : f32 to vector<64x256xf32>
    %225 = arith.select %221, %223, %224 : vector<64x256xi1>, vector<64x256xf32>
    %226 = arith.addf %216, %225 : vector<64x256xf32>
    %227 = arith.mulf %207, %226 : vector<64x256xf32>
    %228 = vector.extract_strided_slice %162 {offsets = [256, 0], sizes = [64, 32], strides = [1, 1]} : vector<320x32xf32> to vector<64x32xf32>
    %c640 = arith.constant 640 : index
    %c96 = arith.constant 96 : index
    %229 = vector.load %arg20[%c640, %c96] : memref<768x128xf32, #tpu.memory_space<vmem>>, vector<64x32xf32>
    tpu.vector_store %arg20[%c640, %c96], %228 {strides = array<i32>} : memref<768x128xf32, #tpu.memory_space<vmem>>, vector<64x32xf32>,
    %cst_101 = arith.constant 1.000000e+00 : f32
    %230 = vector.broadcast %cst_101 : f32 to vector<64x1xf32>
    %231 = arith.addf %163, %230 : vector<64x1xf32>
    %cst_102 = arith.constant 8.000000e+00 : f32
    %232 = vector.broadcast %cst_102 : f32 to vector<64x1xf32>
    %233 = arith.mulf %231, %232 : vector<64x1xf32>
    %cst_103 = arith.constant 1.000000e+00 : f32
    %234 = vector.broadcast %cst_103 : f32 to vector<64x1xf32>
    %235 = arith.subf %233, %234 : vector<64x1xf32>
    %cst_104 = arith.constant 5.000000e-01 : f32
    %236 = vector.broadcast %cst_104 : f32 to vector<64x1xf32>
    %237 = arith.mulf %235, %236 : vector<64x1xf32>
    %cst_105 = arith.constant 1.000000e+00 : f32
    %238 = vector.broadcast %cst_105 : f32 to vector<64x1xf32>
    %239 = arith.addf %164, %238 : vector<64x1xf32>
    %cst_106 = arith.constant 8.000000e+00 : f32
    %240 = vector.broadcast %cst_106 : f32 to vector<64x1xf32>
    %241 = arith.mulf %239, %240 : vector<64x1xf32>
    %cst_107 = arith.constant 1.000000e+00 : f32
    %242 = vector.broadcast %cst_107 : f32 to vector<64x1xf32>
    %243 = arith.subf %241, %242 : vector<64x1xf32>
    %cst_108 = arith.constant 5.000000e-01 : f32
    %244 = vector.broadcast %cst_108 : f32 to vector<64x1xf32>
    %245 = arith.mulf %243, %244 : vector<64x1xf32>
    %246 = math.floor %237 : vector<64x1xf32>
    %247 = math.floor %245 : vector<64x1xf32>
    %248 = arith.subf %237, %246 : vector<64x1xf32>
    %249 = arith.subf %245, %247 : vector<64x1xf32>
    %c0_109 = arith.constant 0 : index
    %c0_110 = arith.constant 0 : index
    %250 = vector.load %arg17[%c0_109, %c0_110] : memref<1x128xf32, #tpu.memory_space<vmem>>, vector<1x128xf32>
    %c0_111 = arith.constant 0 : index
    %c0_112 = arith.constant 0 : index
    %251 = vector.load %arg18[%c0_111, %c0_112] : memref<1x128xf32, #tpu.memory_space<vmem>>, vector<1x128xf32>
    %252 = vector.broadcast %250 : vector<1x128xf32> to vector<64x128xf32>
    %253 = vector.broadcast %246 : vector<64x1xf32> to vector<64x128xf32>
    %254 = arith.cmpf oeq, %252, %253 : vector<64x128xf32>
    %cst_113 = arith.constant 1.000000e+00 : f32
    %255 = vector.broadcast %cst_113 : f32 to vector<64x1xf32>
    %256 = arith.subf %255, %248 : vector<64x1xf32>
    %cst_114 = arith.constant 0.000000e+00 : f32
    %257 = vector.shape_cast %256 : vector<64x1xf32> to vector<64x1xf32>
    %258 = vector.broadcast %257 : vector<64x1xf32> to vector<64x128xf32>
    %259 = vector.broadcast %cst_114 : f32 to vector<64x128xf32>
    %260 = arith.select %254, %258, %259 : vector<64x128xi1>, vector<64x128xf32>
    %cst_115 = arith.constant 1.000000e+00 : f32
    %261 = vector.broadcast %cst_115 : f32 to vector<64x1xf32>
    %262 = arith.addf %246, %261 : vector<64x1xf32>
    %263 = vector.broadcast %250 : vector<1x128xf32> to vector<64x128xf32>
    %264 = vector.broadcast %262 : vector<64x1xf32> to vector<64x128xf32>
    %265 = arith.cmpf oeq, %263, %264 : vector<64x128xf32>
    %cst_116 = arith.constant 0.000000e+00 : f32
    %266 = vector.shape_cast %248 : vector<64x1xf32> to vector<64x1xf32>
    %267 = vector.broadcast %266 : vector<64x1xf32> to vector<64x128xf32>
    %268 = vector.broadcast %cst_116 : f32 to vector<64x128xf32>
    %269 = arith.select %265, %267, %268 : vector<64x128xi1>, vector<64x128xf32>
    %270 = arith.addf %260, %269 : vector<64x128xf32>
    %271 = vector.broadcast %251 : vector<1x128xf32> to vector<64x128xf32>
    %272 = vector.broadcast %247 : vector<64x1xf32> to vector<64x128xf32>
    %273 = arith.cmpf oeq, %271, %272 : vector<64x128xf32>
    %cst_117 = arith.constant 1.000000e+00 : f32
    %274 = vector.broadcast %cst_117 : f32 to vector<64x1xf32>
    %275 = arith.subf %274, %249 : vector<64x1xf32>
    %cst_118 = arith.constant 0.000000e+00 : f32
    %276 = vector.shape_cast %275 : vector<64x1xf32> to vector<64x1xf32>
    %277 = vector.broadcast %276 : vector<64x1xf32> to vector<64x128xf32>
    %278 = vector.broadcast %cst_118 : f32 to vector<64x128xf32>
    %279 = arith.select %273, %277, %278 : vector<64x128xi1>, vector<64x128xf32>
    %cst_119 = arith.constant 1.000000e+00 : f32
    %280 = vector.broadcast %cst_119 : f32 to vector<64x1xf32>
    %281 = arith.addf %247, %280 : vector<64x1xf32>
    %282 = vector.broadcast %251 : vector<1x128xf32> to vector<64x128xf32>
    %283 = vector.broadcast %281 : vector<64x1xf32> to vector<64x128xf32>
    %284 = arith.cmpf oeq, %282, %283 : vector<64x128xf32>
    %cst_120 = arith.constant 0.000000e+00 : f32
    %285 = vector.shape_cast %249 : vector<64x1xf32> to vector<64x1xf32>
    %286 = vector.broadcast %285 : vector<64x1xf32> to vector<64x128xf32>
    %287 = vector.broadcast %cst_120 : f32 to vector<64x128xf32>
    %288 = arith.select %284, %286, %287 : vector<64x128xi1>, vector<64x128xf32>
    %289 = arith.addf %279, %288 : vector<64x128xf32>
    %290 = arith.mulf %270, %289 : vector<64x128xf32>
    %291 = tpu.concatenate %95, %158, %227, %290 in 1 : vector<64x256xf32>, vector<64x128xf32>, vector<64x256xf32>, vector<64x128xf32> -> vector<64x768xf32>
    %c0_121 = arith.constant 0 : index
    %c0_122 = arith.constant 0 : index
    %292 = vector.load %arg20[%c0_121, %c0_122] : memref<768x128xf32, #tpu.memory_space<vmem>>, vector<768x128xf32>
    %cst_123 = arith.constant dense<0.000000e+00> : vector<64x128xf32>
    %293 = tpu.matmul %291, %292, %cst_123 {dimension_numbers = #tpu.dot_dimension_numbers<[1], [0], [0], [1], [0, 0, 1, 1], [], []>} : vector<64x768xf32>, vector<768x128xf32>, vector<64x128xf32> -> vector<64x128xf32>
    %294 = arith.mulf %24, %293 : vector<64x128xf32>
    %c0_124 = arith.constant 0 : index
    %c0_125 = arith.constant 0 : index
    %295 = vector.load %arg13[%c0_124, %c0_125] : memref<8x64xf32, #tpu.memory_space<vmem>>, vector<8x64xf32>
    %cst_126 = arith.constant dense<0.000000e+00> : vector<8x128xf32>
    %296 = tpu.matmul %295, %294, %cst_126 {dimension_numbers = #tpu.dot_dimension_numbers<[1], [0], [0], [1], [0, 0, 1, 1], [], []>} : vector<8x64xf32>, vector<64x128xf32>, vector<8x128xf32> -> vector<8x128xf32>
    %c0_127 = arith.constant 0 : index
    %c0_128 = arith.constant 0 : index
    %297 = vector.load %arg14[%c0_127, %c0_128] : memref<128x32xf32, #tpu.memory_space<vmem>>, vector<128x32xf32>
    %cst_129 = arith.constant dense<0.000000e+00> : vector<8x32xf32>
    %298 = tpu.matmul %296, %297, %cst_129 {dimension_numbers = #tpu.dot_dimension_numbers<[1], [0], [0], [1], [0, 0, 1, 1], [], []>} : vector<8x128xf32>, vector<128x32xf32>, vector<8x32xf32> -> vector<8x32xf32>
    %c0_130 = arith.constant 0 : index
    %c0_131 = arith.constant 0 : index
    %299 = vector.load %arg7[%c0_130, %c0_131] : memref<32x32xf32, #tpu.memory_space<vmem>>, vector<32x32xf32>
    %cst_132 = arith.constant dense<0.000000e+00> : vector<8x32xf32>
    %300 = tpu.matmul %298, %299, %cst_132 {dimension_numbers = #tpu.dot_dimension_numbers<[1], [0], [0], [1], [0, 0, 1, 1], [], []>} : vector<8x32xf32>, vector<32x32xf32>, vector<8x32xf32> -> vector<8x32xf32>
    %c0_133 = arith.constant 0 : index
    %c0_134 = arith.constant 0 : index
    %301 = vector.load %arg8[%c0_133, %c0_134] : memref<1x32xf32, #tpu.memory_space<vmem>>, vector<1x32xf32>
    %302 = vector.broadcast %301 : vector<1x32xf32> to vector<8x32xf32>
    %303 = arith.addf %300, %302 : vector<8x32xf32>
    %304 = arith.addf %303, %1 : vector<8x32xf32>
    %c0_135 = arith.constant 0 : index
    %c0_136 = arith.constant 0 : index
    %c0_137 = arith.constant 0 : index
    %305 = vector.load %arg19[%c0_135, %c0_136, %c0_137] : memref<1x8x32xf32, #tpu.memory_space<vmem>>, vector<1x8x32xf32>
    %306 = vector.shape_cast %305 : vector<1x8x32xf32> to vector<8x32xf32>
    %307 = vector.shape_cast %304 : vector<8x32xf32> to vector<1x8x32xf32>
    tpu.vector_store %arg19[%c0_135, %c0_136, %c0_137], %307 {strides = array<i32>} : memref<1x8x32xf32, #tpu.memory_space<vmem>>, vector<1x8x32xf32>,
    return
  }
  func.func @transform_0(%arg0: i32) -> (i32, i32, i32) {
    %c0_i32 = arith.constant 0 : i32
    %c0_i32_0 = arith.constant 0 : i32
    %c0_i32_1 = arith.constant 0 : i32
    return %arg0, %c0_i32, %c0_i32_0 : i32, i32, i32
  }
  func.func @transform_1(%arg0: i32) -> (i32, i32, i32) {
    %c0_i32 = arith.constant 0 : i32
    %c0_i32_0 = arith.constant 0 : i32
    %c0_i32_1 = arith.constant 0 : i32
    return %arg0, %c0_i32, %c0_i32_0 : i32, i32, i32
  }
  func.func @transform_2(%arg0: i32) -> (i32, i32, i32, i32) {
    %c0_i32 = arith.constant 0 : i32
    %c0_i32_0 = arith.constant 0 : i32
    %c0_i32_1 = arith.constant 0 : i32
    %c0_i32_2 = arith.constant 0 : i32
    return %arg0, %c0_i32, %c0_i32_0, %c0_i32_1 : i32, i32, i32, i32
  }
  func.func @transform_3(%arg0: i32) -> (i32, i32, i32, i32) {
    %c0_i32 = arith.constant 0 : i32
    %c0_i32_0 = arith.constant 0 : i32
    %c0_i32_1 = arith.constant 0 : i32
    %c0_i32_2 = arith.constant 0 : i32
    return %arg0, %c0_i32, %c0_i32_0, %c0_i32_1 : i32, i32, i32, i32
  }
  func.func @transform_4(%arg0: i32) -> (i32, i32) {
    %c0_i32 = arith.constant 0 : i32
    %c0_i32_0 = arith.constant 0 : i32
    %c0_i32_1 = arith.constant 0 : i32
    return %c0_i32, %c0_i32_0 : i32, i32
  }
  func.func @transform_5(%arg0: i32) -> (i32, i32) {
    %c0_i32 = arith.constant 0 : i32
    %c0_i32_0 = arith.constant 0 : i32
    %c0_i32_1 = arith.constant 0 : i32
    return %c0_i32, %c0_i32_0 : i32, i32
  }
  func.func @transform_6(%arg0: i32) -> (i32, i32) {
    %c0_i32 = arith.constant 0 : i32
    %c0_i32_0 = arith.constant 0 : i32
    %c0_i32_1 = arith.constant 0 : i32
    return %c0_i32, %c0_i32_0 : i32, i32
  }
  func.func @transform_7(%arg0: i32) -> (i32, i32) {
    %c0_i32 = arith.constant 0 : i32
    %c0_i32_0 = arith.constant 0 : i32
    %c0_i32_1 = arith.constant 0 : i32
    return %c0_i32, %c0_i32_0 : i32, i32
  }
  func.func @transform_8(%arg0: i32) -> (i32, i32) {
    %c0_i32 = arith.constant 0 : i32
    %c0_i32_0 = arith.constant 0 : i32
    %c0_i32_1 = arith.constant 0 : i32
    return %c0_i32, %c0_i32_0 : i32, i32
  }
  func.func @transform_9(%arg0: i32) -> (i32, i32) {
    %c0_i32 = arith.constant 0 : i32
    %c0_i32_0 = arith.constant 0 : i32
    %c0_i32_1 = arith.constant 0 : i32
    return %c0_i32, %c0_i32_0 : i32, i32
  }
  func.func @transform_10(%arg0: i32) -> (i32, i32) {
    %c0_i32 = arith.constant 0 : i32
    %c0_i32_0 = arith.constant 0 : i32
    %c0_i32_1 = arith.constant 0 : i32
    return %c0_i32, %c0_i32_0 : i32, i32
  }
  func.func @transform_11(%arg0: i32) -> (i32, i32) {
    %c0_i32 = arith.constant 0 : i32
    %c0_i32_0 = arith.constant 0 : i32
    %c0_i32_1 = arith.constant 0 : i32
    return %c0_i32, %c0_i32_0 : i32, i32
  }
  func.func @transform_12(%arg0: i32) -> (i32, i32) {
    %c0_i32 = arith.constant 0 : i32
    %c0_i32_0 = arith.constant 0 : i32
    %c0_i32_1 = arith.constant 0 : i32
    return %c0_i32, %c0_i32_0 : i32, i32
  }
  func.func @transform_13(%arg0: i32) -> (i32, i32) {
    %c0_i32 = arith.constant 0 : i32
    %c0_i32_0 = arith.constant 0 : i32
    %c0_i32_1 = arith.constant 0 : i32
    return %c0_i32, %c0_i32_0 : i32, i32
  }
  func.func @transform_14(%arg0: i32) -> (i32, i32) {
    %c0_i32 = arith.constant 0 : i32
    %c0_i32_0 = arith.constant 0 : i32
    %c0_i32_1 = arith.constant 0 : i32
    return %c0_i32, %c0_i32_0 : i32, i32
  }
  func.func @transform_15(%arg0: i32) -> (i32, i32) {
    %c0_i32 = arith.constant 0 : i32
    %c0_i32_0 = arith.constant 0 : i32
    %c0_i32_1 = arith.constant 0 : i32
    return %c0_i32, %c0_i32_0 : i32, i32
  }
  func.func @transform_16(%arg0: i32) -> (i32, i32) {
    %c0_i32 = arith.constant 0 : i32
    %c0_i32_0 = arith.constant 0 : i32
    %c0_i32_1 = arith.constant 0 : i32
    return %c0_i32, %c0_i32_0 : i32, i32
  }
  func.func @transform_17(%arg0: i32) -> (i32, i32) {
    %c0_i32 = arith.constant 0 : i32
    %c0_i32_0 = arith.constant 0 : i32
    %c0_i32_1 = arith.constant 0 : i32
    return %c0_i32, %c0_i32_0 : i32, i32
  }
  func.func @transform_18(%arg0: i32) -> (i32, i32, i32) {
    %c0_i32 = arith.constant 0 : i32
    %c0_i32_0 = arith.constant 0 : i32
    %c0_i32_1 = arith.constant 0 : i32
    return %arg0, %c0_i32, %c0_i32_0 : i32, i32, i32
  }
}

</mosaic_0001>

<bundles_post_ra>
// kernel: custom-call.11
= control target key start
LH: loop header
LB: loop body
LE: loop exit
PB: predicated region body
PF: predicated region fallthrough
CT: control target
= control target key end

     0   :  { %s1074_s0 = inlined_call_operand.hbm [shape: f32[2,2,4,4], index: 0, kind: input, shape index: {}]   ;;  %s1075_s1 = inlined_call_operand.vmem [shape: f32[2,2,4,4], index: 1, kind: output, shape index: {0}]   ;;  %s1076_s2 = inlined_call_operand.hbm [shape: s32[2,2,4], index: 2, kind: output, shape index: {1}]   ;;  %s1077_s3 = inlined_call_operand.vmem [shape: s32[2,2,4], index: 3, kind: output, shape index: {2}]  }
   0x1   :  { %1081 = sst [smem:[#allocation15_spill]] %s1074_s0 }
   0x2   :  { %5 = vsyncpa [#allocation2], 0 }
   0x3   :  { %7 = vsyncpa [#allocation2 + $0x1], 0 }
   0x4   :  { %8 = vsyncpa [#allocation3], 0 }
   0x5   :  { %10 = vsyncpa [#allocation3 + $0x1], 0  ;;  %s860_s12 = smov 0   ;;  %s862_s13 = smov 0  }
   0x6   :  { %s864_s14 = smov 0   ;;  %s866_s15 = smov 0  }
   0x7   :  { %s868_s16 = smov 0   ;;  %s870_s17 = smov 0  }
   0x8   :  { %s872_s18 = smov 0   ;;  %s874_s19 = smov 0  }
   0x9 LB: > { %s596_s20 = sadd.s32 4294967295, %s833_s19   ;;  %s597_s21 = sadd.s32 4294967294, %s833_s19   ;;  %s833_s19 = sphi %s874_s19, %s16_s19   ;;  %s829_s18 = sphi %s872_s18, %s1098_s18   ;;  %s825_s17 = sphi %s870_s17, %s1097_s17   ;;  %s821_s16 = sphi %s868_s16, %s1096_s16   ;;  %s817_s15 = sphi %s866_s15, %s1095_s15   ;;  %s813_s14 = sphi %s864_s14, %s1094_s14   ;;  %s809_s13 = sphi %s862_s13, %s1093_s13   ;;  %s805_s12 = sphi %s860_s12, %s1092_s12  }
   0xa   : > { %s25_s22 = sadd.s32 1, %s825_s17  ;;  %s28_s23 = sadd.s32 1, %s829_s18 }
   0xb   : > { %p26_p0 = scmp.ge.s32.totalorder %s25_s22, 2  ;;  %s32_s24 = sshrl.u32 %s825_s17, 3 }
   0xc   : > { %s39_s25 = sadd.s32 1, %s813_s14  ;;  %p49_p1 = scmp.ne.s32.totalorder %s813_s14, %s809_s13 }
   0xd   : > { %s1100_s22 = smov (%p26_p0, %s25_s22), 0  ;;  %s1102_s23 = smov (!%p26_p0, %s28_s23), %s829_s18 }
   0xe   : > { %1082 = sst [smem:[#allocation13_spill]] %s1100_s22  ;;  %s33_s26 = sshrl.u32 %s1100_s22, 3 }
   0xf   : > { %p50_p2 = scmp.eq.s32.totalorder %s596_s20, 3  ;;  %p30_p3 = scmp.ge.s32.totalorder %s1102_s23, 2 }
  0x10   : > { %s35_s27 = ssub.s32 %s32_s24, %s33_s26  ;;  %p55_p5 = scmp.ne.s32.totalorder %s809_s13, %s805_s12 }
  0x11   : > { %p914_p4 = por %p50_p2, %p49_p1  ;;  %s1104_s23 = smov (%p30_p3, %s1102_s23), 0 }
  0x12   : > { %1084 = sst [smem:[#allocation14_spill]] %s1104_s23  ;;  %p56_p6 = scmp.eq.s32.totalorder %s597_s21, 3 }
  0x13   : > { %s34_s29 = ssub.s32 %s829_s18, %s1104_s23  ;;  %p628_p7 = scmp.lt.s32.totalorder %s833_s19, 4 }
  0x14   : > { %s36_s30 = sor.u32 %s35_s27, %s34_s29  ;;  %p925_p8 = por %p56_p6, %p55_p5 }
  0x15   : > { %p37_p9 = scmp.eq.s32.totalorder %s36_s30, 0  ;;  %s103_s5 = sand.u32 1, %s833_s19  }
  0x16   : > { %s600_s6 = sshll.u32 %s103_s5, 2  ;;  %s601_s8 = sshll.u32 %s829_s18, 1 }
  0x17   : > { %s931_s7 = scalar_select %p37_p9, %s813_s14, %s39_s25  }
  0x18   : > { %s111_s9 = sadd.s32 %s825_s17, %s601_s8  ;;  %s107_s10 = scalar_lea.vmem [#allocation1], %s600_s6 }
  0x19   : > { %s117_s11 = sshll.u32 %s107_s10, 4  ;;  %s602_s21 = sshll.u32 %s111_s9, 2  ;;  %s118_s11 = int_to_ptr.vmem [resolvable:$true] %s117_s11 }
  0x1a   : > { %s1086_s0 = sld [smem:[#allocation15_spill]]  ;;  %p603_p10 = scmp.ge.s32.totalorder %s833_s19, 1 }
  0x1b   : > { %p122_p11 = scmp.lt.s32.totalorder %s833_s19, 5  ;;  %s104_s30 = scalar_lea.sflag [#allocation2], %s103_s5 }
  0x1d   : > { %p123_p12 = pnand %p603_p10, %p122_p11 }
  0x1f   : > { %126 = sbr.rel (%p123_p12) target bundleno = 495 (0x1ef), region = 20 }
  0x20   : > { %s113_s27 = scalar_lea.hbm %s1086_s0, %s602_s21 }
  0x21   : > { %s115_s29 = sshll.u32 %s113_s27, 4  ;;  %s116_s29 = int_to_ptr.hbm [resolvable:$true] %s115_s29 }
  0x22   : > { %621 = dma.hbm_to_vmem [thread:$0]  (%p628_p7), %s116_s29, 64, %s118_s11, %s104_s30  }
  0x24   : > { %s128_s25 = sand.u32 1, %s596_s20  }
  0x25   : > { %s129_s6 = scalar_lea.sflag [#allocation2], %s128_s25 }
  0x26   : > { %797 = dma.done.wait %s129_s6, 64  }
  0x27   : > { %798 = vsyncadd %s129_s6, 4294967232  ;;  %s604_s8 = sshll.u32 %s128_s25, 2  ;;  %s165_s9 = sand.u32 7, %s817_s15   ;;  %v170_v0 = vlaneseq  ;;  %v839_v2 = vmov 0  }
  0x28   : > { %s948_s5 = scalar_lea.vmem [#allocation6], %s165_s9  ;;  %s1078_s10 = sand.u32 1, %s809_s13  }
  0x29   : > { %v946_v1 = vshrl.u32 %v170_v0, 7  ;;  %169 = vst [vmem:[%s948_s5] sm:$0x1] %v839_v2  ;;  %s955_s20 = sshll.u32 %s1078_s10, 1  ;;  %s139_s11 = scalar_lea.vmem [#allocation1], %s604_s8 }
  0x2a   : > { %v159_v3 = vld [vmem:[%s139_s11] sm:$0xf]  ;;  %s957_s21 = scalar_lea.vmem [#allocation5], %s604_s8  ;;  %s150_s24 = scalar_lea.vmem [#allocation7], %s955_s20 }
  0x2b   : > { %174 = vst [vmem:[#allocation10] sm:$0xff] %v946_v1  ;;  %s961_s27 = scalar_lea.vmem [#allocation8], %s165_s9  ;;  %s963_s29 = smov 0  }
  0x2c   : > { %160 = vst [vmem:[#allocation0] sm:$0xf] %v159_v3 }
  0x33   : > { %v163_v4 = vld [vmem:[#allocation0] sm:$0xff] }
  0x34   : > { %164 = vst [vmem:[#allocation4] sm:$0xff] %v163_v4 }
  0x35 LB: >> { %vm190_vm0 = vcmp.lt.s32.totalorder %v946_v1, 4  ;;  %v970_v7 = vstv %s837_s29  ;;  %s231_s30 = ssub.s32 128, %s837_s29  ;;  %v237_v38 = vand.u32 127, %v170_v0  ;;  %s243_s25 = scalar_lea.vmem [#allocation4], %s837_s29  ;;  %v240_v41 = vld [vmem:[%s948_s5] ss:$0 sm:$0xff]  ;;  %s837_s29 = sphi %s963_s29, %s180_s29  }
  0x36   : >> { %vm189_vm1 = vcmp.ge.s32.totalorder %v946_v1, %v970_v7  ;;  %s249_s9 = scalar_lea.vmem [#allocation10], %s837_s29  ;;  %vm269_vm14 = vcmp.gt.s32.totalorder %v946_v1, %v970_v7  ;;  %s180_s29 = sadd.s32 1, %s837_s29  }
  0x37   : >> { %vm191_vm3 = vmand %vm189_vm1, %vm190_vm0  ;;  %vm238_vm12 = vcmp.eq.s32.totalorder %v237_v38, %v970_v7  ;;  %v251_v43 = vld [vmem:[%s249_s9] ss:$0 sm:$0xff]  ;;  %p177_p13 = scmp.ge.s32.totalorder %s180_s29, 4  }
  0x38   : > { %s420_s10 = sshll.u32 (%p177_p13), %s150_s24, 4  ;;  %s753_s23 = scalar_lea.hbm (%p177_p13), %s1076_s2, 4  ;;  %s421_s10 = int_to_ptr.vmem [resolvable:$true] %s420_s10 }
  0x3b   : >> { %v185_v5 = vld [vmem:[#allocation4] sm:$0xff]  ;;  %v245_v39 = vld [vmem:[%s243_s25] ss:$0 sm:$0xff] }
  0x3c   : >> { %v186_v6 = vand.u32 2147483647, %v185_v5 }
  0x3e   : >> { %vm608_vm2 = vcmp.gt.f32.partialorder %v186_v6, -inf }
  0x3f   : >> { %vm193_vm4 = vmand %vm191_vm3, %vm608_vm2 }
  0x40   : >> { %v194_v8 = vsel %vm193_vm4, %v946_v1, %v970_v7  ;;  %v195_v9 = vsel %vm193_vm4, %v186_v6, -inf  ;;  %vm286_vm4 = vmand %vm269_vm14, %vm238_vm12 }
  0x41   : >> { %v196_v10 = vrot.slane %v195_v9, 1  ;;  %v197_v11 = vrot.slane %v194_v8, 1 }
  0x43   : >> { %vm198_vm5 = vcmp.ge.f32.partialorder %v196_v10, %v195_v9  ;;  %v201_v12 = vrot.slane %v196_v10, 1  ;;  %v202_v13 = vrot.slane %v197_v11, 1 }
  0x44   : >> { %v199_v14 = vsel %vm198_vm5, %v196_v10, %v195_v9  ;;  %v200_v15 = vsel %vm198_vm5, %v197_v11, %v194_v8  ;;  %vm261_vm5 = vcmp.gt.s32.totalorder %v237_v38, %v970_v7 }
  0x45   : >> { %vm203_vm6 = vcmp.ge.f32.partialorder %v201_v12, %v199_v14  ;;  %v206_v16 = vrot.slane %v201_v12, 1  ;;  %v207_v17 = vrot.slane %v202_v13, 1 }
  0x46   : >> { %v204_v18 = vsel %vm203_vm6, %v201_v12, %v199_v14  ;;  %v205_v19 = vsel %vm203_vm6, %v202_v13, %v200_v15 }
  0x47   : >> { %vm208_vm7 = vcmp.ge.f32.partialorder %v206_v16, %v204_v18  ;;  %v211_v20 = vrot.slane %v206_v16, 1  ;;  %v212_v21 = vrot.slane %v207_v17, 1 }
  0x48   : >> { %v209_v22 = vsel %vm208_vm7, %v206_v16, %v204_v18  ;;  %v210_v23 = vsel %vm208_vm7, %v207_v17, %v205_v19 }
  0x49   : >> { %vm213_vm8 = vcmp.ge.f32.partialorder %v211_v20, %v209_v22  ;;  %v216_v24 = vrot.slane %v211_v20, 1  ;;  %v217_v25 = vrot.slane %v212_v21, 1 }
  0x4a   : >> { %v214_v26 = vsel %vm213_vm8, %v211_v20, %v209_v22  ;;  %v215_v27 = vsel %vm213_vm8, %v212_v21, %v210_v23 }
  0x4b   : >> { %vm218_vm9 = vcmp.ge.f32.partialorder %v216_v24, %v214_v26  ;;  %v221_v28 = vrot.slane %v216_v24, 1  ;;  %v222_v29 = vrot.slane %v217_v25, 1 }
  0x4c   : >> { %v219_v30 = vsel %vm218_vm9, %v216_v24, %v214_v26  ;;  %v220_v31 = vsel %vm218_vm9, %v217_v25, %v215_v27 }
  0x4d   : >> { %vm223_vm10 = vcmp.ge.f32.partialorder %v221_v28, %v219_v30  ;;  %v226_v32 = vrot.slane %v221_v28, 1  ;;  %v227_v33 = vrot.slane %v222_v29, 1 }
  0x4e   : >> { %v224_v34 = vsel %vm223_vm10, %v221_v28, %v219_v30  ;;  %v225_v35 = vsel %vm223_vm10, %v222_v29, %v220_v31 }
  0x4f   : >> { %vm228_vm11 = vcmp.ge.f32.partialorder %v226_v32, %v224_v34 }
  0x50   : >> { %v230_v36 = vsel %vm228_vm11, %v227_v33, %v225_v35 }
  0x51   : >> { %232 = vrot.lane.b32.xlu0 %v230_v36, %s231_s30  ;;  %s413_s30 = sshrl.u32 (%p177_p13), %s817_s15, 3 }
  0xc3   : >> { %v233_v37 = vpop.permute.xlu0 %232 }
  0xc4   : >> { %618 = vpush %v233_v37 }
  0xf5   : >> { %s619_s6 = spop %618 }
  0xf6   : >> { %v239_v40 = vstv %s619_s6  ;;  %s244_s8 = scalar_lea.vmem [#allocation4], %s619_s6  ;;  %s250_s11 = scalar_lea.vmem [#allocation10], %s619_s6 }
  0xf7   : >> { %v246_v42 = vld [vmem:[%s244_s8] ss:$0 sm:$0xff]  ;;  %v241_v45 = vsel %vm238_vm12, %v239_v40, %v240_v41  ;;  %s612_s6 = sshll.u32 (%p177_p13), %s821_s16, 1 }
  0xf8   : >> { %v252_v44 = vld [vmem:[%s250_s11] ss:$0 sm:$0xff]  ;;  %247 = vst [vmem:[%s244_s8] sm:$0x1] %v245_v39  ;;  %vm255_vm13 = vcmp.ne.f32.partialorder %v246_v42, 0.0  ;;  %v262_v61 = vsel %vm261_vm5, %v246_v42, 0.0  ;;  %s374_s29 = sadd.s32 (%p177_p13), %s817_s15, %s612_s6  ;;  %s1087_s15 = sand.u32 (%p177_p13), 1, %s809_s13  }
  0xf9   : >> { %248 = vst [vmem:[%s243_s25] sm:$0x1] %v246_v42  ;;  %vm256_vm15 = vmand %vm238_vm12, %vm255_vm13  ;;  %s1003_s25 = sadd.s32 (%p177_p13), %s821_s16, %s413_s30  ;;  %s613_s26 = sshll.u32 (%p177_p13), %s374_s29, 2 }
  0xfa   : >> { %253 = vst [vmem:[%s250_s11] sm:$0x1] %v251_v43  ;;  %v257_v46 = vsel %vm256_vm15, %v246_v42, 1.0  ;;  %s614_s8 = sshll.u32 (%p177_p13), %s1003_s25, 1  ;;  %s376_s22 = scalar_lea.vmem (%p177_p13), %s1075_s1, %s613_s26 }
  0xfb   : >> { %254 = vst [vmem:[%s249_s9] sm:$0x1] %v252_v44  ;;  %v270_v47 = vsel %vm269_vm14, %v257_v46, 1.0  ;;  %s418_s11 = scalar_lea.hbm (%p177_p13), %s1076_s2, %s614_s8  ;;  %s365_s16 = scalar_lea.sflag (%p177_p13), [#allocation3], %s1087_s15 }
  0xfc   : >> { %703 = vrcp.f32 %v270_v47  ;;  %242 = vst [vmem:[%s948_s5] sm:$0x1] %v241_v45  ;;  %v282_v51 = vand.u32 2147483648, %v270_v47  ;;  %v280_v53 = vand.u32 2147483647, %v270_v47  ;;  %vm276_vm1 = vweird.f32 %v270_v47  ;;  %s422_s0 = sshll.u32 (%p177_p13), %s418_s11, 4  ;;  %s423_s0 = int_to_ptr.hbm [resolvable:$true] %s422_s0 }
  0xfd   : > { %s747_s6 = sshra.s32 (%p177_p13), %s423_s0, 4  ;;  %s748_s6 = int_to_ptr.hbm [resolvable:$true] %s747_s6 }
  0xfe   : >> { %v283_v55 = vor.u32 1.1754944e-38, %v282_v51  ;;  %vm281_vm3 = vcmp.eq.f32.partialorder %v280_v53, 8.507059e+37  ;;  %s749_s5 = scalar_lea.hbm (%p177_p13), %s748_s6, 2  ;;  %p754_p3 = scmp.lt.s32.totalorder (%p177_p13), %s748_s6, %s1076_s2 }
  0xff   : > { %p750_p0 = scmp.ne.s32.totalorder (%p177_p13), %s748_s6, %s749_s5  ;;  %p755_p5 = scmp.lt.s32.totalorder (%p177_p13), %s753_s23, %s749_s5 }
 0x100   : >> { %v266_v57 = vld [vmem:[#allocation4] sm:$0xff] }
 0x101   : > { %p751_p1 = pnand (%p177_p13), %p750_p0, %p914_p4  ;;  %p756_p6 = por (%p177_p13), %p755_p5, %p754_p3 }
 0x102   : >> { %v704_v48 = vpop.eup %703  ;;  %v293_v3 = vld [vmem:[#allocation10] sm:$0xff] (%p177_p13) }
 0x103   : >> { %v272_v49 = vmul.f32 %v704_v48, %v270_v47  ;;  %vm277_vm0 = vweird.f32 %v704_v48  ;;  %v350_v0 = vld [vmem:[#allocation6] sm:$0x3] (%p177_p13)  ;;  %p752_p2 = pneg (%p177_p13), %p751_p1 }
 0x104   : >> { %vm278_vm2 = vmor %vm276_vm1, %vm277_vm0  ;;  %353 = vst [vmem:[%s150_s24] sm:$0x3] (%p177_p13), %v350_v0 }
 0x105   : >> { %v273_v50 = vsub.f32 1.0, %v272_v49  ;;  %p757_p7 = pnand (%p177_p13), %p756_p6, %p752_p2 }
 0x107   : >> { %v274_v52 = vmul.f32 %v704_v48, %v273_v50 }
 0x109   : >> { %v275_v54 = vadd.f32 %v704_v48, %v274_v52 }
 0x10b   : >> { %v279_v56 = vsel %vm278_vm2, %v704_v48, %v275_v54 }
 0x10c   : >> { %v284_v58 = vsel %vm281_vm3, %v283_v55, %v279_v56 }
 0x10d   : >> { %v285_v59 = vmul.f32 %v284_v58, %v266_v57 }
 0x10f   : >> { %v287_v60 = vsel %vm286_vm4, %v285_v59, 0.0 }
 0x110   : >> { %288 = vadd.xlane.f32.xlu0 %v287_v60 }
 0x139   : > { %309 = vxpose.xlu0.b32.start.end [1/1] (short) (narrow) (%p177_p13), %v293_v3, 8 }
 0x183   : >> { %v289_v62 = vpop.xlane.xlu0 %288 }
 0x184   : >> { %v290_v63 = vmul.f32 %v289_v62, %v262_v61  ;;  %179 = sbr.rel (!%p177_p13) target bundleno = 53 (0x35), region = 173 }
 0x186   : >> { %v291_v2 = vsub.f32 %v285_v59, %v290_v63 }
 0x188   : >> { %292 = vst [vmem:[#allocation4] sm:$0xff] %v291_v2 }
 0x18f   : > { %v344_v4 = vld [vmem:[#allocation4] sm:$0xf] }
 0x190   : > { %347 = vst [vmem:[%s957_s21] sm:$0xf] %v344_v4 }
 0x197   : > { %v393_v1 = vld [vmem:[%s957_s21] sm:$0xf] }
 0x198   : > { %394 = vst [vmem:[%s376_s22] sm:$0xf] %v393_v1 }
 0x199   : > { %760 = shalt.err (!%p757_p7)
}
 0x19a   : > { %622 = dma.vmem_to_hbm [thread:$0]  (%p914_p4), %s421_s10, 32, %s423_s0, %s365_s16  }
 0x19b   : > { %s1088_s22 = scalar_lea.vmem [#allocation9], %s955_s20  ;;  %s432_s30 = scalar_lea.vmem (%p914_p4), %s1077_s3, %s614_s8 }
 0x19c   : > { %s1089_s15 = scalar_lea.vmem (%p914_p4), [#allocation9], %s955_s20 }
 0x1dd   : > { %v325_v5 = vpop.trf.xlu0 }
 0x1de   : > { %341 = vst [vmem:[%s961_s27] sm:$0x1] %v325_v5 }
 0x1e2   : > { %428 = sbr.rel (!%p914_p4) target bundleno = 495 (0x1ef), region = 66 }
 0x1e5   : > { %v356_v6 = vld [vmem:[#allocation8] sm:$0x3] }
 0x1e6   : > { %359 = vst [vmem:[%s1088_s22] sm:$0x3] %v356_v6 }
 0x1ed   : > { %v449_v7 = vld [vmem:[%s1089_s15] sm:$0x3] }
 0x1ee   : > { %450 = vst [vmem:[%s432_s30] sm:$0x3] %v449_v7 }
 0x1ef PF: > { %p629_p9 = scmp.ge.s32.totalorder %s833_s19, 2  ;;  %s478_s0 = sand.u32 1, %s805_s12  }
 0x1f0   : > { %s479_s28 = scalar_lea.sflag [#allocation3], %s478_s0 }
 0x1f1   : > { %p625_p10 = pnand %p629_p9, %p925_p8 }
 0x1f3   : > { %p626_p4 = pneg %p625_p10 }
 0x1f5   : > { %800 = dma.done.wait (%p626_p4), %s479_s28, 32  }
 0x1f6   : > { %802 = vsyncadd (%p626_p4), %s479_s28, 4294967264  ;;  %s16_s19 = sadd.s32 1, %s833_s19   ;;  %s1090_s10 = sld [smem:[#allocation13_spill]] }
 0x1f7   : > { %p13_p11 = scmp.ge.s32.totalorder %s16_s19, 6   ;;  %s1091_s20 = sld [smem:[#allocation14_spill]] }
 0x1f8   : > { %s1092_s12 = smov %s809_s13  ;;  %s1093_s13 = smov %s813_s14 }
 0x1f9   : > { %s1094_s14 = smov %s931_s7  ;;  %s1095_s15 = smov %s825_s17 }
 0x1fa   : > { %s1096_s16 = smov %s829_s18  ;;  %15 = sbr.rel (!%p13_p11) target bundleno = 9 (0x9), region = 184 }
 0x1fc   : > { %s1097_s17 = smov %s1090_s10 }
 0x1fd   : > { %s1098_s18 = smov %s1091_s20 }
 0x1ff   :  { %492 = vsyncpa [#allocation2], 1 }
 0x200   :  { %494 = vsyncpa [#allocation2 + $0x1], 1 }
 0x201   :  { %495 = vsyncpa [#allocation3], 1 }
 0x202   :  { %497 = vsyncpa [#allocation3 + $0x1], 1 }

// kernel: custom-call.12
= control target key start
LH: loop header
LB: loop body
LE: loop exit
PB: predicated region body
PF: predicated region fallthrough
CT: control target
= control target key end

     0   :  { %s437_s6 = smov 0   ;;  %s439_s7 = smov 0   ;;  %s508_s0 = inlined_call_operand.vmem [shape: f32[2,2,1,4,4], index: 0, kind: input, shape index: {}]   ;;  %s509_s1 = inlined_call_operand.vmem [shape: f32[2,2,1,4,4], index: 1, kind: output, shape index: {}]  }
   0x1   :  { %s441_s8 = smov 0   ;;  %s443_s9 = smov 0  }
   0x2   :  { %s445_s10 = smov 0  }
   0x3 LB: > { %s329_s11 = sadd.s32 4294967295, %s424_s10   ;;  %s36_s12 = sadd.s32 1, %s416_s8  ;;  %s424_s10 = sphi %s445_s10, %s7_s10   ;;  %s420_s9 = sphi %s443_s9, %s513_s9   ;;  %s416_s8 = sphi %s441_s8, %s512_s8   ;;  %s412_s7 = sphi %s439_s7, %s511_s7   ;;  %s408_s6 = sphi %s437_s6, %s510_s6  }
   0x4   : > { %p38_p0 = scmp.ge.s32.totalorder %s36_s12, 2  ;;  %s40_s13 = sadd.s32 1, %s420_s9 }
   0x5   : > { %p331_p2 = scmp.ge.s32.totalorder %s424_s10, 4 }
   0x6   : > { %s515_s12 = smov (%p38_p0, %s36_s12), 0  ;;  %s517_s13 = smov (!%p38_p0, %s40_s13), %s420_s9 }
   0x7   : > { %p42_p1 = scmp.ge.s32.totalorder %s517_s13, 2  ;;  %54 = sbr.rel (%p331_p2) target bundleno = 15 (0xf), region = 16 }
   0x8   : > { %s56_s14 = sand.u32 (!%p331_p2), 1, %s424_s10   ;;  %s333_s15 = sshll.u32 (!%p331_p2), %s420_s9, 1 }
   0x9   : > { %s519_s13 = smov (%p42_p1, %s517_s13), 0  ;;  %s332_s16 = sshll.u32 (!%p331_p2), %s56_s14, 2 }
   0xa   : > { %s63_s17 = sadd.s32 (!%p331_p2), %s416_s8, %s333_s15  ;;  %s58_s22 = scalar_lea.vmem (!%p331_p2), [#allocation1], %s332_s16 }
   0xb   : > { %s334_s18 = sshll.u32 (!%p331_p2), %s63_s17, 2 }
   0xc   : > { %s65_s21 = scalar_lea.vmem %s508_s0, %s334_s18 }
   0xd   : > { %v82_v0 = vld [vmem:[%s65_s21] sm:$0xf] }
   0xe   : > { %83 = vst [vmem:[%s58_s22] sm:$0xf] %v82_v0 }
   0xf PF: > { %p335_p3 = scmp.ge.s32.totalorder %s424_s10, 1  ;;  %p100_p4 = scmp.lt.s32.totalorder %s424_s10, 5 }
  0x11   : > { %p101_p5 = pnand %p335_p3, %p100_p4 }
  0x13   : > { %104 = sbr.rel (%p101_p5) target bundleno = 559 (0x22f), region = 50 }
  0x18   : > { %s479_s23 = sand.u32 1, %s329_s11   ;;  %v122_v1 = vlaneseq  ;;  %v426_v20 = vmov -1.0   ;;  %s339_s26 = sshll.u32 %s412_s7, 1 }
  0x19   : > { %s336_s24 = sshll.u32 %s479_s23, 2  ;;  %s224_s27 = sadd.s32 %s408_s6, %s339_s26 }
  0x1a   : > { %s113_s25 = scalar_lea.vmem [#allocation1], %s336_s24  ;;  %v123_v3 = vand.u32 127, %v122_v1  ;;  %v126_v4 = vshrl.u32 %v122_v1, 7  ;;  %s117_s28 = scalar_lea.vmem [#allocation3], %s336_s24 }
  0x1b   : > { %v120_v2 = vld [vmem:[%s113_s25] sm:$0xf]  ;;  %s340_s29 = sshll.u32 %s224_s27, 2 }
  0x1c   : > { %121 = vst [vmem:[#allocation0] sm:$0xf] %v120_v2  ;;  %vm128_vm0 = vcmp.eq.s32.totalorder %v126_v4, %v123_v3  ;;  %vm124_vm1 = vcmp.lt.s32.totalorder %v123_v3, 4  ;;  %vm133_vm2 = vcmp.le.s32.totalorder %v126_v4, %v123_v3  ;;  %vm160_vm8 = vcmp.eq.s32.totalorder %v123_v3, 3  ;;  %s226_s3 = scalar_lea.vmem %s509_s1, %s340_s29 }
  0x1d   : > { %vm134_vm3 = vmand %vm133_vm2, %vm124_vm1  ;;  %vm157_vm9 = vcmp.eq.s32.totalorder %v123_v3, %v126_v4  ;;  %v161_v21 = vsel %vm160_vm8, 1.0, %v426_v20  ;;  %vm168_vm10 = vcmp.eq.s32.totalorder %v123_v3, 2  ;;  %vm178_vm11 = vcmp.eq.s32.totalorder %v123_v3, 1 }
  0x1e   : > { %v162_v22 = vsel %vm157_vm9, %v161_v21, 0.0  ;;  %vm187_vm12 = vcmp.eq.s32.totalorder %v123_v3, 0 }
  0x23   : > { %v129_v5 = vld [vmem:[#allocation0] sm:$0xff] }
  0x24   : > { %v130_v6 = vsel %vm128_vm0, %v129_v5, 0.0  ;;  %v135_v15 = vsel %vm134_vm3, %v129_v5, 0.0 }
  0x25   : > { %131 = vadd.xlane.f32.xlu0 %v130_v6 }
  0x98   : > { %v132_v7 = vpop.xlane.xlu0 %131 }
  0x99   : > { %384 = vrcp.f32 %v132_v7  ;;  %v147_v11 = vand.u32 2147483648, %v132_v7  ;;  %v145_v13 = vand.u32 2147483647, %v132_v7  ;;  %vm141_vm5 = vweird.f32 %v132_v7 }
  0x9b   : > { %v148_v16 = vor.u32 1.1754944e-38, %v147_v11  ;;  %vm146_vm7 = vcmp.eq.f32.partialorder %v145_v13, 8.507059e+37 }
  0x9f   : > { %v385_v8 = vpop.eup %384 }
  0xa0   : > { %v137_v9 = vmul.f32 %v385_v8, %v132_v7  ;;  %vm142_vm4 = vweird.f32 %v385_v8 }
  0xa1   : > { %vm143_vm6 = vmor %vm141_vm5, %vm142_vm4 }
  0xa2   : > { %v138_v10 = vsub.f32 1.0, %v137_v9 }
  0xa4   : > { %v139_v12 = vmul.f32 %v385_v8, %v138_v10 }
  0xa6   : > { %v140_v14 = vadd.f32 %v385_v8, %v139_v12 }
  0xa8   : > { %v144_v17 = vsel %vm143_vm6, %v385_v8, %v140_v14 }
  0xa9   : > { %v149_v18 = vsel %vm146_vm7, %v148_v16, %v144_v17 }
  0xaa   : > { %v150_v19 = vmul.f32 %v149_v18, %v135_v15 }
  0xac   : > { %151 = vst [vmem:[#allocation4] sm:$0xff] %v150_v19 }
  0xb3   : > { %v164_v23 = vld [vmem:[#allocation4 + $0x2] ss:$0 sm:$0xff]  ;;  %v174_v26 = vld [vmem:[#allocation4 + $0x1] ss:$0 sm:$0xff]  ;;  %v183_v31 = vld [vmem:[#allocation4] ss:$0 sm:$0xff] }
  0xb4   : > { %v165_v24 = vxor.u32 2147483648, %v164_v23  ;;  %v175_v28 = vxor.u32 2147483648, %v174_v26  ;;  %v184_v33 = vxor.u32 2147483648, %v183_v31 }
  0xb6   : > { %v169_v25 = vmul.f32 %v165_v24, %v162_v22 }
  0xb8   : > { %170 = vadd.xlane.f32.xlu0 %v169_v25 }
 0x12b   : > { %v171_v27 = vpop.xlane.xlu0 %170 }
 0x12c   : > { %v172_v29 = vsel %vm168_vm10, %v171_v27, %v162_v22 }
 0x12d   : > { %v179_v30 = vmul.f32 %v175_v28, %v172_v29 }
 0x12f   : > { %180 = vadd.xlane.f32.xlu1 %v179_v30 }
 0x1a2   : > { %v181_v32 = vpop.xlane.xlu1 %180 }
 0x1a3   : > { %v182_v34 = vsel %vm178_vm11, %v181_v32, %v172_v29 }
 0x1a4   : > { %v188_v35 = vmul.f32 %v184_v33, %v182_v34 }
 0x1a6   : > { %189 = vadd.xlane.f32.xlu1 %v188_v35 }
 0x219   : > { %v190_v36 = vpop.xlane.xlu1 %189 }
 0x21a   : > { %v191_v37 = vsel %vm187_vm12, %v190_v36, %v182_v34 }
 0x21b   : > { %v206_v38 = vmul.f32 %v191_v37, %v149_v18 }
 0x21d   : > { %v208_v39 = vsel %vm141_vm5, %v191_v37, %v206_v38 }
 0x21e   : > { %209 = vst [vmem:[#allocation2] sm:$0xff] %v208_v39 }
 0x225   : > { %v212_v40 = vld [vmem:[#allocation2] sm:$0xf] }
 0x226   : > { %215 = vst [vmem:[%s117_s28] sm:$0xf] %v212_v40 }
 0x22d   : > { %v243_v41 = vld [vmem:[%s117_s28] sm:$0xf] }
 0x22e   : > { %244 = vst [vmem:[%s226_s3] sm:$0xf] %v243_v41 }
 0x22f PF: > { %s7_s10 = sadd.s32 1, %s424_s10   ;;  %s510_s6 = smov %s416_s8 }
 0x230   : > { %p4_p6 = scmp.ge.s32.totalorder %s7_s10, 6   ;;  %s511_s7 = smov %s420_s9 }
 0x231   : > { %s512_s8 = smov %s515_s12  ;;  %s513_s9 = smov %s519_s13 }
 0x232   :  { %6 = sbr.rel (!%p4_p6) target bundleno = 3 (0x3), region = 112 }

// kernel: custom-call.13
= control target key start
LH: loop header
LB: loop body
LE: loop exit
PB: predicated region body
PF: predicated region fallthrough
CT: control target
= control target key end

     0   :  { %s438_s6 = smov 0   ;;  %s440_s7 = smov 0   ;;  %s509_s0 = inlined_call_operand.vmem [shape: f32[2,2,1,4,4], index: 0, kind: input, shape index: {}]   ;;  %s510_s1 = inlined_call_operand.vmem [shape: f32[2,2,1,4,4], index: 1, kind: output, shape index: {}]  }
   0x1   :  { %s442_s8 = smov 0   ;;  %s444_s9 = smov 0  }
   0x2   :  { %s446_s10 = smov 0  }
   0x3 LB: > { %s330_s11 = sadd.s32 4294967295, %s425_s10   ;;  %s36_s12 = sadd.s32 1, %s417_s8  ;;  %s425_s10 = sphi %s446_s10, %s7_s10   ;;  %s421_s9 = sphi %s444_s9, %s514_s9   ;;  %s417_s8 = sphi %s442_s8, %s513_s8   ;;  %s413_s7 = sphi %s440_s7, %s512_s7   ;;  %s409_s6 = sphi %s438_s6, %s511_s6  }
   0x4   : > { %p38_p0 = scmp.ge.s32.totalorder %s36_s12, 2  ;;  %s40_s13 = sadd.s32 1, %s421_s9 }
   0x5   : > { %p332_p2 = scmp.ge.s32.totalorder %s425_s10, 4 }
   0x6   : > { %s516_s12 = smov (%p38_p0, %s36_s12), 0  ;;  %s518_s13 = smov (!%p38_p0, %s40_s13), %s421_s9 }
   0x7   : > { %p42_p1 = scmp.ge.s32.totalorder %s518_s13, 2  ;;  %54 = sbr.rel (%p332_p2) target bundleno = 15 (0xf), region = 16 }
   0x8   : > { %s56_s14 = sand.u32 (!%p332_p2), 1, %s425_s10   ;;  %s334_s15 = sshll.u32 (!%p332_p2), %s421_s9, 1 }
   0x9   : > { %s520_s13 = smov (%p42_p1, %s518_s13), 0  ;;  %s333_s16 = sshll.u32 (!%p332_p2), %s56_s14, 2 }
   0xa   : > { %s63_s17 = sadd.s32 (!%p332_p2), %s417_s8, %s334_s15  ;;  %s58_s22 = scalar_lea.vmem (!%p332_p2), [#allocation1], %s333_s16 }
   0xb   : > { %s335_s18 = sshll.u32 (!%p332_p2), %s63_s17, 2 }
   0xc   : > { %s65_s21 = scalar_lea.vmem %s509_s0, %s335_s18 }
   0xd   : > { %v82_v0 = vld [vmem:[%s65_s21] sm:$0xf] }
   0xe   : > { %83 = vst [vmem:[%s58_s22] sm:$0xf] %v82_v0 }
   0xf PF: > { %p336_p3 = scmp.ge.s32.totalorder %s425_s10, 1  ;;  %p100_p4 = scmp.lt.s32.totalorder %s425_s10, 5 }
  0x11   : > { %p101_p5 = pnand %p336_p3, %p100_p4 }
  0x13   : > { %104 = sbr.rel (%p101_p5) target bundleno = 559 (0x22f), region = 50 }
  0x18   : > { %s480_s23 = sand.u32 1, %s330_s11   ;;  %v122_v1 = vlaneseq  ;;  %v427_v20 = vmov -1.0   ;;  %s340_s26 = sshll.u32 %s413_s7, 1 }
  0x19   : > { %s337_s24 = sshll.u32 %s480_s23, 2  ;;  %s225_s27 = sadd.s32 %s409_s6, %s340_s26 }
  0x1a   : > { %s113_s25 = scalar_lea.vmem [#allocation1], %s337_s24  ;;  %v123_v3 = vand.u32 127, %v122_v1  ;;  %v126_v4 = vshrl.u32 %v122_v1, 7  ;;  %s117_s28 = scalar_lea.vmem [#allocation3], %s337_s24 }
  0x1b   : > { %v120_v2 = vld [vmem:[%s113_s25] sm:$0xf]  ;;  %s341_s29 = sshll.u32 %s225_s27, 2 }
  0x1c   : > { %121 = vst [vmem:[#allocation0] sm:$0xf] %v120_v2  ;;  %vm128_vm0 = vcmp.eq.s32.totalorder %v126_v4, %v123_v3  ;;  %vm124_vm1 = vcmp.lt.s32.totalorder %v123_v3, 4  ;;  %vm133_vm2 = vcmp.ge.s32.totalorder %v126_v4, %v123_v3  ;;  %vm160_vm8 = vcmp.eq.s32.totalorder %v123_v3, 0  ;;  %s227_s3 = scalar_lea.vmem %s510_s1, %s341_s29 }
  0x1d   : > { %vm134_vm3 = vmand %vm133_vm2, %vm124_vm1  ;;  %vm157_vm9 = vcmp.eq.s32.totalorder %v123_v3, %v126_v4  ;;  %v161_v21 = vsel %vm160_vm8, 1.0, %v427_v20  ;;  %vm168_vm10 = vcmp.eq.s32.totalorder %v123_v3, 1  ;;  %vm178_vm11 = vcmp.eq.s32.totalorder %v123_v3, 2 }
  0x1e   : > { %v162_v22 = vsel %vm157_vm9, %v161_v21, 0.0  ;;  %vm188_vm12 = vcmp.eq.s32.totalorder %v123_v3, 3 }
  0x23   : > { %v129_v5 = vld [vmem:[#allocation0] sm:$0xff] }
  0x24   : > { %v130_v6 = vsel %vm128_vm0, %v129_v5, 0.0  ;;  %v135_v15 = vsel %vm134_vm3, %v129_v5, 0.0 }
  0x25   : > { %131 = vadd.xlane.f32.xlu0 %v130_v6 }
  0x98   : > { %v132_v7 = vpop.xlane.xlu0 %131 }
  0x99   : > { %385 = vrcp.f32 %v132_v7  ;;  %v147_v11 = vand.u32 2147483648, %v132_v7  ;;  %v145_v13 = vand.u32 2147483647, %v132_v7  ;;  %vm141_vm5 = vweird.f32 %v132_v7 }
  0x9b   : > { %v148_v16 = vor.u32 1.1754944e-38, %v147_v11  ;;  %vm146_vm7 = vcmp.eq.f32.partialorder %v145_v13, 8.507059e+37 }
  0x9f   : > { %v386_v8 = vpop.eup %385 }
  0xa0   : > { %v137_v9 = vmul.f32 %v386_v8, %v132_v7  ;;  %vm142_vm4 = vweird.f32 %v386_v8 }
  0xa1   : > { %vm143_vm6 = vmor %vm141_vm5, %vm142_vm4 }
  0xa2   : > { %v138_v10 = vsub.f32 1.0, %v137_v9 }
  0xa4   : > { %v139_v12 = vmul.f32 %v386_v8, %v138_v10 }
  0xa6   : > { %v140_v14 = vadd.f32 %v386_v8, %v139_v12 }
  0xa8   : > { %v144_v17 = vsel %vm143_vm6, %v386_v8, %v140_v14 }
  0xa9   : > { %v149_v18 = vsel %vm146_vm7, %v148_v16, %v144_v17 }
  0xaa   : > { %v150_v19 = vmul.f32 %v149_v18, %v135_v15 }
  0xac   : > { %151 = vst [vmem:[#allocation4] sm:$0xff] %v150_v19 }
  0xb3   : > { %v164_v23 = vld [vmem:[#allocation4 + $0x1] ss:$0 sm:$0xff]  ;;  %v174_v26 = vld [vmem:[#allocation4 + $0x2] ss:$0 sm:$0xff]  ;;  %v184_v31 = vld [vmem:[#allocation4 + $0x3] ss:$0 sm:$0xff] }
  0xb4   : > { %v165_v24 = vxor.u32 2147483648, %v164_v23  ;;  %v175_v28 = vxor.u32 2147483648, %v174_v26  ;;  %v185_v33 = vxor.u32 2147483648, %v184_v31 }
  0xb6   : > { %v169_v25 = vmul.f32 %v165_v24, %v162_v22 }
  0xb8   : > { %170 = vadd.xlane.f32.xlu0 %v169_v25 }
 0x12b   : > { %v171_v27 = vpop.xlane.xlu0 %170 }
 0x12c   : > { %v172_v29 = vsel %vm168_vm10, %v171_v27, %v162_v22 }
 0x12d   : > { %v179_v30 = vmul.f32 %v175_v28, %v172_v29 }
 0x12f   : > { %180 = vadd.xlane.f32.xlu1 %v179_v30 }
 0x1a2   : > { %v181_v32 = vpop.xlane.xlu1 %180 }
 0x1a3   : > { %v182_v34 = vsel %vm178_vm11, %v181_v32, %v172_v29 }
 0x1a4   : > { %v189_v35 = vmul.f32 %v185_v33, %v182_v34 }
 0x1a6   : > { %190 = vadd.xlane.f32.xlu1 %v189_v35 }
 0x219   : > { %v191_v36 = vpop.xlane.xlu1 %190 }
 0x21a   : > { %v192_v37 = vsel %vm188_vm12, %v191_v36, %v182_v34 }
 0x21b   : > { %v207_v38 = vmul.f32 %v192_v37, %v149_v18 }
 0x21d   : > { %v209_v39 = vsel %vm141_vm5, %v192_v37, %v207_v38 }
 0x21e   : > { %210 = vst [vmem:[#allocation2] sm:$0xff] %v209_v39 }
 0x225   : > { %v213_v40 = vld [vmem:[#allocation2] sm:$0xf] }
 0x226   : > { %216 = vst [vmem:[%s117_s28] sm:$0xf] %v213_v40 }
 0x22d   : > { %v244_v41 = vld [vmem:[%s117_s28] sm:$0xf] }
 0x22e   : > { %245 = vst [vmem:[%s227_s3] sm:$0xf] %v244_v41 }
 0x22f PF: > { %s7_s10 = sadd.s32 1, %s425_s10   ;;  %s511_s6 = smov %s417_s8 }
 0x230   : > { %p4_p6 = scmp.ge.s32.totalorder %s7_s10, 6   ;;  %s512_s7 = smov %s421_s9 }
 0x231   : > { %s513_s8 = smov %s516_s12  ;;  %s514_s9 = smov %s520_s13 }
 0x232   :  { %6 = sbr.rel (!%p4_p6) target bundleno = 3 (0x3), region = 113 }

// kernel: dfa_forward.1
= control target key start
LH: loop header
LB: loop body
LE: loop exit
PB: predicated region body
PF: predicated region fallthrough
CT: control target
= control target key end

     0   :  { %s6709_s0 = inlined_call_operand.vmem [shape: f32[2,8,32], index: 0, kind: input, shape index: {}]   ;;  %s6710_s1 = inlined_call_operand.vmem [shape: f32[2,8,32], index: 1, kind: input, shape index: {}]   ;;  %s6711_s2 = inlined_call_operand.vmem [shape: f32[2,2,64,2], index: 2, kind: input, shape index: {}]   ;;  %s6712_s3 = inlined_call_operand.vmem [shape: f32[2,2,320,32], index: 3, kind: input, shape index: {}]   ;;  %s6713_s4 = inlined_call_operand.vmem [shape: f32[32,128], index: 4, kind: input, shape index: {}]   ;;  %s6714_s5 = inlined_call_operand.vmem [shape: f32[1,128], index: 5, kind: input, shape index: {}]   ;;  %s6715_s6 = inlined_call_operand.vmem [shape: f32[32,32], index: 6, kind: input, shape index: {}]   ;;  %s6716_s7 = inlined_call_operand.vmem [shape: f32[1,32], index: 7, kind: input, shape index: {}]   ;;  %s6717_s8 = inlined_call_operand.vmem [shape: f32[128,128], index: 8, kind: input, shape index: {}]   ;;  %s6718_s9 = inlined_call_operand.vmem [shape: f32[64,8], index: 9, kind: input, shape index: {}]   ;;  %s6719_s10 = inlined_call_operand.vmem [shape: f32[64,128], index: 10, kind: input, shape index: {}]   ;;  %s6720_s11 = inlined_call_operand.vmem [shape: f32[128,128], index: 11, kind: input, shape index: {}]   ;;  %s6721_s12 = inlined_call_operand.vmem [shape: f32[8,64], index: 12, kind: input, shape index: {}]   ;;  %s6722_s13 = inlined_call_operand.vmem [shape: f32[128,32], index: 13, kind: input, shape index: {}]   ;;  %s6723_s14 = inlined_call_operand.vmem [shape: f32[1,256], index: 14, kind: input, shape index: {}]   ;;  %s6724_s15 = inlined_call_operand.vmem [shape: f32[1,256], index: 15, kind: input, shape index: {}]   ;;  %s6725_s16 = inlined_call_operand.vmem [shape: f32[1,128], index: 16, kind: input, shape index: {}]   ;;  %s6726_s17 = inlined_call_operand.vmem [shape: f32[1,128], index: 17, kind: input, shape index: {}]   ;;  %s6727_s18 = inlined_call_operand.hbm [shape: f32[2,8,32], index: 18, kind: output, shape index: {}]  }
   0x1   :  { %6830 = sst [smem:[#allocation125_spill]] %s6709_s0 }
   0x2   :  { %6831 = sst [smem:[#allocation126_spill]] %s6710_s1 }
   0x3   :  { %6832 = sst [smem:[#allocation127_spill]] %s6711_s2 }
   0x4   :  { %6833 = sst [smem:[#allocation128_spill]] %s6712_s3 }
   0x5   :  { %6834 = sst [smem:[#allocation129_spill]] %s6713_s4 }
   0x6   :  { %23 = vsyncpa [#allocation4], 0 }
   0x7   :  { %25 = vsyncpa [#allocation4 + $0x1], 0  ;;  %s4239_s27 = smov 0   ;;  %s4241_s28 = smov 0  }
   0x8   :  { %s4243_s29 = smov 0   ;;  %s4245_s30 = smov 0  }
   0x9 LB: > { %6835 = sst [smem:[#allocation6_spill]] %s4124_s27  ;;  %s4260_s0 = sadd.s32 4294967295, %s4136_s30   ;;  %s4136_s30 = sphi %s4245_s30, %s7100_s30   ;;  %s4132_s29 = sphi %s4243_s29, %s7102_s29   ;;  %s4128_s28 = sphi %s4241_s28, %s7104_s28   ;;  %s4124_s27 = sphi %s4239_s27, %s7103_s27  }
   0xa   : > { %6836 = sst [smem:[#allocation7_spill]] %s4132_s29  ;;  %s3837_s19 = sadd.s32 4294967294, %s4136_s30  }
   0xb   : > { %s4264_s1 = sadd.s32 1, %s4136_s30   ;;  %s436_s20 = sadd.s32 1, %s4132_s29 }
   0xc   : > { %6837 = sst [smem:[#allocation8_spill]] %s4264_s1  ;;  %s433_s21 = ssub.s32 %s4136_s30, %s4264_s1 }
   0xd   : > { %p446_p0 = scmp.ne.s32.totalorder %s4132_s29, %s4128_s28  ;;  %p434_p1 = scmp.eq.s32.totalorder %s433_s21, 0 }
   0xe   : > { %p447_p2 = scmp.eq.s32.totalorder %s4260_s0, 1  ;;  %p452_p3 = scmp.ne.s32.totalorder %s4128_s28, %s4124_s27 }
   0xf   : > { %p453_p4 = scmp.eq.s32.totalorder %s3837_s19, 1  ;;  %p3840_p7 = scmp.ge.s32.totalorder %s4136_s30, 1 }
  0x10   : > { %s4275_s22 = scalar_select %p434_p1, %s4132_s29, %s436_s20  }
  0x11   : > { %p4277_p5 = por %p447_p2, %p446_p0  ;;  %p4281_p6 = por %p453_p4, %p452_p3 }
  0x12   : > { %6838 = sst [smem:[#allocation9_spill]] %s4275_s22  ;;  %p543_p8 = scmp.lt.s32.totalorder %s4136_s30, 3 }
  0x13   : > { %s6840_s23 = scalar_select %p4281_p6, 1, 0 }
  0x14   : > { %p544_p9 = pnand %p3840_p7, %p543_p8 }
  0x15   : > { %6841 = sst [smem:[#allocation10_spill]] %s6840_s23 }
  0x16   : > { %547 = sbr.rel (%p544_p9) target bundleno = 1597 (0x63d), region = 92 }
  0x1b   : > { %s6842_s4 = sld [smem:[#allocation129_spill]]  ;;  %p610_p10 = scmp.lt.s32.totalorder %s4260_s0, 1  ;;  %v6740_v2 = vmov 0   ;;  %vm639_vm0 = vcmask 261120   ;;  %vm1601_vm1 = vcmask 523520   ;;  %vm2228_vm2 = vcmask 785920  }
  0x1c   : > { %4007 = vset.pattern.permute.xlu2 %v6740_v2  ;;  %4006 = vset.pattern.permute.xlu1 %v6740_v2  ;;  %s6843_s1 = sld [smem:[#allocation127_spill]]  ;;  %vm714_vm3 = vcmask 64512   ;;  %vm2833_vm4 = vcmask 1048320  }
  0x1d   : > { %4005 = vset.pattern.permute.xlu0 %v6740_v2  ;;  %s4301_s24 = scalar_select %p610_p10, %s4260_s0, 1 }
  0x1e   : > { %s6844_s26 = sld [smem:[#allocation125_spill]] }
  0x1f   : > { %s3942_s25 = sshll.u32 %s4301_s24, 7  ;;  %s3842_s20 = sshll.u32 %s4301_s24, 3 }
  0x20   : > { %s6845_s22 = sld [smem:[#allocation126_spill]]  ;;  %s3959_s27 = smul.u32 640, %s4301_s24 }
  0x21   : > { %v634_v0 = vld [vmem:[%s6842_s4 + $0x18] sm:$0xff]  ;;  %v633_v1 = vld [vmem:[%s6842_s4 + $0x10] sm:$0xff]  ;;  %v632_v3 = vld [vmem:[%s6842_s4 + $0x8] sm:$0xff]  ;;  %s6846_s3 = sld [smem:[#allocation128_spill]]  ;;  %s4139_s24 = smov 32  }
  0x22   : > { %655 = vmatpush.msra.mxu0 %v634_v0  ;;  %v631_v4 = vld [vmem:[%s6842_s4] sm:$0xff]  ;;  %s4310_s23 = scalar_lea.vmem %s6843_s1, %s3942_s25  ;;  %s4142_s1 = smov 64  }
  0x23   : > { %v952_v5 = vld [vmem:[%s4310_s23 + $0x18] sm:$0xff]  ;;  %v950_v6 = vld [vmem:[%s4310_s23 + $0x8] sm:$0xff]  ;;  %v949_v7 = vld [vmem:[%s4310_s23] sm:$0xff] }
  0x24   : > { %656 = vmatpush.msra.mxu0 %v633_v1  ;;  %s4319_s19 = scalar_lea.vmem %s6844_s26, %s3842_s20  ;;  %v4321_v8 = vadd.f32 1.0, %v952_v5  ;;  %v4323_v9 = vadd.f32 1.0, %v950_v6  ;;  %v4325_v10 = vadd.f32 1.0, %v949_v7  ;;  %v953_v12 = vld [vmem:[%s4310_s23 + $0x20] sm:$0xff]  ;;  %v951_v13 = vld [vmem:[%s4310_s23 + $0x10] sm:$0xff]  ;;  %v954_v17 = vld [vmem:[%s4310_s23 + $0x28] sm:$0xff] }
  0x25   : > { %v628_v11 = vld [vmem:[%s4319_s19] sm:$0xff]  ;;  %v4333_v15 = vadd.f32 1.0, %v953_v12  ;;  %v4335_v16 = vadd.f32 1.0, %v951_v13  ;;  %v955_v21 = vld [vmem:[%s4310_s23 + $0x30] sm:$0xff]  ;;  %v4344_v28 = vadd.f32 1.0, %v954_v17  ;;  %v956_v44 = vld [vmem:[%s4310_s23 + $0x38] sm:$0xff] }
  0x26   : > { %657 = vmatpush.msra.mxu0 %v632_v3  ;;  %s617_s25 = scalar_lea.vmem %s6845_s22, %s3842_s20  ;;  %v1040_v18 = vmul.f32 16.0, %v4321_v8  ;;  %v1038_v19 = vmul.f32 16.0, %v4323_v9  ;;  %v1037_v20 = vmul.f32 16.0, %v4325_v10  ;;  %v4347_v31 = vadd.f32 1.0, %v955_v21 }
  0x27   : > { %v629_v14 = vld [vmem:[%s617_s25] sm:$0xff]  ;;  %v1041_v23 = vmul.f32 16.0, %v4333_v15  ;;  %v1039_v24 = vmul.f32 16.0, %v4335_v16  ;;  %v1042_v35 = vmul.f32 16.0, %v4344_v28  ;;  %v4363_v46 = vadd.f32 1.0, %v956_v44  ;;  %s4454_s26 = scalar_lea.vmem %s6846_s3, %s3959_s27  ;;  %s607_s27 = sand.u32 1, %s4128_s28  }
  0x28   : > { %658 = vmatpush.msra.mxu0 %v631_v4  ;;  %v630_v22 = vadd.f32 %v629_v14, %v628_v11  ;;  %v3859_v25 = vadd.f32 -1.0, %v1040_v18  ;;  %v3857_v26 = vadd.f32 -1.0, %v1038_v19  ;;  %v3856_v27 = vadd.f32 -1.0, %v1037_v20  ;;  %v991_v21 = vld [vmem:[%s4454_s26 + $0x110] sm:$0xff] }
  0x29   : > { %v3860_v29 = vadd.f32 -1.0, %v1041_v23  ;;  %v3858_v30 = vadd.f32 -1.0, %v1039_v24  ;;  %v3861_v39 = vadd.f32 -1.0, %v1042_v35  ;;  %v1043_v43 = vmul.f32 16.0, %v4347_v31 }
  0x2a   : > { %3847 = vmatmul.msk.f32.vlgmr.msra.gmra.mxu0 %vm639_vm0, %v630_v22  ;;  %v1056_v32 = vmul.f32 0.5, %v3859_v25  ;;  %v1054_v33 = vmul.f32 0.5, %v3857_v26  ;;  %v1053_v34 = vmul.f32 0.5, %v3856_v27  ;;  %v1044_v53 = vmul.f32 16.0, %v4363_v46  ;;  %v994_v25 = vld [vmem:[%s4454_s26 + $0x128] sm:$0xff] }
  0x2b   : > { %v1057_v40 = vmul.f32 0.5, %v3860_v29  ;;  %v1055_v41 = vmul.f32 0.5, %v3858_v30  ;;  %v1058_v42 = vmul.f32 0.5, %v3861_v39  ;;  %v3862_v50 = vadd.f32 -1.0, %v1043_v43 }
  0x2c   : > { %v4350_v36 = vfloor.f32 %v1056_v32  ;;  %v4352_v37 = vfloor.f32 %v1054_v33  ;;  %v4354_v38 = vfloor.f32 %v1053_v34  ;;  %v3863_v55 = vadd.f32 -1.0, %v1044_v53 }
  0x2d   : > { %v4361_v45 = vfloor.f32 %v1058_v42  ;;  %v4365_v47 = vfloor.f32 %v1057_v40  ;;  %v4367_v48 = vfloor.f32 %v1055_v41  ;;  %v1059_v52 = vmul.f32 0.5, %v3862_v50 }
  0x2e   : > { %1101 = vperm.xlu2 %4007, %v4350_v36   ;;  %1091 = vperm.xlu1 %4006, %v4352_v37   ;;  %v4381_v56 = vadd.f32 1.0, %v4354_v38  ;;  %v1060_v57 = vmul.f32 0.5, %v3863_v55  ;;  %v4386_v58 = vsub.f32 %v1053_v34, %v4354_v38  ;;  %v4393_v61 = vadd.f32 1.0, %v4350_v36 }
  0x2f   : > { %1086 = vperm.xlu0 %4005, %v4354_v38   ;;  %v4370_v49 = vsub.f32 %v1058_v42, %v4361_v45  ;;  %v4378_v54 = vfloor.f32 %v1059_v52  ;;  %v4399_v62 = vsub.f32 %v1054_v33, %v4352_v37  ;;  %v4402_v63 = vsub.f32 %v1055_v41, %v4367_v48 }
  0x30   : > { %v4389_v59 = vfloor.f32 %v1060_v57  ;;  %v1140_v60 = vsub.f32 1.0, %v4386_v58  ;;  %v4415_v4 = vsub.f32 %v1056_v32, %v4350_v36  ;;  %v4418_v5 = vsub.f32 %v1057_v40, %v4365_v47 }
  0x31   : > { %v6736_v51 = vsub.f32 1.0, %v4370_v49  ;;  %v1141_v0 = vsub.f32 1.0, %v4399_v62  ;;  %v6737_v1 = vsub.f32 1.0, %v4402_v63  ;;  %v4408_v3 = vadd.f32 1.0, %v4378_v54 }
  0x32   : > { %v1143_v6 = vsub.f32 1.0, %v4415_v4  ;;  %v1144_v7 = vsub.f32 1.0, %v4418_v5  ;;  %v4428_v11 = vsub.f32 %v1059_v52, %v4378_v54  ;;  %v4431_v12 = vsub.f32 %v1060_v57, %v4389_v59 }
  0x33   : > { %v4442_v17 = vadd.f32 1.0, %v4352_v37  ;;  %v4445_v18 = vadd.f32 1.0, %v4367_v48  ;;  %v4457_v19 = vadd.f32 1.0, %v4365_v47  ;;  %v4460_v20 = vadd.f32 1.0, %v4361_v45 }
  0x34   : > { %v1146_v13 = vsub.f32 1.0, %v4428_v11  ;;  %v1147_v14 = vsub.f32 1.0, %v4431_v12  ;;  %v1610_v22 = vmul.f32 8.0, %v4325_v10  ;;  %v4468_v23 = vadd.f32 1.0, %v4389_v59 }
  0x35   : > { %v1615_v27 = vmul.f32 8.0, %v4344_v28  ;;  %v6738_v33 = vmov 1   ;;  %v1613_v52 = vmul.f32 8.0, %v4321_v8 }
  0x36   : > { %1106 = vperm.xlu2 %4007, %v4365_v47   ;;  %1096 = vperm.xlu1 %4006, %v4367_v48   ;;  %v3864_v24 = vadd.f32 -1.0, %v1610_v22 }
  0x37   : > { %1175 = vperm.xlu0 %4005, %v6736_v51   ;;  %v3869_v30 = vadd.f32 -1.0, %v1615_v27  ;;  %v3867_v57 = vadd.f32 -1.0, %v1613_v52  ;;  %v6755_v51 = vmov 0.0  }
  0x38   : > { %v1626_v26 = vmul.f32 0.5, %v3864_v24  ;;  %887 = vst [vmem:[#allocation2 + $0x110] sm:$0xff] %v6755_v51 }
  0x39   : > { %v4480_v10 = vmul.f32 0.5, %v3869_v30  ;;  %853 = vst [vmem:[#allocation2] sm:$0xff] %v6755_v51 }
  0x3a   : > { %v4475_v29 = vfloor.f32 %v1626_v26  ;;  %854 = vst [vmem:[#allocation2 + $0x8] sm:$0xff] %v6755_v51 }
  0x3b   : > { %v4483_v32 = vfloor.f32 %v4480_v10  ;;  %855 = vst [vmem:[#allocation2 + $0x10] sm:$0xff] %v6755_v51 }
  0x3c   : > { %856 = vst [vmem:[#allocation2 + $0x18] sm:$0xff] %v6755_v51 }
  0x3d   : > { %857 = vst [vmem:[#allocation2 + $0x20] sm:$0xff] %v6755_v51 }
  0x3e   : > { %1116 = vperm.xlu2 %4007, %v4378_v54   ;;  %1111 = vperm.xlu1 %4006, %v4361_v45   ;;  %858 = vst [vmem:[#allocation2 + $0x28] sm:$0xff] %v6755_v51 }
  0x3f   : > { %1214 = vperm.xlu0 %4005, %v4381_v56   ;;  %859 = vst [vmem:[#allocation2 + $0x30] sm:$0xff] %v6755_v51 }
  0x40   : > { %860 = vst [vmem:[#allocation2 + $0x38] sm:$0xff] %v6755_v51 }
  0x41   : > { %861 = vst [vmem:[#allocation2 + $0x40] sm:$0xff] %v6755_v51 }
  0x42   : > { %862 = vst [vmem:[#allocation2 + $0x48] sm:$0xff] %v6755_v51 }
  0x43   : > { %863 = vst [vmem:[#allocation2 + $0x50] sm:$0xff] %v6755_v51 }
  0x44   : > { %864 = vst [vmem:[#allocation2 + $0x58] sm:$0xff] %v6755_v51 }
  0x45   : > { %865 = vst [vmem:[#allocation2 + $0x60] sm:$0xff] %v6755_v51 }
  0x46   : > { %1121 = vperm.xlu1 %4006, %v4389_v59   ;;  %1150 = vperm.xlu2 %4007, %v1140_v60   ;;  %866 = vst [vmem:[#allocation2 + $0x68] sm:$0xff] %v6755_v51 }
  0x47   : > { %1229 = vperm.xlu0 %4005, %v4393_v61   ;;  %867 = vst [vmem:[#allocation2 + $0x70] sm:$0xff] %v6755_v51 }
  0x48   : > { %868 = vst [vmem:[#allocation2 + $0x78] sm:$0xff] %v6755_v51 }
  0x49   : > { %869 = vst [vmem:[#allocation2 + $0x80] sm:$0xff] %v6755_v51 }
  0x4a   : > { %870 = vst [vmem:[#allocation2 + $0x88] sm:$0xff] %v6755_v51 }
  0x4b   : > { %871 = vst [vmem:[#allocation2 + $0x90] sm:$0xff] %v6755_v51 }
  0x4c   : > { %872 = vst [vmem:[#allocation2 + $0x98] sm:$0xff] %v6755_v51 }
  0x4d   : > { %873 = vst [vmem:[#allocation2 + $0xa0] sm:$0xff] %v6755_v51 }
  0x4e   : > { %1155 = vperm.xlu1 %4006, %v1141_v0   ;;  %1160 = vperm.xlu2 %4007, %v6737_v1   ;;  %v989_v1 = vld [vmem:[%s4454_s26 + $0x100] sm:$0xff]  ;;  %874 = vst [vmem:[#allocation2 + $0xa8] sm:$0xff] %v6755_v51 }
  0x4f   : > { %1244 = vperm.xlu0 %4005, %v4408_v3   ;;  %875 = vst [vmem:[#allocation2 + $0xb0] sm:$0xff] %v6755_v51 }
  0x50   : > { %876 = vst [vmem:[#allocation2 + $0xb8] sm:$0xff] %v6755_v51 }
  0x51   : > { %877 = vst [vmem:[#allocation2 + $0xc0] sm:$0xff] %v6755_v51 }
  0x52   : > { %878 = vst [vmem:[#allocation2 + $0xc8] sm:$0xff] %v6755_v51 }
  0x53   : > { %879 = vst [vmem:[#allocation2 + $0xd0] sm:$0xff] %v6755_v51 }
  0x54   : > { %880 = vst [vmem:[#allocation2 + $0xd8] sm:$0xff] %v6755_v51 }
  0x55   : > { %881 = vst [vmem:[#allocation2 + $0xe0] sm:$0xff] %v6755_v51 }
  0x56   : > { %1165 = vperm.xlu1 %4006, %v1143_v6   ;;  %1170 = vperm.xlu2 %4007, %v1144_v7   ;;  %882 = vst [vmem:[#allocation2 + $0xe8] sm:$0xff] %v6755_v51 }
  0x57   : > { %1275 = vperm.xlu0 %4005, %v4399_v62   ;;  %883 = vst [vmem:[#allocation2 + $0xf0] sm:$0xff] %v6755_v51 }
  0x58   : > { %884 = vst [vmem:[#allocation2 + $0xf8] sm:$0xff] %v6755_v51 }
  0x59   : > { %885 = vst [vmem:[#allocation2 + $0x100] sm:$0xff] %v6755_v51 }
  0x5a   : > { %886 = vst [vmem:[#allocation2 + $0x108] sm:$0xff] %v6755_v51 }
  0x5b   : > { %888 = vst [vmem:[#allocation2 + $0x118] sm:$0xff] %v6755_v51 }
  0x5c   : > { %889 = vst [vmem:[#allocation2 + $0x120] sm:$0xff] %v6755_v51 }
  0x5d   : > { %890 = vst [vmem:[#allocation2 + $0x128] sm:$0xff] %v6755_v51 }
  0x5e   : > { %1180 = vperm.xlu1 %4006, %v1146_v13   ;;  %1185 = vperm.xlu2 %4007, %v1147_v14   ;;  %891 = vst [vmem:[#allocation2 + $0x130] sm:$0xff] %v6755_v51 }
  0x5f   : > { %1290 = vperm.xlu0 %4005, %v4418_v5   ;;  %892 = vst [vmem:[#allocation2 + $0x138] sm:$0xff] %v6755_v51 }
  0x66   : > { %1219 = vperm.xlu1 %4006, %v4442_v17   ;;  %1224 = vperm.xlu2 %4007, %v4445_v18  }
  0x67   : > { %1305 = vperm.xlu0 %4005, %v4431_v12  }
  0x6e   : > { %1234 = vperm.xlu1 %4006, %v4457_v19   ;;  %1239 = vperm.xlu2 %4007, %v4460_v20  }
  0x6f   : > { %1581 = vrot.lane.b32.xlu0 %v991_v21, %s4139_s24 }
  0x76   : > { %1249 = vperm.xlu1 %4006, %v4468_v23   ;;  %1270 = vperm.xlu2 %4007, %v4386_v58  }
  0x77   : > { %1587 = vrot.lane.b32.xlu0 %v994_v25, %s4139_s24  ;;  %v1611_v25 = vmul.f32 8.0, %v4323_v9 }
  0x7e   : > { %1280 = vperm.xlu1 %4006, %v4402_v63   ;;  %1285 = vperm.xlu2 %4007, %v4415_v4  }
  0x7f   : > { %1657 = vperm.xlu0 %4005, %v4475_v29  }
  0x86   : > { %1295 = vperm.xlu1 %4006, %v4370_v49   ;;  %1300 = vperm.xlu2 %4007, %v4428_v11  }
  0x87   : > { %1682 = vperm.xlu0 %4005, %v4483_v32  }
  0x88   : > { %v4488_v28 = vpop.permute.xlu2 %1101 }
  0x89   : > { %6847 = vst [vmem:[#allocation11_spill] sm:$0xff] %v4488_v28 }
  0x8e   : > { %4008 = vset.pattern.permute.xlu1 %v6738_v33  ;;  %4009 = vset.pattern.permute.xlu2 %v6738_v33  ;;  %v990_v33 = vld [vmem:[%s4454_s26 + $0x108] sm:$0xff] }
  0x8f   : > { %1346 = vperm.xlu1 %4008, %v4354_v38   ;;  %1350 = vperm.xlu2 %4009, %v4352_v37   ;;  %v4062_v38 = vld [vmem:[%s6714_s5] ss:$0 sm:$0xff] }
  0x90   : > { %v4494_v34 = vpop.permute.xlu2 %1106 }
  0x91   : > { %6848 = vst [vmem:[#allocation12_spill] sm:$0xff] %v4494_v34 }
  0x97   : > { %1358 = vperm.xlu1 %4008, %v4350_v36   ;;  %1362 = vperm.xlu2 %4009, %v4365_v47  }
  0x98   : > { %v4498_v35 = vpop.permute.xlu2 %1116 }
  0x99   : > { %6849 = vst [vmem:[#allocation13_spill] sm:$0xff] %v4498_v35  ;;  %v672_v35 = vld [vmem:[%s6717_s8 + $0x20] sm:$0xff] }
  0x9f   : > { %1366 = vperm.xlu1 %4008, %v4361_v45   ;;  %1370 = vperm.xlu2 %4009, %v4378_v54  }
  0xa0   : > { %v4502_v39 = vpop.permute.xlu1 %1091  ;;  %v4504_v40 = vpop.permute.xlu2 %1150 }
  0xa1   : > { %v4506_v41 = vpop.permute.xlu0 %1086 }
  0xa7   : > { %1394 = vperm.xlu1 %4008, %v1140_v60   ;;  %1398 = vperm.xlu2 %4009, %v1141_v0   ;;  %v660_v43 = vpop.f32.mrf.mxu0  ;;  %v4546_v60 = vsub.f32 %v1626_v26, %v4475_v29  ;;  %v1629_v0 = vmul.f32 0.5, %v3867_v57 }
  0xa8   : > { %v4512_v36 = vpop.permute.xlu1 %1096  ;;  %v4514_v37 = vpop.permute.xlu2 %1160  ;;  %v4521_v44 = vadd.f32 %v4062_v38, %v660_v43  ;;  %v1614_v43 = vmul.f32 8.0, %v4333_v15 }
  0xa9   : > { %6850 = vst [vmem:[#allocation14_spill] sm:$0xff] %v4512_v36  ;;  %v4519_v42 = vpop.permute.xlu0 %1175  ;;  %v6899_v36 = vmov 1  }
  0xaa   : > { %6851 = vst [vmem:[#allocation15_spill] sm:$0xff] %v4514_v37 }
  0xab   : > { %6852 = vst [vmem:[#allocation16_spill] sm:$0xff] %v4519_v42 }
  0xaf   : > { %1406 = vperm.xlu1 %4008, %v1143_v6   ;;  %1410 = vperm.xlu2 %4009, %v1144_v7   ;;  %v1616_v6 = vmul.f32 8.0, %v4347_v31 }
  0xb0   : > { %v4527_v45 = vpop.permute.xlu1 %1111  ;;  %v4529_v47 = vpop.permute.xlu2 %1170 }
  0xb1   : > { %6853 = vst [vmem:[#allocation17_spill] sm:$0xff] %v4527_v45  ;;  %663 = vmax.xlane.f32.xlu0 %v4521_v44  ;;  %v4532_v50 = vpop.permute.xlu0 %1214  ;;  %v3870_v22 = vadd.f32 -1.0, %v1616_v6  ;;  %v668_v45 = vld [vmem:[%s6717_s8] sm:$0xff] }
  0xb2   : > { %6854 = vst [vmem:[#allocation18_spill] sm:$0xff] %v4529_v47 }
  0xb7   : > { %1418 = vperm.xlu1 %4008, %v1146_v13   ;;  %1422 = vperm.xlu2 %4009, %v1147_v14   ;;  %v6735_v13 = vsub.f32 1.0, %v4546_v60  ;;  %v4556_v14 = vfloor.f32 %v1629_v0 }
  0xb8   : > { %v4539_v53 = vpop.permute.xlu1 %1121  ;;  %v4541_v54 = vpop.permute.xlu2 %1185 }
  0xb9   : > { %6855 = vst [vmem:[#allocation19_spill] sm:$0xff] %v4539_v53  ;;  %v4543_v55 = vpop.permute.xlu0 %1229  ;;  %v4563_v31 = vsub.f32 %v1629_v0, %v4556_v14 }
  0xba   : > { %6856 = vst [vmem:[#allocation20_spill] sm:$0xff] %v4541_v54 }
  0xbb   : > { %6857 = vst [vmem:[#allocation21_spill] sm:$0xff] %v4543_v55  ;;  %v6734_v26 = vsub.f32 1.0, %v4563_v31 }
  0xbf   : > { %1446 = vperm.xlu1 %4008, %v4442_v17   ;;  %1450 = vperm.xlu2 %4009, %v4445_v18   ;;  %v1632_v17 = vmul.f32 0.5, %v3870_v22  ;;  %v1617_v22 = vmul.f32 8.0, %v4363_v46 }
  0xc0   : > { %v4551_v8 = vpop.permute.xlu1 %1155  ;;  %v4553_v7 = vpop.permute.xlu2 %1224 }
  0xc1   : > { %6858 = vst [vmem:[#allocation22_spill] sm:$0xff] %v4551_v8  ;;  %v4558_v21 = vpop.permute.xlu0 %1244  ;;  %v4573_v27 = vfloor.f32 %v1632_v17 }
  0xc2   : > { %6859 = vst [vmem:[#allocation23_spill] sm:$0xff] %v4553_v7 }
  0xc3   : > { %6860 = vst [vmem:[#allocation24_spill] sm:$0xff] %v4558_v21  ;;  %v4580_v38 = vsub.f32 %v1632_v17, %v4573_v27  ;;  %v4708_v21 = vsub.f32 %v4480_v10, %v4483_v32  ;;  %v676_v10 = vld [vmem:[%s6717_s8 + $0x40] sm:$0xff] }
  0xc5   : > { %1713 = vperm.xlu0 %4005, %v6735_v13   ;;  %v6733_v52 = vsub.f32 1.0, %v4580_v38  ;;  %v1612_v13 = vmul.f32 8.0, %v4335_v16 }
  0xc7   : > { %1458 = vperm.xlu1 %4008, %v4457_v19   ;;  %1462 = vperm.xlu2 %4009, %v4460_v20   ;;  %v3865_v19 = vadd.f32 -1.0, %v1611_v25  ;;  %v3866_v2 = vadd.f32 -1.0, %v1612_v13 }
  0xc8   : > { %v4567_v18 = vpop.permute.xlu1 %1165  ;;  %v4569_v24 = vpop.permute.xlu2 %1239 }
  0xc9   : > { %6861 = vst [vmem:[#allocation25_spill] sm:$0xff] %v4567_v18  ;;  %v4575_v30 = vpop.permute.xlu0 %1275  ;;  %v4590_v57 = vmul.f32 0.5, %v3865_v19  ;;  %v1628_v54 = vmul.f32 0.5, %v3866_v2 }
  0xca   : > { %6862 = vst [vmem:[#allocation26_spill] sm:$0xff] %v4569_v24  ;;  %v670_v24 = vld [vmem:[%s6717_s8 + $0x10] sm:$0xff] }
  0xcb   : > { %v4597_v6 = vfloor.f32 %v4590_v57 }
  0xcd   : > { %1728 = vperm.xlu0 %4005, %v6734_v26   ;;  %v4607_v17 = vadd.f32 1.0, %v4597_v6 }
  0xcf   : > { %1470 = vperm.xlu1 %4008, %v4468_v23   ;;  %1490 = vperm.xlu2 %4009, %v4386_v58   ;;  %v3868_v23 = vadd.f32 -1.0, %v1614_v43 }
  0xd0   : > { %v4584_v20 = vpop.permute.xlu1 %1180  ;;  %v4586_v9 = vpop.permute.xlu2 %1270 }
  0xd1   : > { %6863 = vst [vmem:[#allocation27_spill] sm:$0xff] %v4584_v20  ;;  %v4592_v0 = vpop.permute.xlu0 %1290  ;;  %v4609_v25 = vmul.f32 0.5, %v3868_v23 }
  0xd2   : > { %6864 = vst [vmem:[#allocation28_spill] sm:$0xff] %v4592_v0 }
  0xd3   : > { %v4615_v43 = vfloor.f32 %v4609_v25 }
  0xd5   : > { %1743 = vperm.xlu0 %4005, %v6733_v52   ;;  %v4624_v23 = vadd.f32 1.0, %v4615_v43 }
  0xd7   : > { %1498 = vperm.xlu1 %4008, %v4402_v63   ;;  %1502 = vperm.xlu2 %4009, %v4415_v4   ;;  %v3871_v4 = vadd.f32 -1.0, %v1617_v22 }
  0xd8   : > { %v4601_v58 = vpop.permute.xlu1 %1219  ;;  %v4603_v15 = vpop.permute.xlu2 %1285 }
  0xd9   : > { %6865 = vst [vmem:[#allocation29_spill] sm:$0xff] %v4603_v15  ;;  %v4611_v19 = vpop.permute.xlu0 %1305  ;;  %v4626_v26 = vmul.f32 0.5, %v3871_v4  ;;  %v6870_v4 = vmov 0  }
  0xda   : > { %6866 = vst [vmem:[#allocation30_spill] sm:$0xff] %v4611_v19  ;;  %v4659_v19 = vfloor.f32 %v1628_v54 }
  0xdc   : > { %v4675_v20 = vsub.f32 %v1628_v54, %v4659_v19  ;;  %v681_v54 = vld [vmem:[%s6717_s8 + $0x68] sm:$0xff] }
  0xdd   : > { %1774 = vperm.xlu0 %4005, %v4607_v17  }
  0xde   : > { %v6762_v34 = vsub.f32 1.0, %v4675_v20 }
  0xdf   : > { %1510 = vperm.xlu1 %4008, %v4370_v49   ;;  %1514 = vperm.xlu2 %4009, %v4428_v11   ;;  %v4635_v11 = vfloor.f32 %v4626_v26 }
  0xe0   : > { %v4619_v46 = vpop.permute.xlu1 %1234  ;;  %v4621_v52 = vpop.permute.xlu2 %1300 }
  0xe1   : > { %6867 = vst [vmem:[#allocation31_spill] sm:$0xff] %v4619_v46  ;;  %v1582_v22 = vpop.permute.xlu0 %1581  ;;  %v4895_v46 = vadd.f32 1.0, %v4573_v27 }
  0xe2   : > { %6868 = vst [vmem:[#allocation32_spill] sm:$0xff] %v4621_v52  ;;  %v996_v52 = vld [vmem:[%s4454_s26 + $0x138] sm:$0xff] }
  0xe3   : > { %1604 = vst.msk [vmem:[#allocation2 + $0x110] sm:$0xff] %vm1601_vm1, %v1582_v22  ;;  %v4650_v22 = vadd.f32 1.0, %v4635_v11 }
  0xe5   : > { %1789 = vperm.xlu0 %4005, %v4624_v23  }
  0xe7   : > { %1577 = vrot.lane.b32.xlu1 %v989_v1, %s4139_s24  ;;  %1579 = vrot.lane.b32.xlu2 %v990_v33, %s4139_s24  ;;  %v992_v1 = vld [vmem:[%s4454_s26 + $0x118] sm:$0xff]  ;;  %v993_v33 = vld [vmem:[%s4454_s26 + $0x120] sm:$0xff] }
  0xe8   : > { %v4642_v16 = vpop.permute.xlu1 %1249  ;;  %4010 = vset.pattern.permute.xlu1 %v6870_v4  ;;  %4011 = vset.pattern.permute.xlu2 %v6870_v4 }
  0xe9   : > { %6869 = vst [vmem:[#allocation33_spill] sm:$0xff] %v4642_v16  ;;  %v4647_v13 = vpop.permute.xlu2 %1350  ;;  %v683_v16 = vld [vmem:[%s6717_s8 + $0x78] sm:$0xff] }
  0xea   : > { %684 = vmatpush.msra.mxu1 %v683_v16  ;;  %v680_v16 = vld [vmem:[%s6717_s8 + $0x60] sm:$0xff] }
  0xed   : > { %1804 = vperm.xlu0 %4005, %v4650_v22  }
  0xef   : > { %1583 = vrot.lane.b32.xlu1 %v992_v1, %s4139_s24  ;;  %1585 = vrot.lane.b32.xlu2 %v993_v33, %s4139_s24  ;;  %v682_v1 = vld [vmem:[%s6717_s8 + $0x70] sm:$0xff] }
  0xf0   : > { %v4666_v2 = vpop.permute.xlu1 %1280  ;;  %685 = vmatpush.msra.mxu1 %v682_v1  ;;  %v995_v33 = vld [vmem:[%s4454_s26 + $0x130] sm:$0xff] }
  0xf1   : > { %6871 = vst [vmem:[#allocation34_spill] sm:$0xff] %v4666_v2  ;;  %v4672_v53 = vpop.permute.xlu2 %1362 }
  0xf2   : > { %6872 = vst [vmem:[#allocation35_spill] sm:$0xff] %v4672_v53  ;;  %686 = vmatpush.msra.mxu1 %v681_v54  ;;  %v679_v54 = vld [vmem:[%s6717_s8 + $0x58] sm:$0xff] }
  0xf4   : > { %687 = vmatpush.msra.mxu1 %v680_v16  ;;  %v675_v16 = vld [vmem:[%s6717_s8 + $0x38] sm:$0xff] }
  0xf5   : > { %1827 = vperm.xlu0 %4005, %v4675_v20  }
  0xf6   : > { %688 = vmatpush.msra.mxu1 %v679_v54 }
  0xf7   : > { %1589 = vrot.lane.b32.xlu1 %v995_v33, %s4139_s24  ;;  %1591 = vrot.lane.b32.xlu2 %v996_v52, %s4139_s24  ;;  %v678_v52 = vld [vmem:[%s6717_s8 + $0x50] sm:$0xff]  ;;  %v677_v33 = vld [vmem:[%s6717_s8 + $0x48] sm:$0xff]  ;;  %s4143_s24 = smov 96  }
  0xf8   : > { %v4698_v1 = vpop.permute.xlu1 %1295  ;;  %689 = vmatpush.msra.mxu1 %v678_v52 }
  0xf9   : > { %6873 = vst [vmem:[#allocation36_spill] sm:$0xff] %v4698_v1  ;;  %v4704_v42 = vpop.permute.xlu2 %1370  ;;  %v3883_v1 = vld [vmem:[%s4454_s26 + $0x158] sm:$0xff] }
  0xfa   : > { %6874 = vst [vmem:[#allocation37_spill] sm:$0xff] %v4704_v42  ;;  %690 = vmatpush.msra.mxu1 %v677_v33  ;;  %v3880_v33 = vld [vmem:[%s4454_s26 + $0x140] sm:$0xff]  ;;  %v674_v42 = vld [vmem:[%s6717_s8 + $0x30] sm:$0xff] }
  0xfc   : > { %691 = vmatpush.msra.mxu1 %v676_v10  ;;  %v673_v10 = vld [vmem:[%s6717_s8 + $0x28] sm:$0xff] }
  0xfd   : > { %1842 = vperm.xlu0 %4005, %v4708_v21  }
  0xfe   : > { %692 = vmatpush.msra.mxu1 %v675_v16  ;;  %v4751_v16 = vpop.permute.xlu0 %1587 }
  0xff   : > { %1662 = vperm.xlu1 %4010, %v4597_v6   ;;  %1667 = vperm.xlu2 %4011, %v4659_v19   ;;  %1607 = vst.msk [vmem:[#allocation2 + $0x128] sm:$0xff] %vm1601_vm1, %v4751_v16  ;;  %v3907_v16 = vld [vmem:[%s4454_s26 + $0x218] sm:$0xff] }
 0x100   : > { %693 = vmatpush.msra.mxu1 %v674_v42  ;;  %v671_v42 = vld [vmem:[%s6717_s8 + $0x18] sm:$0xff] }
 0x101   : > { %v4733_v54 = vpop.permute.xlu1 %1346  ;;  %v4735_v52 = vpop.permute.xlu2 %1398 }
 0x102   : > { %6875 = vst [vmem:[#allocation38_spill] sm:$0xff] %v4735_v52  ;;  %694 = vmatpush.msra.mxu1 %v673_v10  ;;  %v3879_v52 = vld [vmem:[%s4310_s23 + $0x78] sm:$0xff] }
 0x104   : > { %695 = vmatpush.msra.mxu1 %v672_v35  ;;  %v669_v35 = vld [vmem:[%s6717_s8 + $0x8] sm:$0xff] }
 0x105   : > { %2132 = vrot.lane.b32.xlu0 %v3880_v33, %s4142_s1 }
 0x106   : > { %696 = vmatpush.msra.mxu1 %v671_v42  ;;  %v4785_v42 = vsub.f32 %v4590_v57, %v4597_v6 }
 0x107   : > { %1672 = vperm.xlu1 %4010, %v4556_v14   ;;  %1677 = vperm.xlu2 %4011, %v4615_v43  }
 0x108   : > { %697 = vmatpush.msra.mxu1 %v670_v24  ;;  %v4787_v24 = vpop.permute.xlu0 %1657 }
 0x109   : > { %v4764_v33 = vpop.permute.xlu1 %1358  ;;  %v4766_v10 = vpop.permute.xlu2 %1410  ;;  %6878 = vst [vmem:[#allocation41_spill] sm:$0xff] %v4787_v24 }
 0x10a   : > { %6876 = vst [vmem:[#allocation39_spill] sm:$0xff] %v4764_v33  ;;  %698 = vmatpush.msra.mxu1 %v669_v35  ;;  %v6761_v35 = vsub.f32 1.0, %v4785_v42 }
 0x10b   : > { %6877 = vst [vmem:[#allocation40_spill] sm:$0xff] %v4766_v10  ;;  %v6881_v10 = vmov 0.0  }
 0x10c   : > { %699 = vmatpush.msra.mxu1 %v668_v45  ;;  %901 = vst [vmem:[#allocation2 + $0x180] sm:$0xff] %v6881_v10  ;;  %v4807_v45 = vsub.f32 %v4609_v25, %v4615_v43  ;;  %v6765_v25 = vsub.f32 1.0, %v4708_v21 }
 0x10d   : > { %2138 = vrot.lane.b32.xlu0 %v3883_v1, %s4142_s1  ;;  %v3886_v1 = vld [vmem:[%s4454_s26 + $0x170] sm:$0xff]  ;;  %902 = vst [vmem:[#allocation2 + $0x188] sm:$0xff] %v6881_v10 }
 0x10e   : > { %903 = vst [vmem:[#allocation2 + $0x190] sm:$0xff] %v6881_v10 }
 0x10f   : > { %1687 = vperm.xlu1 %4010, %v4573_v27   ;;  %1692 = vperm.xlu2 %4011, %v4635_v11   ;;  %904 = vst [vmem:[#allocation2 + $0x198] sm:$0xff] %v6881_v10 }
 0x110   : > { %905 = vst [vmem:[#allocation2 + $0x1a0] sm:$0xff] %v6881_v10 }
 0x111   : > { %v4789_v51 = vpop.permute.xlu1 %1366  ;;  %v4791_v47 = vpop.permute.xlu2 %1422  ;;  %906 = vst [vmem:[#allocation2 + $0x1a8] sm:$0xff] %v6881_v10 }
 0x112   : > { %6879 = vst [vmem:[#allocation42_spill] sm:$0xff] %v4789_v51  ;;  %v3892_v51 = vld [vmem:[%s4454_s26 + $0x1a0] sm:$0xff] }
 0x113   : > { %6880 = vst [vmem:[#allocation43_spill] sm:$0xff] %v4791_v47  ;;  %v4816_v47 = vpop.permute.xlu0 %1682 }
 0x114   : > { %907 = vst [vmem:[#allocation2 + $0x1b0] sm:$0xff] %v6881_v10 }
 0x115   : > { %2144 = vrot.lane.b32.xlu0 %v3886_v1, %s4142_s1  ;;  %6883 = vst [vmem:[#allocation45_spill] sm:$0xff] %v4816_v47  ;;  %v4833_v47 = vsub.f32 %v4626_v26, %v4635_v11 }
 0x116   : > { %908 = vst [vmem:[#allocation2 + $0x1b8] sm:$0xff] %v6881_v10 }
 0x117   : > { %1718 = vperm.xlu1 %4010, %v6761_v35   ;;  %1723 = vperm.xlu2 %4011, %v6762_v34   ;;  %v3889_v35 = vld [vmem:[%s4454_s26 + $0x188] sm:$0xff]  ;;  %v6764_v34 = vsub.f32 1.0, %v4807_v45  ;;  %909 = vst [vmem:[#allocation2 + $0x1c0] sm:$0xff] %v6881_v10 }
 0x118   : > { %910 = vst [vmem:[#allocation2 + $0x1c8] sm:$0xff] %v6881_v10 }
 0x119   : > { %v4811_v57 = vpop.permute.xlu1 %1394  ;;  %v4813_v1 = vpop.permute.xlu2 %1450  ;;  %911 = vst [vmem:[#allocation2 + $0x1d0] sm:$0xff] %v6881_v10 }
 0x11a   : > { %6882 = vst [vmem:[#allocation44_spill] sm:$0xff] %v4813_v1 }
 0x11b   : > { %912 = vst [vmem:[#allocation2 + $0x1d8] sm:$0xff] %v6881_v10 }
 0x11c   : > { %913 = vst [vmem:[#allocation2 + $0x1e0] sm:$0xff] %v6881_v10 }
 0x11d   : > { %2150 = vrot.lane.b32.xlu0 %v3889_v35, %s4142_s1  ;;  %914 = vst [vmem:[#allocation2 + $0x1e8] sm:$0xff] %v6881_v10 }
 0x11e   : > { %915 = vst [vmem:[#allocation2 + $0x1f0] sm:$0xff] %v6881_v10 }
 0x11f   : > { %1733 = vperm.xlu1 %4010, %v6764_v34   ;;  %1738 = vperm.xlu2 %4011, %v6765_v25   ;;  %916 = vst [vmem:[#allocation2 + $0x1f8] sm:$0xff] %v6881_v10  ;;  %v6769_v34 = vsub.f32 1.0, %v4833_v47  ;;  %v4846_v25 = vadd.f32 1.0, %v4475_v29 }
 0x120   : > { %917 = vst [vmem:[#allocation2 + $0x200] sm:$0xff] %v6881_v10 }
 0x121   : > { %v4837_v24 = vpop.permute.xlu1 %1406  ;;  %v4839_v35 = vpop.permute.xlu2 %1462  ;;  %918 = vst [vmem:[#allocation2 + $0x208] sm:$0xff] %v6881_v10 }
 0x122   : > { %6884 = vst [vmem:[#allocation46_spill] sm:$0xff] %v4837_v24  ;;  %v4892_v24 = vadd.f32 1.0, %v4483_v32 }
 0x123   : > { %6885 = vst [vmem:[#allocation47_spill] sm:$0xff] %v4839_v35 }
 0x124   : > { %v664_v26 = vpop.xlane.xlu0 %663  ;;  %919 = vst [vmem:[#allocation2 + $0x210] sm:$0xff] %v6881_v10 }
 0x125   : > { %v665_v0 = vsub.f32 %v4521_v44, %v664_v26  ;;  %2156 = vrot.lane.b32.xlu0 %v3892_v51, %s4142_s1  ;;  %920 = vst [vmem:[#allocation2 + $0x218] sm:$0xff] %v6881_v10  ;;  %v3895_v51 = vld [vmem:[%s4454_s26 + $0x1b8] sm:$0xff]  ;;  %v4870_v26 = vadd.f32 1.0, %v4556_v14 }
 0x126   : > { %921 = vst [vmem:[#allocation2 + $0x220] sm:$0xff] %v6881_v10 }
 0x127   : > { %v666_v35 = vmul.f32 1.442695, %v665_v0  ;;  %1748 = vperm.xlu1 %4010, %v6769_v34   ;;  %1769 = vperm.xlu2 %4011, %v4846_v25   ;;  %922 = vst [vmem:[#allocation2 + $0x228] sm:$0xff] %v6881_v10  ;;  %v4867_v0 = vadd.f32 1.0, %v4659_v19 }
 0x128   : > { %923 = vst [vmem:[#allocation2 + $0x230] sm:$0xff] %v6881_v10 }
 0x129   : > { %4068 = vpow2.f32 %v666_v35  ;;  %v4859_v53 = vpop.permute.xlu1 %1418  ;;  %v4861_v44 = vpop.permute.xlu2 %1490  ;;  %924 = vst [vmem:[#allocation2 + $0x238] sm:$0xff] %v6881_v10 }
 0x12a   : > { %6886 = vst [vmem:[#allocation48_spill] sm:$0xff] %v4859_v53 }
 0x12b   : > { %925 = vst [vmem:[#allocation2 + $0x240] sm:$0xff] %v6881_v10 }
 0x12c   : > { %926 = vst [vmem:[#allocation2 + $0x248] sm:$0xff] %v6881_v10 }
 0x12d   : > { %2162 = vrot.lane.b32.xlu0 %v3895_v51, %s4142_s1  ;;  %927 = vst [vmem:[#allocation2 + $0x250] sm:$0xff] %v6881_v10  ;;  %v3898_v51 = vld [vmem:[%s4454_s26 + $0x1d0] sm:$0xff] }
 0x12e   : > { %928 = vst [vmem:[#allocation2 + $0x258] sm:$0xff] %v6881_v10 }
 0x12f   : > { %v4876_v35 = vpop.eup %4068  ;;  %1779 = vperm.xlu1 %4010, %v4867_v0   ;;  %1784 = vperm.xlu2 %4011, %v4870_v26   ;;  %929 = vst [vmem:[#allocation2 + $0x260] sm:$0xff] %v6881_v10 }
 0x130   : > { %700 = vmatmul.f32.vlgmr.msra.gmra.mxu1 %v4876_v35  ;;  %930 = vst [vmem:[#allocation2 + $0x268] sm:$0xff] %v6881_v10 }
 0x131   : > { %v4884_v34 = vpop.permute.xlu1 %1446  ;;  %v4886_v53 = vpop.permute.xlu2 %1502  ;;  %931 = vst [vmem:[#allocation2 + $0x270] sm:$0xff] %v6881_v10 }
 0x132   : > { %6887 = vst [vmem:[#allocation49_spill] sm:$0xff] %v4884_v34 }
 0x133   : > { %6888 = vst [vmem:[#allocation50_spill] sm:$0xff] %v4886_v53 }
 0x134   : > { %932 = vst [vmem:[#allocation2 + $0x278] sm:$0xff] %v6881_v10 }
 0x135   : > { %933 = vst [vmem:[#allocation2 + $0x280] sm:$0xff] %v6881_v10  ;;  %2168 = vrot.lane.b32.xlu0 %v3898_v51, %s4142_s1  ;;  %v3901_v51 = vld [vmem:[%s4454_s26 + $0x1e8] sm:$0xff] }
 0x136   : > { %934 = vst [vmem:[#allocation2 + $0x288] sm:$0xff] %v6881_v10 }
 0x137   : > { %935 = vst [vmem:[#allocation2 + $0x290] sm:$0xff] %v6881_v10  ;;  %v4902_v33 = vpop.permute.xlu0 %1713  ;;  %1794 = vperm.xlu1 %4010, %v4892_v24   ;;  %1799 = vperm.xlu2 %4011, %v4895_v46  }
 0x138   : > { %936 = vst [vmem:[#allocation2 + $0x298] sm:$0xff] %v6881_v10 }
 0x139   : > { %6889 = vst [vmem:[#allocation51_spill] sm:$0xff] %v4902_v33  ;;  %v4908_v53 = vpop.permute.xlu1 %1458  ;;  %v4910_v18 = vpop.permute.xlu2 %1514 }
 0x13a   : > { %937 = vst [vmem:[#allocation2 + $0x2a0] sm:$0xff] %v6881_v10 }
 0x13b   : > { %938 = vst [vmem:[#allocation2 + $0x2a8] sm:$0xff] %v6881_v10 }
 0x13c   : > { %6890 = vst [vmem:[#allocation52_spill] sm:$0xff] %v4908_v53  ;;  %v3904_v53 = vld [vmem:[%s4454_s26 + $0x200] sm:$0xff] }
 0x13d   : > { %6891 = vst [vmem:[#allocation53_spill] sm:$0xff] %v4910_v18  ;;  %2174 = vrot.lane.b32.xlu0 %v3901_v51, %s4142_s1  ;;  %v3873_v51 = vld [vmem:[%s4310_s23 + $0x48] sm:$0xff] }
 0x13e   : > { %939 = vst [vmem:[#allocation2 + $0x2b0] sm:$0xff] %v6881_v10  ;;  %v4934_v37 = vadd.f32 1.0, %v3873_v51 }
 0x13f   : > { %940 = vst [vmem:[#allocation2 + $0x2b8] sm:$0xff] %v6881_v10  ;;  %v4916_v33 = vpop.permute.xlu0 %1728  ;;  %1817 = vperm.xlu1 %4010, %v4546_v60   ;;  %1822 = vperm.xlu2 %4011, %v4785_v42  }
 0x140   : > { %6892 = vst [vmem:[#allocation54_spill] sm:$0xff] %v4916_v33 }
 0x141   : > { %v4920_v15 = vpop.permute.xlu1 %1470  ;;  %v1580_v28 = vpop.permute.xlu2 %1579 }
 0x142   : > { %6893 = vst [vmem:[#allocation55_spill] sm:$0xff] %v4920_v15 }
 0x143   : > { %1603 = vst.msk [vmem:[#allocation2 + $0x108] sm:$0xff] %vm1601_vm1, %v1580_v28  ;;  %v2270_v28 = vmul.f32 16.0, %v4934_v37 }
 0x145   : > { %2180 = vrot.lane.b32.xlu0 %v3904_v53, %s4142_s1  ;;  %v3878_v53 = vld [vmem:[%s4310_s23 + $0x70] sm:$0xff]  ;;  %v3921_v51 = vadd.f32 -1.0, %v2270_v28 }
 0x146   : > { %v4947_v2 = vadd.f32 1.0, %v3878_v53 }
 0x147   : > { %v4928_v18 = vpop.permute.xlu0 %1743  ;;  %1832 = vperm.xlu1 %4010, %v4563_v31   ;;  %1837 = vperm.xlu2 %4011, %v4807_v45  }
 0x148   : > { %6894 = vst [vmem:[#allocation56_spill] sm:$0xff] %v4928_v18  ;;  %v2275_v1 = vmul.f32 16.0, %v4947_v2 }
 0x149   : > { %v4932_v33 = vpop.permute.xlu1 %1498  ;;  %v1586_v15 = vpop.permute.xlu2 %1585 }
 0x14a   : > { %6895 = vst [vmem:[#allocation57_spill] sm:$0xff] %v4932_v33 }
 0x14b   : > { %1606 = vst.msk [vmem:[#allocation2 + $0x120] sm:$0xff] %vm1601_vm1, %v1586_v15  ;;  %v3910_v15 = vld [vmem:[%s4454_s26 + $0x230] sm:$0xff] }
 0x14d   : > { %2186 = vrot.lane.b32.xlu0 %v3907_v16, %s4142_s1  ;;  %v2286_v16 = vmul.f32 0.5, %v3921_v51  ;;  %v3926_v51 = vadd.f32 -1.0, %v2275_v1 }
 0x14f   : > { %v4941_v18 = vpop.permute.xlu0 %1774  ;;  %1847 = vperm.xlu1 %4010, %v4580_v38   ;;  %1852 = vperm.xlu2 %4011, %v4833_v47   ;;  %v4962_v53 = vfloor.f32 %v2286_v16 }
 0x150   : > { %6896 = vst [vmem:[#allocation58_spill] sm:$0xff] %v4941_v18  ;;  %v3876_v18 = vld [vmem:[%s4310_s23 + $0x60] sm:$0xff] }
 0x151   : > { %v4945_v55 = vpop.permute.xlu1 %1510  ;;  %v1592_v33 = vpop.permute.xlu2 %1591 }
 0x152   : > { %6897 = vst [vmem:[#allocation59_spill] sm:$0xff] %v4945_v55 }
 0x153   : > { %1609 = vst.msk [vmem:[#allocation2 + $0x138] sm:$0xff] %vm1601_vm1, %v1592_v33 }
 0x155   : > { %2192 = vrot.lane.b32.xlu0 %v3910_v15, %s4142_s1  ;;  %v4964_v15 = vadd.f32 1.0, %v3876_v18 }
 0x157   : > { %v4954_v7 = vpop.permute.xlu0 %1789  ;;  %4012 = vset.pattern.permute.xlu1 %v6899_v36  ;;  %4013 = vset.pattern.permute.xlu2 %v6899_v36  ;;  %6901 = vst [vmem:[#allocation62_spill] sm:$0xff] %v4964_v15  ;;  %v2273_v55 = vmul.f32 16.0, %v4964_v15 }
 0x158   : > { %6898 = vst [vmem:[#allocation60_spill] sm:$0xff] %v4954_v7  ;;  %1879 = vperm.xlu1 %4012, %v4597_v6   ;;  %1883 = vperm.xlu2 %4013, %v4659_v19   ;;  %v4968_v7 = vmul.f32 0.5, %v3926_v51  ;;  %v4986_v51 = vsub.f32 %v2286_v16, %v4962_v53  ;;  %v3874_v16 = vld [vmem:[%s4310_s23 + $0x50] sm:$0xff] }
 0x159   : > { %v1578_v28 = vpop.permute.xlu1 %1577  ;;  %v4960_v33 = vpop.permute.xlu2 %1667  ;;  %v3924_v1 = vadd.f32 -1.0, %v2273_v55 }
 0x15a   : > { %6900 = vst [vmem:[#allocation61_spill] sm:$0xff] %v4960_v33  ;;  %v4979_v18 = vfloor.f32 %v4968_v7 }
 0x15b   : > { %1602 = vst.msk [vmem:[#allocation2 + $0x100] sm:$0xff] %vm1601_vm1, %v1578_v28  ;;  %v4981_v28 = vadd.f32 1.0, %v3879_v52  ;;  %v6792_v52 = vsub.f32 1.0, %v4986_v51 }
 0x15d   : > { %2323 = vperm.xlu0 %4005, %v4962_v53   ;;  %6904 = vst [vmem:[#allocation65_spill] sm:$0xff] %v4981_v28 }
 0x15f   : > { %v4972_v6 = vpop.permute.xlu0 %1804 }
 0x160   : > { %6902 = vst [vmem:[#allocation63_spill] sm:$0xff] %v4972_v6  ;;  %1887 = vperm.xlu1 %4012, %v4556_v14   ;;  %1891 = vperm.xlu2 %4013, %v4615_v43   ;;  %v2289_v14 = vmul.f32 0.5, %v3924_v1  ;;  %v2276_v43 = vmul.f32 16.0, %v4981_v28 }
 0x161   : > { %v1584_v19 = vpop.permute.xlu1 %1583  ;;  %v4976_v33 = vpop.permute.xlu2 %1677 }
 0x162   : > { %6903 = vst [vmem:[#allocation64_spill] sm:$0xff] %v4976_v33  ;;  %v3927_v33 = vadd.f32 -1.0, %v2276_v43 }
 0x163   : > { %1605 = vst.msk [vmem:[#allocation2 + $0x118] sm:$0xff] %vm1601_vm1, %v1584_v19  ;;  %v4996_v19 = vfloor.f32 %v2289_v14 }
 0x165   : > { %2348 = vperm.xlu0 %4005, %v4979_v18   ;;  %v5003_v1 = vsub.f32 %v2289_v14, %v4996_v19  ;;  %v3877_v14 = vld [vmem:[%s4310_s23 + $0x68] sm:$0xff] }
 0x167   : > { %v4989_v6 = vpop.permute.xlu0 %1827  ;;  %6907 = vst [vmem:[#allocation68_spill] sm:$0xff] %v5003_v1 }
 0x168   : > { %6905 = vst [vmem:[#allocation66_spill] sm:$0xff] %v4989_v6  ;;  %1899 = vperm.xlu1 %4012, %v4573_v27   ;;  %1903 = vperm.xlu2 %4013, %v4635_v11   ;;  %v2292_v27 = vmul.f32 0.5, %v3927_v33  ;;  %v5005_v11 = vadd.f32 1.0, %v3874_v16  ;;  %v6911_v6 = vsub.f32 1.0, %v4675_v20 }
 0x169   : > { %v1590_v55 = vpop.permute.xlu1 %1589  ;;  %v4993_v15 = vpop.permute.xlu2 %1692 }
 0x16a   : > { %6906 = vst [vmem:[#allocation67_spill] sm:$0xff] %v4993_v15  ;;  %v6910_v15 = vsub.f32 1.0, %v4785_v42  ;;  %v5018_v34 = vfloor.f32 %v2292_v27  ;;  %v2271_v33 = vmul.f32 16.0, %v5005_v11 }
 0x16b   : > { %1608 = vst.msk [vmem:[#allocation2 + $0x130] sm:$0xff] %vm1601_vm1, %v1590_v55 }
 0x16c   : > { %6908 = vst [vmem:[#allocation69_spill] sm:$0xff] %v5005_v11  ;;  %v3922_v16 = vadd.f32 -1.0, %v2271_v33 }
 0x16d   : > { %2387 = vperm.xlu0 %4005, %v6792_v52   ;;  %v6797_v52 = vsub.f32 1.0, %v5003_v1  ;;  %6914 = vst [vmem:[#allocation73_spill] sm:$0xff] %v5018_v34 }
 0x16f   : > { %v5007_v28 = vpop.permute.xlu0 %1842 }
 0x170   : > { %6909 = vst [vmem:[#allocation70_spill] sm:$0xff] %v5007_v28  ;;  %1919 = vperm.xlu1 %4012, %v6910_v15   ;;  %1923 = vperm.xlu2 %4013, %v6911_v6   ;;  %v5025_v15 = vsub.f32 %v2292_v27, %v5018_v34  ;;  %v5027_v6 = vadd.f32 1.0, %v3877_v14  ;;  %v2287_v27 = vmul.f32 0.5, %v3922_v16 }
 0x171   : > { %v5013_v43 = vpop.permute.xlu1 %1662  ;;  %v5015_v55 = vpop.permute.xlu2 %1723 }
 0x172   : > { %6912 = vst [vmem:[#allocation71_spill] sm:$0xff] %v5013_v43  ;;  %v6918_v43 = vsub.f32 1.0, %v4708_v21  ;;  %v2274_v33 = vmul.f32 16.0, %v5027_v6  ;;  %v5042_v14 = vfloor.f32 %v2287_v27 }
 0x173   : > { %6913 = vst [vmem:[#allocation72_spill] sm:$0xff] %v5015_v55  ;;  %v6917_v55 = vsub.f32 1.0, %v4807_v45 }
 0x174   : > { %6915 = vst [vmem:[#allocation74_spill] sm:$0xff] %v5025_v15  ;;  %v5053_v16 = vadd.f32 1.0, %v5042_v14 }
 0x175   : > { %2402 = vperm.xlu0 %4005, %v6797_v52   ;;  %6916 = vst [vmem:[#allocation75_spill] sm:$0xff] %v5027_v6  ;;  %v6800_v52 = vsub.f32 1.0, %v5025_v15 }
 0x177   : > { %v2133_v28 = vpop.permute.xlu0 %2132 }
 0x178   : > { %2229 = vst.msk [vmem:[#allocation2 + $0x180] sm:$0xff] %vm2228_vm2, %v2133_v28  ;;  %1931 = vperm.xlu1 %4012, %v6917_v55   ;;  %1935 = vperm.xlu2 %4013, %v6918_v43   ;;  %v3925_v28 = vadd.f32 -1.0, %v2274_v33  ;;  %v6921_v43 = vsub.f32 1.0, %v4833_v47 }
 0x179   : > { %v5034_v11 = vpop.permute.xlu1 %1672  ;;  %v5036_v1 = vpop.permute.xlu2 %1738 }
 0x17a   : > { %6919 = vst [vmem:[#allocation76_spill] sm:$0xff] %v5034_v11  ;;  %v5055_v11 = vmul.f32 0.5, %v3925_v28 }
 0x17b   : > { %6920 = vst [vmem:[#allocation77_spill] sm:$0xff] %v5036_v1 }
 0x17c   : > { %v5059_v33 = vfloor.f32 %v5055_v11 }
 0x17d   : > { %2417 = vperm.xlu0 %4005, %v6800_v52  }
 0x17e   : > { %v5069_v28 = vadd.f32 1.0, %v5059_v33 }
 0x17f   : > { %v2139_v8 = vpop.permute.xlu0 %2138 }
 0x180   : > { %2232 = vst.msk [vmem:[#allocation2 + $0x198] sm:$0xff] %vm2228_vm2, %v2139_v8  ;;  %1943 = vperm.xlu1 %4012, %v6921_v43   ;;  %1955 = vperm.xlu2 %4013, %v4846_v25  }
 0x181   : > { %v5048_v55 = vpop.permute.xlu1 %1687  ;;  %v5050_v1 = vpop.permute.xlu2 %1769  ;;  %6925 = vst [vmem:[#allocation81_spill] sm:$0xff] %v5069_v28 }
 0x182   : > { %6922 = vst [vmem:[#allocation78_spill] sm:$0xff] %v5048_v55  ;;  %v3872_v55 = vld [vmem:[%s4310_s23 + $0x40] sm:$0xff] }
 0x185   : > { %2456 = vperm.xlu0 %4005, %v5053_v16  }
 0x187   : > { %v2145_v8 = vpop.permute.xlu0 %2144 }
 0x188   : > { %2235 = vst.msk [vmem:[#allocation2 + $0x1b0] sm:$0xff] %vm2228_vm2, %v2145_v8  ;;  %1963 = vperm.xlu1 %4012, %v4867_v0   ;;  %1967 = vperm.xlu2 %4013, %v4870_v26   ;;  %v5080_v8 = vsub.f32 %v2287_v27, %v5042_v14  ;;  %v3917_v27 = vld [vmem:[%s4454_s26 + $0x268] sm:$0xff] }
 0x189   : > { %v5064_v25 = vpop.permute.xlu1 %1718  ;;  %v5066_v43 = vpop.permute.xlu2 %1784 }
 0x18a   : > { %6923 = vst [vmem:[#allocation79_spill] sm:$0xff] %v5064_v25 }
 0x18b   : > { %6924 = vst [vmem:[#allocation80_spill] sm:$0xff] %v5066_v43  ;;  %v5084_v43 = vadd.f32 1.0, %v3872_v55 }
 0x18d   : > { %2471 = vperm.xlu0 %4005, %v5069_v28  }
 0x18f   : > { %v2151_v52 = vpop.permute.xlu0 %2150 }
 0x190   : > { %2238 = vst.msk [vmem:[#allocation2 + $0x1c8] sm:$0xff] %vm2228_vm2, %v2151_v52  ;;  %1975 = vperm.xlu1 %4012, %v4892_v24   ;;  %1979 = vperm.xlu2 %4013, %v4895_v46   ;;  %v2842_v52 = vmul.f32 8.0, %v5084_v43 }
 0x191   : > { %v5075_v0 = vpop.permute.xlu1 %1733  ;;  %v5077_v26 = vpop.permute.xlu2 %1799 }
 0x192   : > { %6926 = vst [vmem:[#allocation82_spill] sm:$0xff] %v5075_v0  ;;  %v3928_v55 = vadd.f32 -1.0, %v2842_v52  ;;  %v3913_v0 = vld [vmem:[%s4454_s26 + $0x248] sm:$0xff]  ;;  %v2843_v52 = vmul.f32 8.0, %v4934_v37 }
 0x193   : > { %6927 = vst [vmem:[#allocation83_spill] sm:$0xff] %v5077_v26 }
 0x195   : > { %2512 = vperm.xlu0 %4005, %v5080_v8  }
 0x197   : > { %v2157_v25 = vpop.permute.xlu0 %2156 }
 0x198   : > { %2241 = vst.msk [vmem:[#allocation2 + $0x1e0] sm:$0xff] %vm2228_vm2, %v2157_v25  ;;  %1995 = vperm.xlu1 %4012, %v4546_v60   ;;  %1999 = vperm.xlu2 %4013, %v4785_v42  }
 0x199   : > { %v5089_v46 = vpop.permute.xlu1 %1748  ;;  %v5091_v24 = vpop.permute.xlu2 %1822 }
 0x19a   : > { %6928 = vst [vmem:[#allocation84_spill] sm:$0xff] %v5089_v46  ;;  %v2858_v46 = vmul.f32 0.5, %v3928_v55 }
 0x19b   : > { %6929 = vst [vmem:[#allocation85_spill] sm:$0xff] %v5091_v24 }
 0x19c   : > { %v5105_v24 = vfloor.f32 %v2858_v46 }
 0x19d   : > { %2819 = vrot.lane.b32.xlu0 %v3917_v27, %s4143_s24 }
 0x19e   : > { %v5116_v55 = vsub.f32 %v2858_v46, %v5105_v24 }
 0x19f   : > { %v2163_v26 = vpop.permute.xlu0 %2162 }
 0x1a0   : > { %2244 = vst.msk [vmem:[#allocation2 + $0x1f8] sm:$0xff] %vm2228_vm2, %v2163_v26  ;;  %2007 = vperm.xlu1 %4012, %v4563_v31   ;;  %2011 = vperm.xlu2 %4013, %v4807_v45  }
 0x1a1   : > { %v5099_v25 = vpop.permute.xlu1 %1779  ;;  %v5101_v42 = vpop.permute.xlu2 %1837 }
 0x1a2   : > { %6930 = vst [vmem:[#allocation86_spill] sm:$0xff] %v5099_v25  ;;  %v3881_v25 = vld [vmem:[%s4454_s26 + $0x148] sm:$0xff] }
 0x1a3   : > { %6931 = vst [vmem:[#allocation87_spill] sm:$0xff] %v5101_v42  ;;  %v3929_v42 = vadd.f32 -1.0, %v2843_v52 }
 0x1a5   : > { %2811 = vrot.lane.b32.xlu0 %v3913_v0, %s4143_s24  ;;  %v2848_v0 = vmul.f32 8.0, %v4947_v2  ;;  %v5122_v6 = vmul.f32 0.5, %v3929_v42 }
 0x1a7   : > { %v2169_v27 = vpop.permute.xlu0 %2168  ;;  %v3934_v28 = vadd.f32 -1.0, %v2848_v0  ;;  %v5130_v46 = vfloor.f32 %v5122_v6  ;;  %v3875_v0 = vld [vmem:[%s4310_s23 + $0x58] sm:$0xff]  ;;  %s3841_s23 = sshll.u32 %s607_s27, 3 }
 0x1a8   : > { %2247 = vst.msk [vmem:[#allocation2 + $0x210] sm:$0xff] %vm2228_vm2, %v2169_v27  ;;  %2019 = vperm.xlu1 %4012, %v4580_v38   ;;  %2023 = vperm.xlu2 %4013, %v4833_v47   ;;  %v3882_v27 = vld [vmem:[%s4454_s26 + $0x150] sm:$0xff] }
 0x1a9   : > { %v5111_v45 = vpop.permute.xlu1 %1794  ;;  %v5113_v26 = vpop.permute.xlu2 %1852  ;;  %v2864_v52 = vmul.f32 0.5, %v3934_v28 }
 0x1aa   : > { %6932 = vst [vmem:[#allocation88_spill] sm:$0xff] %v5111_v45  ;;  %v3885_v45 = vld [vmem:[%s4454_s26 + $0x168] sm:$0xff] }
 0x1ab   : > { %6933 = vst [vmem:[#allocation89_spill] sm:$0xff] %v5113_v26  ;;  %v5142_v26 = vadd.f32 1.0, %v3875_v0 }
 0x1ad   : > { %3049 = vperm.xlu0 %4005, %v5116_v55   ;;  %v701_v37 = vpop.f32.mrf.mxu1  ;;  %v2845_v0 = vmul.f32 8.0, %v5142_v26 }
 0x1ae   : > { %4070 = vrcp.f32 %v701_v37 }
 0x1af   : > { %v2175_v47 = vpop.permute.xlu0 %2174 }
 0x1b0   : > { %2250 = vst.msk [vmem:[#allocation2 + $0x228] sm:$0xff] %vm2228_vm2, %v2175_v47  ;;  %2134 = vrot.lane.b32.xlu1 %v3881_v25, %s4142_s1  ;;  %2136 = vrot.lane.b32.xlu2 %v3882_v27, %s4142_s1  ;;  %v3884_v47 = vld [vmem:[%s4454_s26 + $0x160] sm:$0xff]  ;;  %v5140_v27 = vfloor.f32 %v2864_v52 }
 0x1b1   : > { %v5127_v2 = vpop.permute.xlu1 %1817  ;;  %4014 = vset.pattern.permute.xlu2 %v6870_v4  ;;  %4015 = vset.pattern.permute.xlu1 %v6870_v4 }
 0x1b2   : > { %v5134_v42 = vpop.permute.xlu2 %1883  ;;  %6935 = vst [vmem:[#allocation91_spill] sm:$0xff] %v5140_v27 }
 0x1b3   : > { %6934 = vst [vmem:[#allocation90_spill] sm:$0xff] %v5134_v42 }
 0x1b4   : > { %v4071_v37 = vpop.eup %4070 }
 0x1b5   : > { %2894 = vperm.xlu0 %4005, %v5130_v46   ;;  %v705_v25 = vmul.f32 %v4071_v37, %v4876_v35  ;;  %v5152_v35 = vsub.f32 %v2864_v52, %v5140_v27 }
 0x1b7   : > { %754 = vmatpush.msra.mxu2 %v705_v25  ;;  %v2181_v28 = vpop.permute.xlu0 %2180  ;;  %6937 = vst [vmem:[#allocation93_spill] sm:$0xff] %v5152_v35  ;;  %v3887_v25 = vld [vmem:[%s4454_s26 + $0x178] sm:$0xff] }
 0x1b8   : > { %2253 = vst.msk [vmem:[#allocation2 + $0x240] sm:$0xff] %vm2228_vm2, %v2181_v28  ;;  %2140 = vrot.lane.b32.xlu1 %v3884_v47, %s4142_s1  ;;  %2142 = vrot.lane.b32.xlu2 %v3885_v45, %s4142_s1  ;;  %v3931_v47 = vadd.f32 -1.0, %v2845_v0  ;;  %v3888_v45 = vld [vmem:[%s4454_s26 + $0x180] sm:$0xff] }
 0x1b9   : > { %3460 = vmatpush.msrb.mxu2 %v6881_v10  ;;  %v5149_v42 = vpop.permute.xlu1 %1832 }
 0x1ba   : > { %6936 = vst [vmem:[#allocation92_spill] sm:$0xff] %v5149_v42  ;;  %v5156_v37 = vpop.permute.xlu2 %1891  ;;  %v3318_v42 = vld [vmem:[#allocation2 + $0x120] sm:$0xff] }
 0x1bb   : > { %3461 = vmatpush.msrb.mxu2 %v6881_v10  ;;  %6938 = vst [vmem:[#allocation94_spill] sm:$0xff] %v5156_v37  ;;  %v5169_v37 = vmul.f32 0.5, %v3931_v47  ;;  %v3320_v47 = vld [vmem:[#allocation2 + $0x130] sm:$0xff] }
 0x1bd   : > { %3462 = vmatpush.msrb.mxu2 %v6881_v10  ;;  %3079 = vperm.xlu0 %4005, %v5152_v35   ;;  %6940 = vst [vmem:[#allocation96_spill] sm:$0xff] %v5169_v37  ;;  %v3890_v35 = vld [vmem:[%s4454_s26 + $0x190] sm:$0xff] }
 0x1bf   : > { %3463 = vmatpush.msrb.mxu2 %v6881_v10  ;;  %v2187_v28 = vpop.permute.xlu0 %2186 }
 0x1c0   : > { %2256 = vst.msk [vmem:[#allocation2 + $0x258] sm:$0xff] %vm2228_vm2, %v2187_v28  ;;  %2146 = vrot.lane.b32.xlu1 %v3887_v25, %s4142_s1  ;;  %2148 = vrot.lane.b32.xlu2 %v3888_v45, %s4142_s1  ;;  %v5178_v28 = vfloor.f32 %v5169_v37  ;;  %v3891_v25 = vld [vmem:[%s4454_s26 + $0x198] sm:$0xff]  ;;  %v3319_v37 = vld [vmem:[#allocation2 + $0x128] sm:$0xff] }
 0x1c1   : > { %3464 = vmatpush.msrb.mxu2 %v6881_v10  ;;  %v5167_v52 = vpop.permute.xlu1 %1847 }
 0x1c2   : > { %6939 = vst [vmem:[#allocation95_spill] sm:$0xff] %v5167_v52  ;;  %v5172_v0 = vpop.permute.xlu2 %1903  ;;  %v3321_v52 = vld [vmem:[#allocation2 + $0x138] sm:$0xff] }
 0x1c3   : > { %3465 = vmatpush.msrb.mxu2 %v6881_v10  ;;  %6941 = vst [vmem:[#allocation97_spill] sm:$0xff] %v5172_v0 }
 0x1c4   : > { %6942 = vst [vmem:[#allocation98_spill] sm:$0xff] %v5178_v28 }
 0x1c5   : > { %3466 = vmatpush.msrb.mxu2 %v6881_v10  ;;  %2537 = vperm.xlu0 %4005, %v5025_v15   ;;  %v5186_v15 = vadd.f32 1.0, %v5178_v28  ;;  %v3315_v28 = vld [vmem:[#allocation2 + $0x108] sm:$0xff] }
 0x1c7   : > { %3467 = vmatpush.msrb.mxu2 %v6881_v10  ;;  %v2193_v45 = vpop.permute.xlu0 %2192  ;;  %6943 = vst [vmem:[#allocation99_spill] sm:$0xff] %v5186_v15 }
 0x1c8   : > { %2259 = vst.msk [vmem:[#allocation2 + $0x270] sm:$0xff] %vm2228_vm2, %v2193_v45  ;;  %2152 = vrot.lane.b32.xlu1 %v3890_v35, %s4142_s1  ;;  %2154 = vrot.lane.b32.xlu2 %v3891_v25, %s4142_s1  ;;  %v3893_v45 = vld [vmem:[%s4454_s26 + $0x1a8] sm:$0xff]  ;;  %v3894_v35 = vld [vmem:[%s4454_s26 + $0x1b0] sm:$0xff]  ;;  %v3317_v25 = vld [vmem:[#allocation2 + $0x118] sm:$0xff] }
 0x1c9   : > { %3468 = vmatpush.msrb.mxu2 %v3321_v52 }
 0x1ca   : > { %v5188_v0 = vpop.permute.xlu1 %1879  ;;  %v5190_v10 = vpop.permute.xlu2 %1923 }
 0x1cb   : > { %3469 = vmatpush.msrb.mxu2 %v3320_v47  ;;  %6944 = vst [vmem:[#allocation100_spill] sm:$0xff] %v5190_v10  ;;  %v3316_v47 = vld [vmem:[#allocation2 + $0x110] sm:$0xff]  ;;  %v982_v10 = vld [vmem:[%s4454_s26 + $0xc8] sm:$0xff] }
 0x1cc   : > { %1022 = vst.msk [vmem:[#allocation2 + $0xc8] sm:$0xff] %vm639_vm0, %v982_v10 }
 0x1cd   : > { %3470 = vmatpush.msrb.mxu2 %v3319_v37  ;;  %3016 = vperm.xlu0 %4005, %v5186_v15  }
 0x1cf   : > { %3471 = vmatpush.msrb.mxu2 %v3318_v42  ;;  %v5195_v52 = vpop.permute.xlu0 %2323  ;;  %v3314_v42 = vld [vmem:[#allocation2 + $0x100] sm:$0xff] }
 0x1d0   : > { %6945 = vst [vmem:[#allocation101_spill] sm:$0xff] %v5195_v52  ;;  %2158 = vrot.lane.b32.xlu1 %v3893_v45, %s4142_s1  ;;  %2160 = vrot.lane.b32.xlu2 %v3894_v35, %s4142_s1  ;;  %v3896_v52 = vld [vmem:[%s4454_s26 + $0x1c0] sm:$0xff]  ;;  %v3897_v45 = vld [vmem:[%s4454_s26 + $0x1c8] sm:$0xff] }
 0x1d1   : > { %3472 = vmatpush.msrb.mxu2 %v3317_v25 }
 0x1d2   : > { %v5199_v37 = vpop.permute.xlu1 %1887  ;;  %v5201_v15 = vpop.permute.xlu2 %1935 }
 0x1d3   : > { %3473 = vmatpush.msrb.mxu2 %v3316_v47  ;;  %6946 = vst [vmem:[#allocation102_spill] sm:$0xff] %v5199_v37  ;;  %v6969_v37 = vsub.f32 1.0, %v4546_v60  ;;  %v712_v60 = vld [vmem:[%s6718_s9 + $0x30] sm:$0xff] }
 0x1d4   : > { %6947 = vst [vmem:[#allocation103_spill] sm:$0xff] %v5201_v15  ;;  %v3900_v15 = vld [vmem:[%s4454_s26 + $0x1e0] sm:$0xff] }
 0x1d5   : > { %3474 = vmatpush.msrb.mxu2 %v3315_v28  ;;  %4053 = vset.pattern.permute.xlu0 %v6899_v36  ;;  %v3899_v28 = vld [vmem:[%s4454_s26 + $0x1d8] sm:$0xff] }
 0x1d6   : > { %1354 = vperm.xlu0 %4053, %v4367_v48  }
 0x1d7   : > { %3475 = vmatpush.msrb.mxu2 %v3314_v42  ;;  %v5207_v35 = vpop.permute.xlu0 %2348 }
 0x1d8   : > { %6948 = vst [vmem:[#allocation104_spill] sm:$0xff] %v5207_v35  ;;  %2164 = vrot.lane.b32.xlu1 %v3896_v52, %s4142_s1  ;;  %2166 = vrot.lane.b32.xlu2 %v3897_v45, %s4142_s1  ;;  %v3902_v45 = vld [vmem:[%s4454_s26 + $0x1f0] sm:$0xff]  ;;  %v6952_v35 = vsub.f32 1.0, %v4402_v63 }
 0x1da   : > { %v5211_v25 = vpop.permute.xlu1 %1899  ;;  %v5213_v47 = vpop.permute.xlu2 %1955 }
 0x1db   : > { %6949 = vst [vmem:[#allocation105_spill] sm:$0xff] %v5211_v25  ;;  %v3903_v25 = vld [vmem:[%s4454_s26 + $0x1f8] sm:$0xff] }
 0x1de   : > { %1374 = vperm.xlu0 %4053, %v4389_v59  }
 0x1df   : > { %v5218_v48 = vpop.permute.xlu0 %2387 }
 0x1e0   : > { %6950 = vst [vmem:[#allocation106_spill] sm:$0xff] %v5218_v48  ;;  %2170 = vrot.lane.b32.xlu1 %v3899_v28, %s4142_s1  ;;  %2172 = vrot.lane.b32.xlu2 %v3900_v15, %s4142_s1  ;;  %v3905_v28 = vld [vmem:[%s4454_s26 + $0x208] sm:$0xff]  ;;  %v6956_v48 = vsub.f32 1.0, %v4370_v49 }
 0x1e1   : > { %v3909_v49 = vld [vmem:[%s4454_s26 + $0x228] sm:$0xff] }
 0x1e2   : > { %v5222_v42 = vpop.permute.xlu1 %1919  ;;  %v5224_v52 = vpop.permute.xlu2 %1967 }
 0x1e3   : > { %6951 = vst [vmem:[#allocation107_spill] sm:$0xff] %v5224_v52  ;;  %v3906_v52 = vld [vmem:[%s4454_s26 + $0x210] sm:$0xff] }
 0x1e6   : > { %1402 = vperm.xlu0 %4053, %v6952_v35   ;;  %v2269_v35 = vmul.f32 16.0, %v5084_v43  ;;  %v811_v43 = vld [vmem:[%s6720_s11 + $0x78] sm:$0xff] }
 0x1e7   : > { %v5230_v27 = vpop.permute.xlu0 %2402  ;;  %812 = vmatpush.msra.mxu3 %v811_v43  ;;  %v808_v43 = vld [vmem:[%s6720_s11 + $0x60] sm:$0xff] }
 0x1e8   : > { %6953 = vst [vmem:[#allocation108_spill] sm:$0xff] %v5230_v27  ;;  %2176 = vrot.lane.b32.xlu1 %v3902_v45, %s4142_s1  ;;  %2178 = vrot.lane.b32.xlu2 %v3903_v25, %s4142_s1  ;;  %v3908_v27 = vld [vmem:[%s4454_s26 + $0x220] sm:$0xff] }
 0x1ea   : > { %v5234_v59 = vpop.permute.xlu1 %1931  ;;  %v5236_v15 = vpop.permute.xlu2 %1979 }
 0x1eb   : > { %6954 = vst [vmem:[#allocation109_spill] sm:$0xff] %v5234_v59 }
 0x1ec   : > { %6955 = vst [vmem:[#allocation110_spill] sm:$0xff] %v5236_v15  ;;  %v3920_v15 = vadd.f32 -1.0, %v2269_v35  ;;  %v3911_v35 = vld [vmem:[%s4454_s26 + $0x238] sm:$0xff] }
 0x1ee   : > { %1414 = vperm.xlu0 %4053, %v6956_v48  }
 0x1ef   : > { %v5242_v63 = vpop.permute.xlu0 %2417 }
 0x1f0   : > { %6957 = vst [vmem:[#allocation111_spill] sm:$0xff] %v5242_v63  ;;  %2182 = vrot.lane.b32.xlu1 %v3905_v28, %s4142_s1  ;;  %2184 = vrot.lane.b32.xlu2 %v3906_v52, %s4142_s1  ;;  %v2285_v28 = vmul.f32 0.5, %v3920_v15  ;;  %v2272_v52 = vmul.f32 16.0, %v5142_v26  ;;  %v809_v26 = vld [vmem:[%s6720_s11 + $0x68] sm:$0xff] }
 0x1f2   : > { %v5247_v45 = vpop.permute.xlu1 %1943  ;;  %v5249_v25 = vpop.permute.xlu2 %1999 }
 0x1f3   : > { %6958 = vst [vmem:[#allocation112_spill] sm:$0xff] %v5247_v45 }
 0x1f6   : > { %1442 = vperm.xlu0 %4053, %v4381_v56   ;;  %v810_v56 = vld [vmem:[%s6720_s11 + $0x70] sm:$0xff] }
 0x1f7   : > { %v5254_v48 = vpop.permute.xlu0 %2456  ;;  %813 = vmatpush.msra.mxu3 %v810_v56 }
 0x1f8   : > { %2188 = vrot.lane.b32.xlu1 %v3908_v27, %s4142_s1  ;;  %2190 = vrot.lane.b32.xlu2 %v3909_v49, %s4142_s1  ;;  %v5270_v27 = vfloor.f32 %v2285_v28  ;;  %v3923_v49 = vadd.f32 -1.0, %v2272_v52 }
 0x1f9   : > { %814 = vmatpush.msra.mxu3 %v809_v26  ;;  %v806_v26 = vld [vmem:[%s6720_s11 + $0x50] sm:$0xff] }
 0x1fa   : > { %v5262_v63 = vpop.permute.xlu1 %1963  ;;  %v5264_v45 = vpop.permute.xlu2 %2011  ;;  %v5283_v59 = vmul.f32 0.5, %v3923_v49  ;;  %v805_v49 = vld [vmem:[%s6720_s11 + $0x48] sm:$0xff] }
 0x1fb   : > { %6959 = vst [vmem:[#allocation113_spill] sm:$0xff] %v5262_v63  ;;  %815 = vmatpush.msra.mxu3 %v808_v43 }
 0x1fc   : > { %6960 = vst [vmem:[#allocation114_spill] sm:$0xff] %v5264_v45 }
 0x1fe   : > { %1454 = vperm.xlu0 %4053, %v4393_v61   ;;  %v807_v61 = vld [vmem:[%s6720_s11 + $0x58] sm:$0xff] }
 0x1ff   : > { %v5276_v15 = vpop.permute.xlu0 %2471  ;;  %816 = vmatpush.msra.mxu3 %v807_v61  ;;  %v804_v61 = vld [vmem:[%s6720_s11 + $0x40] sm:$0xff] }
 0x200   : > { %6961 = vst [vmem:[#allocation115_spill] sm:$0xff] %v5276_v15  ;;  %2194 = vrot.lane.b32.xlu1 %v3911_v35, %s4142_s1  ;;  %2318 = vperm.xlu2 %4014, %v5270_v27   ;;  %v5296_v35 = vfloor.f32 %v5283_v59  ;;  %v706_v15 = vld [vmem:[%s6718_s9] sm:$0xff]  ;;  %s609_s1 = scalar_lea.vmem [#allocation3], %s3841_s23  ;;  %s4094_s23 = scalar_lea.hbm %s6727_s18, 16 }
 0x201   : > { %817 = vmatpush.msra.mxu3 %v806_v26  ;;  %3848 = vmatmul.msk.f32.vlgmr.msra.gmra.mxu2 %vm714_vm3, %v706_v15  ;;  %v801_v15 = vld [vmem:[%s6720_s11 + $0x28] sm:$0xff]  ;;  %s3739_s25 = sshll.u32 %s609_s1, 4  ;;  %s3740_s25 = int_to_ptr.vmem [resolvable:$true] %s3739_s25 }
 0x202   : > { %v5288_v52 = vpop.permute.xlu1 %1975  ;;  %v5290_v56 = vpop.permute.xlu2 %2023 }
 0x203   : > { %6962 = vst [vmem:[#allocation116_spill] sm:$0xff] %v5288_v52  ;;  %818 = vmatpush.msra.mxu3 %v805_v49 }
 0x204   : > { %6963 = vst [vmem:[#allocation117_spill] sm:$0xff] %v5290_v56  ;;  %v5319_v56 = vld [vmem:[#allocation2] sm:$0xff] }
 0x205   : > { %819 = vmatpush.msra.mxu3 %v804_v61  ;;  %3943 = vmatpush.msra.mxu2 %v5319_v56  ;;  %v802_v61 = vld [vmem:[%s6720_s11 + $0x30] sm:$0xff] }
 0x206   : > { %1466 = vperm.xlu0 %4053, %v4408_v3   ;;  %v803_v3 = vld [vmem:[%s6720_s11 + $0x38] sm:$0xff] }
 0x207   : > { %v5302_v43 = vpop.permute.xlu0 %2512  ;;  %820 = vmatpush.msra.mxu3 %v803_v3  ;;  %3944 = vmatpush.msra.mxu2 %v5319_v56  ;;  %v800_v3 = vld [vmem:[%s6720_s11 + $0x20] sm:$0xff] }
 0x208   : > { %2328 = vperm.xlu1 %4015, %v5042_v14   ;;  %2333 = vperm.xlu2 %4014, %v5296_v35  }
 0x209   : > { %821 = vmatpush.msra.mxu3 %v802_v61  ;;  %3945 = vmatpush.msra.mxu2 %v5319_v56  ;;  %v5340_v61 = vsub.f32 %v2285_v28, %v5270_v27  ;;  %v798_v28 = vld [vmem:[%s6720_s11 + $0x10] sm:$0xff] }
 0x20a   : > { %v5315_v26 = vpop.permute.xlu1 %1995  ;;  %v2137_v49 = vpop.permute.xlu2 %2136 }
 0x20b   : > { %2231 = vst.msk [vmem:[#allocation2 + $0x190] sm:$0xff] %vm2228_vm2, %v2137_v49  ;;  %822 = vmatpush.msra.mxu3 %v801_v15  ;;  %v799_v15 = vld [vmem:[%s6720_s11 + $0x18] sm:$0xff]  ;;  %3946 = vmatpush.msra.mxu2 %v5319_v56 }
 0x20d   : > { %823 = vmatpush.msra.mxu3 %v800_v3  ;;  %v6824_v3 = vsub.f32 1.0, %v5340_v61  ;;  %3947 = vmatpush.msra.mxu2 %v5319_v56 }
 0x20e   : > { %1494 = vperm.xlu0 %4053, %v4399_v62   ;;  %v707_v62 = vld [vmem:[%s6718_s9 + $0x8] sm:$0xff] }
 0x20f   : > { %v2820_v49 = vpop.permute.xlu0 %2819  ;;  %3849 = vmatmul.msk.f32.gmra.mxu2 %vm714_vm3, %v707_v62  ;;  %824 = vmatpush.msra.mxu3 %v799_v15  ;;  %v797_v62 = vld [vmem:[%s6720_s11 + $0x8] sm:$0xff] }
 0x210   : > { %2839 = vst.msk [vmem:[#allocation2 + $0x2a8] sm:$0xff] %vm2833_vm4, %v2820_v49  ;;  %2338 = vperm.xlu1 %4015, %v4996_v19   ;;  %2343 = vperm.xlu2 %4014, %v5059_v33  }
 0x211   : > { %825 = vmatpush.msra.mxu3 %v798_v28  ;;  %3948 = vmatpush.msra.mxu2 %v5319_v56  ;;  %v5371_v28 = vsub.f32 %v5283_v59, %v5296_v35 }
 0x212   : > { %v5346_v52 = vpop.permute.xlu1 %2007  ;;  %v2143_v49 = vpop.permute.xlu2 %2142 }
 0x213   : > { %6964 = vst [vmem:[#allocation118_spill] sm:$0xff] %v5346_v52  ;;  %826 = vmatpush.msra.mxu3 %v797_v62  ;;  %v3345_v62 = vld [vmem:[#allocation2 + $0x1f8] sm:$0xff]  ;;  %3949 = vmatpush.msra.mxu2 %v5319_v56  ;;  %v6825_v59 = vsub.f32 1.0, %v5371_v28 }
 0x214   : > { %2234 = vst.msk [vmem:[#allocation2 + $0x1a8] sm:$0xff] %vm2228_vm2, %v2143_v49  ;;  %v796_v49 = vld [vmem:[%s6720_s11] sm:$0xff] }
 0x215   : > { %827 = vmatpush.msra.mxu3 %v796_v49  ;;  %3950 = vmatpush.msra.mxu2 %v5319_v56 }
 0x216   : > { %1506 = vperm.xlu0 %4053, %v4418_v5   ;;  %v708_v5 = vld [vmem:[%s6718_s9 + $0x10] sm:$0xff] }
 0x217   : > { %v2812_v15 = vpop.permute.xlu0 %2811  ;;  %3850 = vmatmul.msk.f32.gmra.mxu2 %vm714_vm3, %v708_v5  ;;  %3501 = vmatpush.msrb.mxu3 %v3345_v62  ;;  %v5390_v5 = vsub.f32 %v5055_v11, %v5059_v33  ;;  %v709_v62 = vld [vmem:[%s6718_s9 + $0x18] sm:$0xff] }
 0x218   : > { %2835 = vst.msk [vmem:[#allocation2 + $0x288] sm:$0xff] %vm2833_vm4, %v2812_v15  ;;  %2353 = vperm.xlu1 %4015, %v5018_v34   ;;  %2382 = vperm.xlu2 %4014, %v6824_v3   ;;  %v6823_v34 = vsub.f32 1.0, %v5080_v8 }
 0x219   : > { %v6826_v11 = vsub.f32 1.0, %v5390_v5 }
 0x21a   : > { %v5375_v45 = vpop.permute.xlu1 %2019  ;;  %v2149_v15 = vpop.permute.xlu2 %2148 }
 0x21b   : > { %6965 = vst [vmem:[#allocation119_spill] sm:$0xff] %v5375_v45 }
 0x21c   : > { %2237 = vst.msk [vmem:[#allocation2 + $0x1c0] sm:$0xff] %vm2228_vm2, %v2149_v15  ;;  %v5397_v15 = vsub.f32 %v4968_v7, %v4979_v18 }
 0x21e   : > { %1518 = vperm.xlu0 %4053, %v4431_v12   ;;  %v6827_v3 = vsub.f32 1.0, %v5397_v15 }
 0x21f   : > { %v5384_v49 = vpop.permute.xlu0 %3049  ;;  %3851 = vmatmul.msk.f32.gmra.mxu2 %vm714_vm3, %v709_v62 }
 0x220   : > { %6966 = vst [vmem:[#allocation120_spill] sm:$0xff] %v5384_v49  ;;  %2392 = vperm.xlu1 %4015, %v6823_v34   ;;  %2397 = vperm.xlu2 %4014, %v6825_v59   ;;  %v972_v59 = vld [vmem:[%s4454_s26 + $0x78] sm:$0xff] }
 0x221   : > { %v988_v49 = vld [vmem:[%s4454_s26 + $0xf8] sm:$0xff]  ;;  %1012 = vst.msk [vmem:[#allocation2 + $0x78] sm:$0xff] %vm639_vm0, %v972_v59  ;;  %v5428_v59 = vadd.f32 1.0, %v5270_v27 }
 0x222   : > { %v2135_v12 = vpop.permute.xlu1 %2134  ;;  %v2155_v34 = vpop.permute.xlu2 %2154  ;;  %1028 = vst.msk [vmem:[#allocation2 + $0xf8] sm:$0xff] %vm639_vm0, %v988_v49  ;;  %v5432_v49 = vadd.f32 1.0, %v4962_v53 }
 0x223   : > { %2230 = vst.msk [vmem:[#allocation2 + $0x188] sm:$0xff] %vm2228_vm2, %v2135_v12  ;;  %v987_v12 = vld [vmem:[%s4454_s26 + $0xf0] sm:$0xff] }
 0x224   : > { %2240 = vst.msk [vmem:[#allocation2 + $0x1d8] sm:$0xff] %vm2228_vm2, %v2155_v34  ;;  %v710_v34 = vld [vmem:[%s6718_s9 + $0x20] sm:$0xff] }
 0x225   : > { %1027 = vst.msk [vmem:[#allocation2 + $0xf0] sm:$0xff] %vm639_vm0, %v987_v12  ;;  %v711_v12 = vld [vmem:[%s6718_s9 + $0x28] sm:$0xff] }
 0x226   : > { %1875 = vperm.xlu0 %4053, %v4475_v29   ;;  %v971_v29 = vld [vmem:[%s4454_s26 + $0x70] sm:$0xff] }
 0x227   : > { %v5407_v7 = vpop.permute.xlu0 %2894  ;;  %3852 = vmatmul.msk.f32.gmra.mxu2 %vm714_vm3, %v710_v34  ;;  %1011 = vst.msk [vmem:[#allocation2 + $0x70] sm:$0xff] %vm639_vm0, %v971_v29  ;;  %v969_v34 = vld [vmem:[%s4454_s26 + $0x60] sm:$0xff] }
 0x228   : > { %6967 = vst [vmem:[#allocation121_spill] sm:$0xff] %v5407_v7  ;;  %2407 = vperm.xlu1 %4015, %v6826_v11   ;;  %2412 = vperm.xlu2 %4014, %v6827_v3   ;;  %v970_v7 = vld [vmem:[%s4454_s26 + $0x68] sm:$0xff]  ;;  %v985_v29 = vld [vmem:[%s4454_s26 + $0xe0] sm:$0xff]  ;;  %v3297_v45 = vld [vmem:[#allocation2 + $0x78] sm:$0xff] }
 0x229   : > { %v986_v3 = vld [vmem:[%s4454_s26 + $0xe8] sm:$0xff]  ;;  %1010 = vst.msk [vmem:[#allocation2 + $0x68] sm:$0xff] %vm639_vm0, %v970_v7  ;;  %3378 = vmatpush.msrb.mxu0 %v3297_v45  ;;  %v3313_v52 = vld [vmem:[#allocation2 + $0xf8] sm:$0xff] }
 0x22a   : > { %v2141_v62 = vpop.permute.xlu1 %2140  ;;  %v2161_v11 = vpop.permute.xlu2 %2160  ;;  %1026 = vst.msk [vmem:[#allocation2 + $0xe8] sm:$0xff] %vm639_vm0, %v986_v3  ;;  %3419 = vmatpush.msrb.mxu1 %v3313_v52  ;;  %v984_v45 = vld [vmem:[%s4454_s26 + $0xd8] sm:$0xff]  ;;  %v5457_v52 = vadd.f32 1.0, %v5296_v35 }
 0x22b   : > { %2233 = vst.msk [vmem:[#allocation2 + $0x1a0] sm:$0xff] %vm2228_vm2, %v2141_v62 }
 0x22c   : > { %2243 = vst.msk [vmem:[#allocation2 + $0x1f0] sm:$0xff] %vm2228_vm2, %v2161_v11  ;;  %v968_v11 = vld [vmem:[%s4454_s26 + $0x58] sm:$0xff] }
 0x22d   : > { %1009 = vst.msk [vmem:[#allocation2 + $0x60] sm:$0xff] %vm639_vm0, %v969_v34  ;;  %v967_v34 = vld [vmem:[%s4454_s26 + $0x50] sm:$0xff] }
 0x22e   : > { %1895 = vperm.xlu0 %4053, %v4483_v32   ;;  %v3296_v32 = vld [vmem:[#allocation2 + $0x70] sm:$0xff]  ;;  %1025 = vst.msk [vmem:[#allocation2 + $0xe0] sm:$0xff] %vm639_vm0, %v985_v29 }
 0x22f   : > { %v5439_v62 = vpop.permute.xlu0 %3079  ;;  %3853 = vmatmul.msk.f32.gmra.mxu2 %vm714_vm3, %v711_v12  ;;  %3379 = vmatpush.msrb.mxu0 %v3296_v32  ;;  %1008 = vst.msk [vmem:[#allocation2 + $0x58] sm:$0xff] %vm639_vm0, %v968_v11  ;;  %v3312_v29 = vld [vmem:[#allocation2 + $0xf0] sm:$0xff]  ;;  %v5461_v32 = vadd.f32 1.0, %v4996_v19 }
 0x230   : > { %6968 = vst [vmem:[#allocation122_spill] sm:$0xff] %v5439_v62  ;;  %2446 = vperm.xlu1 %4015, %v5428_v59   ;;  %2451 = vperm.xlu2 %4014, %v5432_v49   ;;  %v983_v12 = vld [vmem:[%s4454_s26 + $0xd0] sm:$0xff]  ;;  %v3295_v11 = vld [vmem:[#allocation2 + $0x68] sm:$0xff] }
 0x231   : > { %3420 = vmatpush.msrb.mxu1 %v3312_v29  ;;  %1024 = vst.msk [vmem:[#allocation2 + $0xd8] sm:$0xff] %vm639_vm0, %v984_v45  ;;  %3380 = vmatpush.msrb.mxu0 %v3295_v11  ;;  %v965_v29 = vld [vmem:[%s4454_s26 + $0x40] sm:$0xff]  ;;  %v964_v11 = vld [vmem:[%s4454_s26 + $0x38] sm:$0xff] }
 0x232   : > { %v2147_v3 = vpop.permute.xlu1 %2146  ;;  %v2167_v7 = vpop.permute.xlu2 %2166  ;;  %1007 = vst.msk [vmem:[#allocation2 + $0x50] sm:$0xff] %vm639_vm0, %v967_v34 }
 0x233   : > { %2236 = vst.msk [vmem:[#allocation2 + $0x1b8] sm:$0xff] %vm2228_vm2, %v2147_v3  ;;  %v3344_v62 = vld [vmem:[#allocation2 + $0x1f0] sm:$0xff]  ;;  %v966_v3 = vld [vmem:[%s4454_s26 + $0x48] sm:$0xff] }
 0x234   : > { %2246 = vst.msk [vmem:[#allocation2 + $0x208] sm:$0xff] %vm2228_vm2, %v2167_v7  ;;  %3502 = vmatpush.msrb.mxu3 %v3344_v62  ;;  %v3311_v7 = vld [vmem:[#allocation2 + $0xe8] sm:$0xff]  ;;  %v3294_v63 = vld [vmem:[#allocation2 + $0x60] sm:$0xff] }
 0x235   : > { %3421 = vmatpush.msrb.mxu1 %v3311_v7  ;;  %1023 = vst.msk [vmem:[#allocation2 + $0xd0] sm:$0xff] %vm639_vm0, %v983_v12  ;;  %3381 = vmatpush.msrb.mxu0 %v3294_v63  ;;  %v3310_v45 = vld [vmem:[#allocation2 + $0xe0] sm:$0xff]  ;;  %v980_v7 = vld [vmem:[%s4454_s26 + $0xb8] sm:$0xff] }
 0x236   : > { %1915 = vperm.xlu0 %4053, %v6969_v37   ;;  %1006 = vst.msk [vmem:[#allocation2 + $0x48] sm:$0xff] %vm639_vm0, %v966_v3  ;;  %v3293_v37 = vld [vmem:[#allocation2 + $0x58] sm:$0xff]  ;;  %v981_v63 = vld [vmem:[%s4454_s26 + $0xc0] sm:$0xff]  ;;  %v5487_v3 = vadd.f32 1.0, %v4979_v18 }
 0x237   : > { %v5469_v62 = vpop.permute.xlu0 %2537  ;;  %3422 = vmatpush.msrb.mxu1 %v3310_v45  ;;  %3382 = vmatpush.msrb.mxu0 %v3293_v37  ;;  %1005 = vst.msk [vmem:[#allocation2 + $0x40] sm:$0xff] %vm639_vm0, %v965_v29  ;;  %v6971_v29 = vsub.f32 1.0, %v4563_v31  ;;  %v713_v31 = vld [vmem:[%s6718_s9 + $0x38] sm:$0xff] }
 0x238   : > { %6970 = vst [vmem:[#allocation123_spill] sm:$0xff] %v5469_v62  ;;  %2461 = vperm.xlu1 %4015, %v5457_v52   ;;  %2466 = vperm.xlu2 %4014, %v5461_v32   ;;  %v3309_v10 = vld [vmem:[#allocation2 + $0xd8] sm:$0xff] }
 0x239   : > { %3854 = vmatmul.msk.f32.gmra.mxu2 %vm714_vm3, %v712_v60  ;;  %3423 = vmatpush.msrb.mxu1 %v3309_v10  ;;  %v3292_v45 = vld [vmem:[#allocation2 + $0x50] sm:$0xff]  ;;  %1021 = vst.msk [vmem:[#allocation2 + $0xc0] sm:$0xff] %vm639_vm0, %v981_v63  ;;  %v962_v10 = vld [vmem:[%s4454_s26 + $0x28] sm:$0xff] }
 0x23a   : > { %v2153_v34 = vpop.permute.xlu1 %2152  ;;  %v2173_v12 = vpop.permute.xlu2 %2172  ;;  %v963_v60 = vld [vmem:[%s4454_s26 + $0x30] sm:$0xff]  ;;  %3383 = vmatpush.msrb.mxu0 %v3292_v45  ;;  %1004 = vst.msk [vmem:[#allocation2 + $0x38] sm:$0xff] %vm639_vm0, %v964_v11  ;;  %v3307_v63 = vld [vmem:[#allocation2 + $0xc8] sm:$0xff] }
 0x23b   : > { %2239 = vst.msk [vmem:[#allocation2 + $0x1d0] sm:$0xff] %vm2228_vm2, %v2153_v34  ;;  %v979_v34 = vld [vmem:[%s4454_s26 + $0xb0] sm:$0xff] }
 0x23c   : > { %2249 = vst.msk [vmem:[#allocation2 + $0x220] sm:$0xff] %vm2228_vm2, %v2173_v12  ;;  %v3308_v37 = vld [vmem:[#allocation2 + $0xd0] sm:$0xff] }
 0x23d   : > { %3424 = vmatpush.msrb.mxu1 %v3308_v37  ;;  %v3291_v62 = vld [vmem:[#allocation2 + $0x48] sm:$0xff]  ;;  %1020 = vst.msk [vmem:[#allocation2 + $0xb8] sm:$0xff] %vm639_vm0, %v980_v7  ;;  %v977_v37 = vld [vmem:[%s4454_s26 + $0xa0] sm:$0xff] }
 0x23e   : > { %1927 = vperm.xlu0 %4053, %v6971_v29   ;;  %3384 = vmatpush.msrb.mxu0 %v3291_v62  ;;  %1003 = vst.msk [vmem:[#allocation2 + $0x30] sm:$0xff] %vm639_vm0, %v963_v60  ;;  %v3290_v11 = vld [vmem:[#allocation2 + $0x40] sm:$0xff]  ;;  %v978_v62 = vld [vmem:[%s4454_s26 + $0xa8] sm:$0xff] }
 0x23f   : > { %v5496_v12 = vpop.permute.xlu0 %3016  ;;  %3425 = vmatpush.msrb.mxu1 %v3307_v63  ;;  %1019 = vst.msk [vmem:[#allocation2 + $0xb0] sm:$0xff] %vm639_vm0, %v979_v34  ;;  %v961_v60 = vld [vmem:[%s4454_s26 + $0x20] sm:$0xff] }
 0x240   : > { %6972 = vst [vmem:[#allocation124_spill] sm:$0xff] %v5496_v12  ;;  %2476 = vperm.xlu1 %4015, %v5487_v3   ;;  %4016 = vset.pattern.permute.xlu2 %v6899_v36  ;;  %v3306_v29 = vld [vmem:[#allocation2 + $0xc0] sm:$0xff] }
 0x241   : > { %2578 = vperm.xlu2 %4016, %v5270_v27   ;;  %3385 = vmatpush.msrb.mxu0 %v3290_v11  ;;  %1002 = vst.msk [vmem:[#allocation2 + $0x28] sm:$0xff] %vm639_vm0, %v962_v10  ;;  %v3289_v34 = vld [vmem:[#allocation2 + $0x38] sm:$0xff]  ;;  %v6973_v10 = vsub.f32 1.0, %v4580_v38 }
 0x242   : > { %v2159_v7 = vpop.permute.xlu1 %2158  ;;  %v2179_v45 = vpop.permute.xlu2 %2178  ;;  %3855 = vmatmul.msk.f32.gmra.mxu2 %vm714_vm3, %v713_v31  ;;  %3426 = vmatpush.msrb.mxu1 %v3306_v29  ;;  %1018 = vst.msk [vmem:[#allocation2 + $0xa8] sm:$0xff] %vm639_vm0, %v978_v62  ;;  %v960_v27 = vld [vmem:[%s4454_s26 + $0x18] sm:$0xff] }
 0x243   : > { %2242 = vst.msk [vmem:[#allocation2 + $0x1e8] sm:$0xff] %vm2228_vm2, %v2159_v7  ;;  %3386 = vmatpush.msrb.mxu0 %v3289_v34  ;;  %v976_v11 = vld [vmem:[%s4454_s26 + $0x98] sm:$0xff]  ;;  %v959_v7 = vld [vmem:[%s4454_s26 + $0x10] sm:$0xff] }
 0x244   : > { %2252 = vst.msk [vmem:[#allocation2 + $0x238] sm:$0xff] %vm2228_vm2, %v2179_v45  ;;  %v3305_v63 = vld [vmem:[#allocation2 + $0xb8] sm:$0xff]  ;;  %v975_v34 = vld [vmem:[%s4454_s26 + $0x90] sm:$0xff] }
 0x245   : > { %1001 = vst.msk [vmem:[#allocation2 + $0x20] sm:$0xff] %vm639_vm0, %v961_v60  ;;  %3427 = vmatpush.msrb.mxu1 %v3305_v63  ;;  %v3288_v31 = vld [vmem:[#allocation2 + $0x30] sm:$0xff]  ;;  %v6974_v60 = vsub.f32 1.0, %v5340_v61  ;;  %v958_v63 = vld [vmem:[%s4454_s26 + $0x8] sm:$0xff] }
 0x246   : > { %1939 = vperm.xlu0 %4053, %v6973_v10   ;;  %1017 = vst.msk [vmem:[#allocation2 + $0xa0] sm:$0xff] %vm639_vm0, %v977_v37  ;;  %3387 = vmatpush.msrb.mxu0 %v3288_v31  ;;  %v3304_v62 = vld [vmem:[#allocation2 + $0xb0] sm:$0xff] }
 0x247   : > { %1000 = vst.msk [vmem:[#allocation2 + $0x18] sm:$0xff] %vm639_vm0, %v960_v27  ;;  %3428 = vmatpush.msrb.mxu1 %v3304_v62  ;;  %v3342_v27 = vld [vmem:[#allocation2 + $0x1e0] sm:$0xff]  ;;  %v974_v62 = vld [vmem:[%s4454_s26 + $0x88] sm:$0xff] }
 0x248   : > { %v5523_v45 = vpop.permute.xlu0 %1354  ;;  %2502 = vperm.xlu1 %4015, %v5340_v61   ;;  %v3287_v38 = vld [vmem:[#allocation2 + $0x28] sm:$0xff]  ;;  %1016 = vst.msk [vmem:[#allocation2 + $0x98] sm:$0xff] %vm639_vm0, %v976_v11  ;;  %v3341_v11 = vld [vmem:[#allocation2 + $0x1d8] sm:$0xff] }
 0x249   : > { %2626 = vperm.xlu2 %4016, %v6974_v60   ;;  %3388 = vmatpush.msrb.mxu0 %v3287_v38  ;;  %999 = vst.msk [vmem:[#allocation2 + $0x10] sm:$0xff] %vm639_vm0, %v959_v7  ;;  %v3303_v31 = vld [vmem:[#allocation2 + $0xa8] sm:$0xff]  ;;  %v957_v38 = vld [vmem:[%s4454_s26] sm:$0xff] }
 0x24a   : > { %v2165_v29 = vpop.permute.xlu1 %2164  ;;  %v3343_v37 = vld [vmem:[#allocation2 + $0x1e8] sm:$0xff]  ;;  %v2185_v10 = vpop.permute.xlu2 %2184  ;;  %3429 = vmatpush.msrb.mxu1 %v3303_v31  ;;  %1015 = vst.msk [vmem:[#allocation2 + $0x90] sm:$0xff] %vm639_vm0, %v975_v34 }
 0x24b   : > { %2245 = vst.msk [vmem:[#allocation2 + $0x200] sm:$0xff] %vm2228_vm2, %v2165_v29  ;;  %3503 = vmatpush.msrb.mxu3 %v3343_v37  ;;  %v973_v29 = vld [vmem:[%s4454_s26 + $0x80] sm:$0xff] }
 0x24c   : > { %2255 = vst.msk [vmem:[#allocation2 + $0x250] sm:$0xff] %vm2228_vm2, %v2185_v10  ;;  %v3286_v60 = vld [vmem:[#allocation2 + $0x20] sm:$0xff] }
 0x24d   : > { %3504 = vmatpush.msrb.mxu3 %v3342_v27  ;;  %3389 = vmatpush.msrb.mxu0 %v3286_v60  ;;  %v3302_v7 = vld [vmem:[#allocation2 + $0xa0] sm:$0xff]  ;;  %998 = vst.msk [vmem:[#allocation2 + $0x8] sm:$0xff] %vm639_vm0, %v958_v63  ;;  %v3340_v27 = vld [vmem:[#allocation2 + $0x1d0] sm:$0xff] }
 0x24e   : > { %1959 = vperm.xlu0 %4053, %v4607_v17   ;;  %3430 = vmatpush.msrb.mxu1 %v3302_v7  ;;  %v3285_v37 = vld [vmem:[#allocation2 + $0x18] sm:$0xff]  ;;  %1014 = vst.msk [vmem:[#allocation2 + $0x88] sm:$0xff] %vm639_vm0, %v974_v62  ;;  %v3338_v62 = vld [vmem:[#allocation2 + $0x1c0] sm:$0xff] }
 0x24f   : > { %3505 = vmatpush.msrb.mxu3 %v3341_v11  ;;  %3390 = vmatpush.msrb.mxu0 %v3285_v37  ;;  %v3301_v34 = vld [vmem:[#allocation2 + $0x98] sm:$0xff]  ;;  %997 = vst.msk [vmem:[#allocation2] sm:$0xff] %vm639_vm0, %v957_v38  ;;  %v3339_v11 = vld [vmem:[#allocation2 + $0x1c8] sm:$0xff]  ;;  %v3336_v37 = vld [vmem:[#allocation2 + $0x1b0] sm:$0xff] }
 0x250   : > { %v5542_v10 = vpop.permute.xlu0 %1374  ;;  %4017 = vset.pattern.permute.xlu1 %v6899_v36  ;;  %v3284_v17 = vld [vmem:[#allocation2 + $0x10] sm:$0xff]  ;;  %1013 = vst.msk [vmem:[#allocation2 + $0x80] sm:$0xff] %vm639_vm0, %v973_v29  ;;  %3431 = vmatpush.msrb.mxu1 %v3301_v34  ;;  %v3337_v38 = vld [vmem:[#allocation2 + $0x1b8] sm:$0xff]  ;;  %v6975_v34 = vsub.f32 1.0, %v4986_v51 }
 0x251   : > { %2722 = vperm.xlu1 %4017, %v5340_v61   ;;  %3506 = vmatpush.msrb.mxu3 %v3340_v27  ;;  %v3300_v60 = vld [vmem:[#allocation2 + $0x90] sm:$0xff] }
 0x252   : > { %2582 = vperm.xlu2 %4016, %v4962_v53   ;;  %v2171_v63 = vpop.permute.xlu1 %2170  ;;  %v2191_v31 = vpop.permute.xlu2 %2190  ;;  %3391 = vmatpush.msrb.mxu0 %v3284_v17  ;;  %v3335_v17 = vld [vmem:[#allocation2 + $0x1a8] sm:$0xff] }
 0x253   : > { %2248 = vst.msk [vmem:[#allocation2 + $0x218] sm:$0xff] %vm2228_vm2, %v2171_v63  ;;  %3507 = vmatpush.msrb.mxu3 %v3339_v11  ;;  %3432 = vmatpush.msrb.mxu1 %v3300_v60  ;;  %v3334_v11 = vld [vmem:[#allocation2 + $0x1a0] sm:$0xff] }
 0x254   : > { %2258 = vst.msk [vmem:[#allocation2 + $0x268] sm:$0xff] %vm2228_vm2, %v2191_v31  ;;  %v3283_v61 = vld [vmem:[#allocation2 + $0x8] sm:$0xff]  ;;  %v1077_v31 = vld [vmem:[%s6723_s14] sm:$0x3] }
 0x255   : > { %3508 = vmatpush.msrb.mxu3 %v3338_v62  ;;  %3392 = vmatpush.msrb.mxu0 %v3283_v61  ;;  %v3299_v53 = vld [vmem:[#allocation2 + $0x88] sm:$0xff]  ;;  %v3333_v62 = vld [vmem:[#allocation2 + $0x198] sm:$0xff]  ;;  %v5567_v60 = vperm.slane %v1077_v31, 0 }
 0x256   : > { %1971 = vperm.xlu0 %4053, %v4624_v23   ;;  %3433 = vmatpush.msrb.mxu1 %v3299_v53  ;;  %v3282_v7 = vld [vmem:[#allocation2] sm:$0xff]  ;;  %v5572_v53 = vperm.slane %v1077_v31, 1 }
 0x257   : > { %3509 = vmatpush.msrb.mxu3 %v3337_v38  ;;  %3393 = vmatpush.msrb.mxu0 %v3282_v7  ;;  %v3298_v27 = vld [vmem:[#allocation2 + $0x80] sm:$0xff]  ;;  %v3332_v38 = vld [vmem:[#allocation2 + $0x190] sm:$0xff]  ;;  %vm1252_vm5 = vcmp.eq.f32.partialorder %v5567_v60, %v4532_v50  ;;  %vm1124_vm6 = vcmp.eq.f32.partialorder %v5567_v60, %v4506_v41  ;;  %vm1254_vm15 = vcmp.eq.f32.partialorder %v5567_v60, %v4601_v58 }
 0x258   : > { %v5552_v29 = vpop.permute.xlu0 %1402  ;;  %3434 = vmatpush.msrb.mxu1 %v3298_v27  ;;  %vm1125_vm7 = vcmp.eq.f32.partialorder %v5572_v53, %v4506_v41  ;;  %vm1253_vm8 = vcmp.eq.f32.partialorder %v5572_v53, %v4532_v50  ;;  %vm1255_vm1 = vcmp.eq.f32.partialorder %v5572_v53, %v4601_v58  ;;  %v6978_v58 = vld [vmem:[#allocation22_spill] sm:$0xff] }
 0x259   : > { %4018 = vset.pattern.permute.xlu1 %v6870_v4  ;;  %3510 = vmatpush.msrb.mxu3 %v3336_v37  ;;  %v3331_v37 = vld [vmem:[#allocation2 + $0x188] sm:$0xff]  ;;  %v1189_v41 = vsel %vm1125_vm7, %v4504_v40, 0.0 }
 0x25a   : > { %2630 = vperm.xlu2 %4016, %v6975_v34   ;;  %2507 = vperm.xlu1 %4018, %v4986_v51   ;;  %v2177_v23 = vpop.permute.xlu1 %2176  ;;  %v5559_v63 = vpop.permute.xlu2 %2318  ;;  %v3330_v34 = vld [vmem:[#allocation2 + $0x180] sm:$0xff] }
 0x25b   : > { %2251 = vst.msk [vmem:[#allocation2 + $0x230] sm:$0xff] %vm2228_vm2, %v2177_v23  ;;  %3511 = vmatpush.msrb.mxu3 %v3335_v17  ;;  %3583 = vmatpush.msra.mxu1 %v5319_v56 }
 0x25d   : > { %3512 = vmatpush.msrb.mxu3 %v3334_v11  ;;  %3584 = vmatpush.msra.mxu1 %v5319_v56  ;;  %v1309_v11 = vsel %vm1253_vm8, %v4586_v9, 0.0 }
 0x25e   : > { %1983 = vperm.xlu0 %4053, %v4650_v22   ;;  %v1078_v22 = vld [vmem:[%s6724_s15] sm:$0x3] }
 0x25f   : > { %3513 = vmatpush.msrb.mxu3 %v3333_v62  ;;  %3585 = vmatpush.msra.mxu1 %v5319_v56  ;;  %v5593_v23 = vperm.slane %v1078_v22, 0  ;;  %v5595_v17 = vperm.slane %v1078_v22, 1  ;;  %v1325_v22 = vadd.f32 %v1309_v11, %v1189_v41 }
 0x260   : > { %v5569_v61 = vpop.permute.xlu0 %1414 }
 0x261   : > { %3514 = vmatpush.msrb.mxu3 %v3332_v38  ;;  %3586 = vmatpush.msra.mxu1 %v5319_v56  ;;  %vm1377_vm9 = vcmp.eq.f32.partialorder %v5593_v23, %v4733_v54  ;;  %vm1378_vm10 = vcmp.eq.f32.partialorder %v5595_v17, %v4733_v54  ;;  %vm1380_vm3 = vcmp.eq.f32.partialorder %v5595_v17, %v4647_v13 }
 0x262   : > { %2682 = vperm.xlu2 %4016, %v5053_v16   ;;  %4019 = vset.pattern.permute.xlu1 %v6899_v36  ;;  %v2183_v7 = vpop.permute.xlu1 %2182  ;;  %v5582_v27 = vpop.permute.xlu2 %2333  ;;  %v1308_v16 = vsel %vm1252_vm5, %v4586_v9, 0.0  ;;  %v1425_v50 = vsel %vm1377_vm9, %v4811_v57, 0.0  ;;  %vm1126_vm5 = vcmp.eq.f32.partialorder %v5567_v60, %v4502_v39  ;;  %vm1381_vm9 = vcmp.eq.f32.partialorder %v5593_v23, %v5523_v45 }
 0x263   : > { %2254 = vst.msk [vmem:[#allocation2 + $0x248] sm:$0xff] %vm2228_vm2, %v2183_v7  ;;  %2586 = vperm.xlu1 %4019, %v5042_v14   ;;  %3515 = vmatpush.msrb.mxu3 %v3331_v37  ;;  %v1188_v14 = vsel %vm1124_vm6, %v4504_v40, 0.0  ;;  %v1426_v40 = vsel %vm1378_vm10, %v4811_v57, 0.0  ;;  %vm1127_vm6 = vcmp.eq.f32.partialorder %v5572_v53, %v4502_v39  ;;  %vm1382_vm10 = vcmp.eq.f32.partialorder %v5595_v17, %v5523_v45  ;;  %v6982_v45 = vld [vmem:[#allocation23_spill] sm:$0xff] }
 0x264   : > { %3587 = vmatpush.msra.mxu1 %v5319_v56  ;;  %v1324_v31 = vadd.f32 %v1308_v16, %v1188_v14  ;;  %v3919_v14 = vld [vmem:[%s4454_s26 + $0x278] sm:$0xff] }
 0x265   : > { %3516 = vmatpush.msrb.mxu3 %v3330_v34  ;;  %v6976_v34 = vsub.f32 1.0, %v5080_v8 }
 0x266   : > { %2003 = vperm.xlu0 %4053, %v4675_v20   ;;  %3588 = vmatpush.msra.mxu1 %v5319_v56 }
 0x268   : > { %v1443_v62 = vpop.permute.xlu0 %1442  ;;  %3589 = vmatpush.msra.mxu1 %v5319_v56 }
 0x269   : > { %vm1473_vm11 = vcmp.eq.f32.partialorder %v5593_v23, %v1443_v62  ;;  %vm1474_vm12 = vcmp.eq.f32.partialorder %v5595_v17, %v1443_v62 }
 0x26a   : > { %v1521_v20 = vsel %vm1473_vm11, %v4861_v44, 0.0  ;;  %v1522_v9 = vsel %vm1474_vm12, %v4861_v44, 0.0  ;;  %2730 = vperm.xlu2 %4016, %v5080_v8   ;;  %v2189_v38 = vpop.permute.xlu1 %2188  ;;  %v5616_v37 = vpop.permute.xlu2 %2343  ;;  %3590 = vmatpush.msra.mxu1 %v5319_v56  ;;  %v2309_v8 = vld [vmem:[%s6723_s14] sm:$0x3] }
 0x26b   : > { %v1537_v54 = vadd.f32 %v1521_v20, %v1425_v50  ;;  %v1538_v7 = vadd.f32 %v1522_v9, %v1426_v40  ;;  %2257 = vst.msk [vmem:[#allocation2 + $0x260] sm:$0xff] %vm2228_vm2, %v2189_v38  ;;  %2634 = vperm.xlu1 %4019, %v6976_v34   ;;  %v5637_v56 = vperm.slane %v2309_v8, 1  ;;  %v3360_v9 = vld [vmem:[#allocation2 + $0x270] sm:$0xff]  ;;  %v1310_v38 = vsel %vm1254_vm15, %v4575_v30, 0.0  ;;  %v6979_v34 = vld [vmem:[#allocation49_spill] sm:$0xff] }
 0x26c   : > { %vm1475_vm7 = vcmp.eq.f32.partialorder %v5593_v23, %v6979_v34  ;;  %vm1476_vm8 = vcmp.eq.f32.partialorder %v5595_v17, %v6979_v34  ;;  %v3356_v34 = vld [vmem:[#allocation2 + $0x250] sm:$0xff] }
 0x26d   : > { %v1553_v57 = vmul.f32 %v1537_v54, %v1324_v31  ;;  %v1554_v44 = vmul.f32 %v1538_v7, %v1325_v22  ;;  %vm2363_vm14 = vcmp.eq.f32.partialorder %v5637_v56, %v5582_v27  ;;  %v6977_v31 = vsub.f32 1.0, %v5371_v28  ;;  %v3918_v22 = vld [vmem:[%s4454_s26 + $0x270] sm:$0xff] }
 0x26e   : > { %2015 = vperm.xlu0 %4053, %v4708_v21   ;;  %v5635_v21 = vperm.slane %v2309_v8, 0  ;;  %v1190_v54 = vsel %vm1126_vm5, %v6978_v58, 0.0  ;;  %v1311_v7 = vsel %vm1255_vm1, %v4575_v30, 0.0  ;;  %v1191_v8 = vsel %vm1127_vm6, %v6978_v58, 0.0 }
 0x26f   : > { %3394 = vmatmul.f32.vlgmr.msrb.gmra.mxu0 %v1553_v57  ;;  %3435 = vmatmul.f32.vlgmr.msrb.gmra.mxu1 %v1554_v44  ;;  %v6980_v57 = vld [vmem:[#allocation38_spill] sm:$0xff]  ;;  %v1327_v58 = vadd.f32 %v1311_v7, %v1191_v8  ;;  %v1429_v7 = vsel %vm1381_vm9, %v5552_v29, 0.0 }
 0x270   : > { %v5622_v16 = vpop.permute.xlu0 %1454  ;;  %vm2362_vm13 = vcmp.eq.f32.partialorder %v5635_v21, %v5582_v27  ;;  %v3359_v27 = vld [vmem:[#allocation2 + $0x268] sm:$0xff]  ;;  %v1428_v39 = vsel %vm1380_vm3, %v6980_v57, 0.0 }
 0x271   : > { %vm1479_vm5 = vcmp.eq.f32.partialorder %v5593_v23, %v5622_v16  ;;  %vm1480_vm6 = vcmp.eq.f32.partialorder %v5595_v17, %v5622_v16  ;;  %v6995_v16 = vld [vmem:[#allocation46_spill] sm:$0xff] }
 0x272   : > { %2590 = vperm.xlu2 %4016, %v5296_v35   ;;  %v2195_v41 = vpop.permute.xlu1 %2194  ;;  %v5627_v11 = vpop.permute.xlu2 %2382 }
 0x273   : > { %2260 = vst.msk [vmem:[#allocation2 + $0x278] sm:$0xff] %vm2228_vm2, %v2195_v41  ;;  %2823 = vrot.lane.b32.xlu1 %v3919_v14, %s4143_s24  ;;  %vm1379_vm2 = vcmp.eq.f32.partialorder %v5593_v23, %v4647_v13 }
 0x274   : > { %4020 = vset.pattern.permute.xlu1 %v6870_v4  ;;  %v1427_v44 = vsel %vm1379_vm2, %v6980_v57, 0.0  ;;  %v3915_v57 = vld [vmem:[%s4454_s26 + $0x258] sm:$0xff] }
 0x276   : > { %2674 = vperm.xlu0 %4053, %v5428_v59  }
 0x278   : > { %v5639_v35 = vpop.permute.xlu0 %1466 }
 0x27a   : > { %2638 = vperm.xlu2 %4016, %v6977_v31   ;;  %v5647_v62 = vpop.permute.xlu1 %2328  ;;  %v3361_v50 = vld [vmem:[#allocation2 + $0x278] sm:$0xff]  ;;  %v2398_v40 = vpop.permute.xlu2 %2397 }
 0x27b   : > { %2517 = vperm.xlu1 %4020, %v5371_v28   ;;  %3542 = vmatpush.msra.mxu0 %v3361_v50  ;;  %v5652_v59 = vsel %vm2362_vm13, %v2398_v40, 0.0  ;;  %v5654_v20 = vsel %vm2363_vm14, %v2398_v40, 0.0  ;;  %v3357_v40 = vld [vmem:[#allocation2 + $0x258] sm:$0xff]  ;;  %vm1256_vm13 = vcmp.eq.f32.partialorder %v5567_v60, %v6982_v45  ;;  %vm1257_vm14 = vcmp.eq.f32.partialorder %v5572_v53, %v6982_v45 }
 0x27d   : > { %3543 = vmatpush.msra.mxu0 %v3360_v9  ;;  %v1326_v9 = vadd.f32 %v1310_v38, %v1190_v54 }
 0x27e   : > { %2678 = vperm.xlu0 %4053, %v5432_v49   ;;  %v3358_v49 = vld [vmem:[#allocation2 + $0x260] sm:$0xff] }
 0x27f   : > { %3544 = vmatpush.msra.mxu0 %v3359_v27 }
 0x280   : > { %v1495_v13 = vpop.permute.xlu0 %1494 }
 0x281   : > { %v1523_v14 = vsel %vm1475_vm7, %v1495_v13, 0.0  ;;  %v1524_v41 = vsel %vm1476_vm8, %v1495_v13, 0.0  ;;  %3545 = vmatpush.msra.mxu0 %v3358_v49  ;;  %v6983_v13 = vld [vmem:[#allocation44_spill] sm:$0xff]  ;;  %v3355_v49 = vld [vmem:[#allocation2 + $0x248] sm:$0xff] }
 0x282   : > { %v1539_v31 = vadd.f32 %v1523_v14, %v1427_v44  ;;  %v1540_v50 = vadd.f32 %v1524_v41, %v1428_v39  ;;  %2821 = vrot.lane.b32.xlu2 %v3918_v22, %s4143_s24  ;;  %v5679_v30 = vpop.permute.xlu1 %2338  ;;  %v5685_v27 = vpop.permute.xlu2 %2412  ;;  %v6981_v22 = vld [vmem:[#allocation14_spill] sm:$0xff]  ;;  %vm1477_vm15 = vcmp.eq.f32.partialorder %v5593_v23, %v6983_v13  ;;  %vm1478_vm1 = vcmp.eq.f32.partialorder %v5595_v17, %v6983_v13  ;;  %v6985_v14 = vld [vmem:[#allocation57_spill] sm:$0xff] }
 0x283   : > { %4021 = vset.pattern.permute.xlu1 %v6899_v36  ;;  %3546 = vmatpush.msra.mxu0 %v3357_v40  ;;  %vm1128_vm11 = vcmp.eq.f32.partialorder %v5567_v60, %v6981_v22  ;;  %vm1129_vm12 = vcmp.eq.f32.partialorder %v5572_v53, %v6981_v22  ;;  %v6984_v44 = vld [vmem:[#allocation34_spill] sm:$0xff]  ;;  %v1526_v41 = vsel %vm1478_vm1, %v6985_v14, 0.0  ;;  %vm2361_vm1 = vcmp.eq.f32.partialorder %v5637_v56, %v5647_v62 }
 0x284   : > { %2734 = vperm.xlu1 %4021, %v5371_v28   ;;  %4022 = vset.pattern.permute.xlu2 %v6870_v4  ;;  %v1555_v38 = vmul.f32 %v1539_v31, %v1326_v9  ;;  %v1556_v54 = vmul.f32 %v1540_v50, %v1327_v58  ;;  %v1430_v28 = vsel %vm1382_vm10, %v5552_v29, 0.0  ;;  %v1312_v39 = vsel %vm1256_vm13, %v6984_v44, 0.0  ;;  %v6986_v31 = vld [vmem:[#allocation21_spill] sm:$0xff] }
 0x285   : > { %3547 = vmatpush.msra.mxu0 %v3356_v34  ;;  %v1313_v29 = vsel %vm1257_vm14, %v6984_v44, 0.0  ;;  %vm1258_vm2 = vcmp.eq.f32.partialorder %v5567_v60, %v6986_v31  ;;  %v1542_v40 = vadd.f32 %v1526_v41, %v1430_v28  ;;  %v3354_v9 = vld [vmem:[#allocation2 + $0x240] sm:$0xff]  ;;  %v6987_v34 = vld [vmem:[#allocation15_spill] sm:$0xff]  ;;  %vm1259_vm3 = vcmp.eq.f32.partialorder %v5572_v53, %v6986_v31  ;;  %v3353_v28 = vld [vmem:[#allocation2 + $0x238] sm:$0xff] }
 0x286   : > { %2726 = vperm.xlu0 %4053, %v4986_v51   ;;  %3397 = vmatmul.f32.gmra.mxu0 %v1555_v38  ;;  %v1525_v51 = vsel %vm1477_vm15, %v6985_v14, 0.0  ;;  %v3916_v58 = vld [vmem:[%s4454_s26 + $0x260] sm:$0xff]  ;;  %v1192_v38 = vsel %vm1128_vm11, %v6987_v34, 0.0  ;;  %v6992_v31 = vld [vmem:[#allocation50_spill] sm:$0xff]  ;;  %vm2488_vm13 = vcmp.eq.f32.partialorder %v5635_v21, %v5254_v48  ;;  %vm2489_vm14 = vcmp.eq.f32.partialorder %v5637_v56, %v5254_v48  ;;  %v6997_v48 = vld [vmem:[#allocation35_spill] sm:$0xff] }
 0x287   : > { %3438 = vmatmul.f32.gmra.mxu1 %v1556_v54  ;;  %3548 = vmatpush.msra.mxu0 %v3355_v49  ;;  %v1541_v50 = vadd.f32 %v1525_v51, %v1429_v7  ;;  %v1193_v54 = vsel %vm1129_vm12, %v6987_v34, 0.0  ;;  %v1328_v13 = vadd.f32 %v1312_v39, %v1192_v38  ;;  %v6989_v49 = vld [vmem:[#allocation11_spill] sm:$0xff]  ;;  %v6990_v44 = vld [vmem:[#allocation29_spill] sm:$0xff]  ;;  %vm2360_vm15 = vcmp.eq.f32.partialorder %v5635_v21, %v5647_v62  ;;  %v6998_v62 = vld [vmem:[#allocation52_spill] sm:$0xff] }
 0x288   : > { %v5710_v8 = vpop.permute.xlu0 %1506  ;;  %v1329_v22 = vadd.f32 %v1313_v29, %v1193_v54  ;;  %vm1130_vm7 = vcmp.eq.f32.partialorder %v5567_v60, %v6989_v49  ;;  %vm1131_vm8 = vcmp.eq.f32.partialorder %v5572_v53, %v6989_v49  ;;  %v1315_v14 = vsel %vm1259_vm3, %v6990_v44, 0.0  ;;  %v3352_v39 = vld [vmem:[#allocation2 + $0x230] sm:$0xff]  ;;  %v756_v29 = vpop.f32.mrf.mxu2  ;;  %v6991_v34 = vld [vmem:[#allocation25_spill] sm:$0xff] }
 0x289   : > { %3549 = vmatpush.msra.mxu0 %v3354_v9  ;;  %v1557_v51 = vmul.f32 %v1541_v50, %v1328_v13  ;;  %v780_v9 = vld [vmem:[%s6719_s10] sm:$0xff]  ;;  %v1194_v38 = vsel %vm1130_vm7, %v6991_v34, 0.0  ;;  %v1528_v54 = vsel %vm1480_vm6, %v6992_v31, 0.0  ;;  %v3351_v13 = vld [vmem:[#allocation2 + $0x228] sm:$0xff]  ;;  %v6994_v49 = vld [vmem:[#allocation31_spill] sm:$0xff]  ;;  %vm1386_vm3 = vcmp.eq.f32.partialorder %v5595_v17, %v6997_v48 }
 0x28a   : > { %2815 = vrot.lane.b32.xlu2 %v3915_v57, %s4143_s24  ;;  %v5726_v45 = vpop.permute.xlu1 %2353  ;;  %v5732_v7 = vpop.permute.xlu2 %2451  ;;  %v1314_v57 = vsel %vm1258_vm2, %v6990_v44, 0.0  ;;  %v1558_v41 = vmul.f32 %v1542_v40, %v1329_v22  ;;  %v788_v50 = vmul.f32 %v780_v9, %v756_v29  ;;  %v1195_v40 = vsel %vm1131_vm8, %v6991_v34, 0.0  ;;  %v6996_v9 = vld [vmem:[#allocation68_spill] sm:$0xff] }
 0x28b   : > { %6988 = vst [vmem:[#allocation22_spill] sm:$0xff] %v5726_v45  ;;  %3550 = vmatpush.msra.mxu0 %v3353_v28  ;;  %v6993_v28 = vld [vmem:[#allocation39_spill] sm:$0xff]  ;;  %v1330_v22 = vadd.f32 %v1314_v57, %v1194_v38  ;;  %vm1260_vm11 = vcmp.eq.f32.partialorder %v5567_v60, %v6994_v49  ;;  %v1331_v29 = vadd.f32 %v1315_v14, %v1195_v40  ;;  %v2544_v34 = vsel %vm2488_vm13, %v5302_v43, 0.0 }
 0x28c   : > { %2817 = vrot.lane.b32.xlu1 %v3916_v58, %s4143_s24  ;;  %v1527_v58 = vsel %vm1479_vm5, %v6992_v31, 0.0  ;;  %vm1383_vm9 = vcmp.eq.f32.partialorder %v5593_v23, %v6993_v28  ;;  %vm1384_vm10 = vcmp.eq.f32.partialorder %v5595_v17, %v6993_v28  ;;  %828 = vmatmul.f32.vlgmr.msra.gmra.mxu3 %v788_v50  ;;  %vm1261_vm12 = vcmp.eq.f32.partialorder %v5572_v53, %v6994_v49  ;;  %v3349_v50 = vld [vmem:[#allocation2 + $0x218] sm:$0xff]  ;;  %v7020_v45 = vld [vmem:[#allocation27_spill] sm:$0xff] }
 0x28d   : > { %3551 = vmatpush.msra.mxu0 %v3352_v39  ;;  %v1431_v44 = vsel %vm1383_vm9, %v6995_v16, 0.0  ;;  %v2545_v38 = vsel %vm2489_vm14, %v5302_v43, 0.0  ;;  %vm1385_vm2 = vcmp.eq.f32.partialorder %v5593_v23, %v6997_v48  ;;  %vm1481_vm5 = vcmp.eq.f32.partialorder %v5593_v23, %v6998_v62 }
 0x28e   : > { %2686 = vperm.xlu0 %4053, %v5457_v52   ;;  %3400 = vmatmul.f32.gmra.mxu0 %v1557_v51  ;;  %v1432_v52 = vsel %vm1384_vm10, %v6995_v16, 0.0  ;;  %v3350_v51 = vld [vmem:[#allocation2 + $0x220] sm:$0xff]  ;;  %v1543_v57 = vadd.f32 %v1527_v58, %v1431_v44  ;;  %vm1482_vm6 = vcmp.eq.f32.partialorder %v5595_v17, %v6998_v62  ;;  %v3348_v16 = vld [vmem:[#allocation2 + $0x210] sm:$0xff]  ;;  %vm2366_vm9 = vcmp.eq.f32.partialorder %v5635_v21, %v5616_v37 }
 0x28f   : > { %3441 = vmatmul.f32.gmra.mxu1 %v1558_v41  ;;  %3552 = vmatpush.msra.mxu0 %v3351_v13  ;;  %v1544_v41 = vadd.f32 %v1528_v54, %v1432_v52  ;;  %v781_v52 = vld [vmem:[%s6719_s10 + $0x8] sm:$0xff]  ;;  %v3346_v62 = vld [vmem:[#allocation2 + $0x200] sm:$0xff]  ;;  %vm2367_vm10 = vcmp.eq.f32.partialorder %v5637_v56, %v5616_v37 }
 0x290   : > { %v5766_v39 = vpop.permute.xlu0 %1518  ;;  %v1559_v43 = vmul.f32 %v1543_v57, %v1330_v22  ;;  %v6999_v22 = vld [vmem:[#allocation28_spill] sm:$0xff]  ;;  %v7004_v37 = vld [vmem:[#allocation26_spill] sm:$0xff] }
 0x291   : > { %3553 = vmatpush.msra.mxu0 %v3350_v51  ;;  %v1560_v13 = vmul.f32 %v1544_v41, %v1331_v29  ;;  %v1529_v51 = vsel %vm1481_vm5, %v5710_v8, 0.0  ;;  %v1316_v29 = vsel %vm1260_vm11, %v6999_v22, 0.0  ;;  %v1317_v57 = vsel %vm1261_vm12, %v6999_v22, 0.0  ;;  %v7000_v41 = vld [vmem:[#allocation40_spill] sm:$0xff] }
 0x292   : > { %2522 = vperm.xlu2 %4022, %v6996_v9   ;;  %v2393_v14 = vpop.permute.xlu1 %2392  ;;  %v5781_v54 = vpop.permute.xlu2 %2466  ;;  %vm1262_vm13 = vcmp.eq.f32.partialorder %v5567_v60, %v7004_v37 }
 0x293   : > { %v2424_v31 = vsel %vm2360_vm15, %v2393_v14, 0.0  ;;  %v2425_v58 = vsel %vm2361_vm1, %v2393_v14, 0.0  ;;  %3554 = vmatpush.msra.mxu0 %v3349_v50  ;;  %v759_v44 = vpop.f32.mrf.mxu2  ;;  %v1530_v14 = vsel %vm1482_vm6, %v5710_v8, 0.0  ;;  %v1434_v8 = vsel %vm1386_vm3, %v7000_v41, 0.0 }
 0x294   : > { %v5787_v40 = vadd.f32 %v2544_v34, %v2424_v31  ;;  %v5789_v28 = vadd.f32 %v2545_v38, %v2425_v58  ;;  %2690 = vperm.xlu1 %4021, %v5461_v32   ;;  %v789_v34 = vmul.f32 %v781_v52, %v759_v44  ;;  %v3347_v38 = vld [vmem:[#allocation2 + $0x208] sm:$0xff]  ;;  %v3914_v32 = vld [vmem:[%s4454_s26 + $0x250] sm:$0xff]  ;;  %v7001_v58 = vld [vmem:[#allocation12_spill] sm:$0xff]  ;;  %v1546_v50 = vadd.f32 %v1530_v14, %v1434_v8 }
 0x295   : > { %3555 = vmatpush.msra.mxu0 %v3348_v16  ;;  %vm1132_vm7 = vcmp.eq.f32.partialorder %v5567_v60, %v7001_v58  ;;  %vm1133_vm8 = vcmp.eq.f32.partialorder %v5572_v53, %v7001_v58  ;;  %v782_v8 = vld [vmem:[%s6719_s10 + $0x10] sm:$0xff]  ;;  %vm1263_vm1 = vcmp.eq.f32.partialorder %v5572_v53, %v7004_v37 }
 0x296   : > { %2594 = vperm.xlu0 %4053, %v4996_v19   ;;  %3403 = vmatmul.f32.gmra.mxu0 %v1559_v43  ;;  %v1433_v19 = vsel %vm1385_vm2, %v7000_v41, 0.0  ;;  %v7002_v43 = vld [vmem:[#allocation18_spill] sm:$0xff] }
 0x297   : > { %3444 = vmatmul.f32.gmra.mxu1 %v1560_v13  ;;  %3556 = vmatpush.msra.mxu0 %v3347_v38  ;;  %v1545_v49 = vadd.f32 %v1529_v51, %v1433_v19  ;;  %v1196_v13 = vsel %vm1132_vm7, %v7002_v43, 0.0  ;;  %v1197_v16 = vsel %vm1133_vm8, %v7002_v43, 0.0  ;;  %v2310_v51 = vld [vmem:[%s6724_s15] sm:$0x3] }
 0x298   : > { %v5819_v31 = vpop.permute.xlu0 %1875  ;;  %831 = vmatmul.f32.gmra.mxu3 %v789_v34  ;;  %v1332_v14 = vadd.f32 %v1316_v29, %v1196_v13  ;;  %v1333_v34 = vadd.f32 %v1317_v57, %v1197_v16  ;;  %v7003_v38 = vld [vmem:[#allocation17_spill] sm:$0xff]  ;;  %v5858_v43 = vperm.slane %v2310_v51, 1  ;;  %v7006_v13 = vsub.f32 1.0, %v6996_v9 }
 0x299   : > { %3557 = vmatpush.msra.mxu0 %v3346_v62  ;;  %vm1134_vm11 = vcmp.eq.f32.partialorder %v5567_v60, %v7003_v38  ;;  %vm1135_vm12 = vcmp.eq.f32.partialorder %v5572_v53, %v7003_v38  ;;  %v5856_v62 = vperm.slane %v2310_v51, 0 }
 0x29a   : > { %2813 = vrot.lane.b32.xlu2 %v3914_v32, %s4143_s24  ;;  %v2408_v48 = vpop.permute.xlu1 %2407  ;;  %v7005_v32 = vld [vmem:[#allocation42_spill] sm:$0xff]  ;;  %v1561_v57 = vmul.f32 %v1545_v49, %v1332_v14  ;;  %v1562_v41 = vmul.f32 %v1546_v50, %v1333_v34  ;;  %v7007_v49 = vld [vmem:[#allocation47_spill] sm:$0xff] }
 0x29b   : > { %v5832_v44 = vsel %vm2366_vm9, %v2408_v48, 0.0  ;;  %v5834_v52 = vsel %vm2367_vm10, %v2408_v48, 0.0  ;;  %4023 = vset.pattern.permute.xlu2 %v6899_v36  ;;  %vm1387_vm14 = vcmp.eq.f32.partialorder %v5593_v23, %v7005_v32  ;;  %v2579_v22 = vpop.permute.xlu2 %2578  ;;  %vm1388_vm15 = vcmp.eq.f32.partialorder %v5595_v17, %v7005_v32  ;;  %v762_v19 = vpop.f32.mrf.mxu2  ;;  %v7009_v48 = vld [vmem:[#allocation59_spill] sm:$0xff]  ;;  %v7010_v32 = vld [vmem:[#allocation13_spill] sm:$0xff] }
 0x29c   : > { %v1435_v29 = vsel %vm1387_vm14, %v5569_v61, 0.0  ;;  %2738 = vperm.xlu1 %4021, %v6996_v9   ;;  %v1436_v58 = vsel %vm1388_vm15, %v5569_v61, 0.0  ;;  %v790_v16 = vmul.f32 %v782_v8, %v762_v19  ;;  %vm1483_vm2 = vcmp.eq.f32.partialorder %v5593_v23, %v7007_v49  ;;  %v7008_v61 = vld [vmem:[#allocation36_spill] sm:$0xff] }
 0x29d   : > { %vm1484_vm3 = vcmp.eq.f32.partialorder %v5595_v17, %v7007_v49  ;;  %v1318_v50 = vsel %vm1262_vm13, %v7008_v61, 0.0  ;;  %v1319_v9 = vsel %vm1263_vm1, %v7008_v61, 0.0  ;;  %v1531_v51 = vsel %vm1483_vm2, %v7009_v48, 0.0  ;;  %v7012_v19 = vld [vmem:[#allocation16_spill] sm:$0xff] }
 0x29e   : > { %2642 = vperm.xlu0 %4053, %v7006_v13   ;;  %3406 = vmatmul.f32.gmra.mxu0 %v1561_v57  ;;  %v1532_v14 = vsel %vm1484_vm3, %v7009_v48, 0.0  ;;  %vm1136_vm5 = vcmp.eq.f32.partialorder %v5567_v60, %v7010_v32  ;;  %vm1137_vm6 = vcmp.eq.f32.partialorder %v5572_v53, %v7010_v32  ;;  %v7011_v57 = vld [vmem:[#allocation24_spill] sm:$0xff]  ;;  %v1547_v37 = vadd.f32 %v1531_v51, %v1435_v29 }
 0x29f   : > { %3447 = vmatmul.f32.gmra.mxu1 %v1562_v41  ;;  %vm1264_vm7 = vcmp.eq.f32.partialorder %v5567_v60, %v7011_v57  ;;  %vm1265_vm8 = vcmp.eq.f32.partialorder %v5572_v53, %v7011_v57  ;;  %v1548_v41 = vadd.f32 %v1532_v14, %v1436_v58  ;;  %v1198_v8 = vsel %vm1134_vm11, %v7012_v19, 0.0  ;;  %v3912_v58 = vld [vmem:[%s4454_s26 + $0x240] sm:$0xff]  ;;  %v7013_v61 = vld [vmem:[#allocation32_spill] sm:$0xff]  ;;  %s3939_s26 = sshll.u32 %s4260_s0, 3  ;;  %s3727_s0 = scalar_lea.sflag [#allocation4], %s607_s27 }
 0x2a0   : > { %v5875_v34 = vpop.permute.xlu0 %1895  ;;  %834 = vmatmul.f32.gmra.mxu3 %v790_v16  ;;  %v1199_v13 = vsel %vm1135_vm12, %v7012_v19, 0.0  ;;  %v5896_v16 = vld [vmem:[%s6725_s16] ss:$0 sm:$0xff]  ;;  %vm2609_vm9 = vcmp.eq.f32.partialorder %v5856_v62, %v2579_v22  ;;  %vm2610_vm10 = vcmp.eq.f32.partialorder %v5858_v43, %v2579_v22  ;;  %vm1485_vm11 = vcmp.eq.f32.partialorder %v5593_v23, %v5639_v35  ;;  %s3737_s22 = scalar_lea.hbm %s6727_s18, %s3939_s26 }
 0x2a1   : > { %vm1486_vm12 = vcmp.eq.f32.partialorder %v5595_v17, %v5639_v35  ;;  %v1334_v38 = vadd.f32 %v1318_v50, %v1198_v8  ;;  %v1335_v49 = vadd.f32 %v1319_v9, %v1199_v13  ;;  %v1320_v48 = vsel %vm1264_vm7, %v7013_v61, 0.0  ;;  %v7014_v22 = vld [vmem:[#allocation37_spill] sm:$0xff]  ;;  %v783_v13 = vld [vmem:[%s6719_s10 + $0x18] sm:$0xff]  ;;  %s3741_s3 = sshll.u32 %s3737_s22, 4  ;;  %s3742_s3 = int_to_ptr.hbm [resolvable:$true] %s3741_s3 }
 0x2a2   : > { %2598 = vperm.xlu2 %4023, %v5059_v33   ;;  %v5901_v29 = vpop.permute.xlu1 %2446  ;;  %v1321_v33 = vsel %vm1265_vm8, %v7013_v61, 0.0  ;;  %vm1389_vm13 = vcmp.eq.f32.partialorder %v5593_v23, %v7014_v22  ;;  %vm1807_vm14 = vcmp.eq.f32.partialorder %v5896_v16, %v5050_v1  ;;  %v5923_v50 = vld [vmem:[%s6726_s17] ss:$0 sm:$0xff]  ;;  %vm1390_vm1 = vcmp.eq.f32.partialorder %v5595_v17, %v7014_v22  ;;  %s4088_s4 = sshra.s32 %s3742_s3, 4  ;;  %s4089_s4 = int_to_ptr.hbm [resolvable:$true] %s4088_s4 }
 0x2a3   : > { %v2627_v9 = vpop.permute.xlu2 %2626  ;;  %v1563_v57 = vmul.f32 %v1547_v37, %v1334_v38  ;;  %v1564_v19 = vmul.f32 %v1548_v41, %v1335_v49  ;;  %v765_v8 = vpop.f32.mrf.mxu2  ;;  %v7015_v61 = vld [vmem:[#allocation53_spill] sm:$0xff]  ;;  %vm1906_vm15 = vcmp.eq.f32.partialorder %v5923_v50, %v5819_v31  ;;  %v1855_v35 = vsel %vm1807_vm14, %v5127_v2, 0.0  ;;  %v7018_v49 = vld [vmem:[#allocation48_spill] sm:$0xff]  ;;  %v7021_v31 = vld [vmem:[#allocation19_spill] sm:$0xff]  ;;  %s4090_s20 = scalar_lea.hbm %s4089_s4, 8  ;;  %p4095_p0 = scmp.lt.s32.totalorder %s4089_s4, %s6727_s18 }
 0x2a4   : > { %v5925_v51 = vsel %vm2609_vm9, %v2627_v9, 0.0  ;;  %v5927_v14 = vsel %vm2610_vm10, %v2627_v9, 0.0  ;;  %2809 = vrot.lane.b32.xlu1 %v3912_v58, %s4143_s24  ;;  %v1533_v12 = vsel %vm1485_vm11, %v7015_v61, 0.0  ;;  %v1534_v9 = vsel %vm1486_vm12, %v7015_v61, 0.0  ;;  %v7016_v37 = vld [vmem:[#allocation81_spill] sm:$0xff]  ;;  %v7019_v61 = vld [vmem:[#allocation51_spill] sm:$0xff]  ;;  %p4091_p11 = scmp.ne.s32.totalorder %s4089_s4, %s4090_s20  ;;  %p4096_p1 = scmp.lt.s32.totalorder %s4094_s23, %s4090_s20 }
 0x2a5   : > { %4024 = vset.pattern.permute.xlu1 %v6870_v4  ;;  %v791_v41 = vmul.f32 %v783_v13, %v765_v8  ;;  %v7017_v58 = vld [vmem:[#allocation41_spill] sm:$0xff]  ;;  %v5954_v38 = vadd.f32 1.0, %v5105_v24  ;;  %v1437_v8 = vsel %vm1389_vm13, %v7018_v49, 0.0  ;;  %v1438_v13 = vsel %vm1390_vm1, %v7018_v49, 0.0 }
 0x2a6   : > { %2694 = vperm.xlu0 %4053, %v7016_v37   ;;  %vm1695_vm2 = vcmp.eq.f32.partialorder %v5896_v16, %v7017_v58  ;;  %3409 = vmatmul.f32.gmra.mxu0 %v1563_v57  ;;  %vm1986_vm3 = vcmp.eq.f32.partialorder %v5923_v50, %v5213_v47  ;;  %v1549_v57 = vadd.f32 %v1533_v12, %v1437_v8  ;;  %v1200_v22 = vsel %vm1136_vm5, %v7020_v45, 0.0  ;;  %v7022_v12 = vld [vmem:[#allocation33_spill] sm:$0xff]  ;;  %p4092_p12 = pnand %p4091_p11, %p4277_p5  ;;  %p4097_p2 = por %p4096_p1, %p4095_p0 }
 0x2a7   : > { %3450 = vmatmul.f32.gmra.mxu1 %v1564_v19  ;;  %v1751_v37 = vsel %vm1695_vm2, %v7019_v61, 0.0  ;;  %v2026_v1 = vsel %vm1986_vm3, %v5315_v26, 0.0  ;;  %v1550_v19 = vadd.f32 %v1534_v9, %v1438_v13  ;;  %v1201_v47 = vsel %vm1137_vm6, %v7020_v45, 0.0  ;;  %v7023_v45 = vld [vmem:[#allocation55_spill] sm:$0xff]  ;;  %v784_v61 = vld [vmem:[%s6719_s10 + $0x20] sm:$0xff] }
 0x2a8   : > { %v1916_v58 = vpop.permute.xlu0 %1915  ;;  %837 = vmatmul.f32.gmra.mxu3 %v791_v41  ;;  %v1863_v49 = vadd.f32 %v1855_v35, %v1751_v37  ;;  %vm1138_vm7 = vcmp.eq.f32.partialorder %v5567_v60, %v7021_v31  ;;  %vm1266_vm8 = vcmp.eq.f32.partialorder %v5567_v60, %v7022_v12  ;;  %v1336_v9 = vadd.f32 %v1320_v48, %v1200_v22  ;;  %p4093_p13 = pneg %p4092_p12 }
 0x2a9   : > { %v1946_v2 = vsel %vm1906_vm15, %v1916_v58, 0.0  ;;  %v1337_v8 = vadd.f32 %v1321_v33, %v1201_v47  ;;  %vm1267_vm5 = vcmp.eq.f32.partialorder %v5572_v53, %v7022_v12  ;;  %vm1487_vm6 = vcmp.eq.f32.partialorder %v5593_v23, %v7023_v45 }
 0x2aa   : > { %v2034_v41 = vadd.f32 %v2026_v1, %v1946_v2  ;;  %4025 = vset.pattern.permute.xlu2 %v6870_v4  ;;  %v5977_v26 = vpop.permute.xlu1 %2461  ;;  %vm1488_vm9 = vcmp.eq.f32.partialorder %v5595_v17, %v7023_v45  ;;  %vm1391_vm10 = vcmp.eq.f32.partialorder %v5593_v23, %v5542_v10  ;;  %vm1392_vm11 = vcmp.eq.f32.partialorder %v5595_v17, %v5542_v10  ;;  %v7024_v1 = vld [vmem:[#allocation75_spill] sm:$0xff]  ;;  %p4098_p3 = pnand %p4097_p2, %p4093_p13 }
 0x2ab   : > { %3001 = vperm.xlu2 %4025, %v5954_v38   ;;  %v1565_v48 = vmul.f32 %v1549_v57, %v1336_v9  ;;  %v1566_v33 = vmul.f32 %v1550_v19, %v1337_v8  ;;  %v768_v13 = vpop.f32.mrf.mxu2  ;;  %v1535_v37 = vsel %vm1487_vm6, %v5766_v39, 0.0  ;;  %v1536_v58 = vsel %vm1488_vm9, %v5766_v39, 0.0  ;;  %v7025_v57 = vld [vmem:[#allocation30_spill] sm:$0xff]  ;;  %v7027_v9 = vld [vmem:[#allocation20_spill] sm:$0xff] }
 0x2ac   : > { %v2042_v32 = vmul.f32 %v2034_v41, %v1863_v49  ;;  %v2583_v35 = vpop.permute.xlu2 %2582  ;;  %2889 = vperm.xlu1 %4024, %v5105_v24   ;;  %v2847_v2 = vmul.f32 8.0, %v7024_v1  ;;  %v792_v22 = vmul.f32 %v784_v61, %v768_v13  ;;  %vm1139_vm12 = vcmp.eq.f32.partialorder %v5572_v53, %v7021_v31 }
 0x2ad   : > { %v1322_v19 = vsel %vm1266_vm8, %v7025_v57, 0.0  ;;  %v1323_v39 = vsel %vm1267_vm5, %v7025_v57, 0.0  ;;  %v1202_v8 = vsel %vm1138_vm7, %v7027_v9, 0.0  ;;  %v1203_v45 = vsel %vm1139_vm12, %v7027_v9, 0.0 }
 0x2ae   : > { %3107 = vperm.xlu0 %4053, %v5105_v24   ;;  %3476 = vmatmul.f32.vlgmr.msrb.gmra.mxu2 %v2042_v32  ;;  %v7026_v24 = vld [vmem:[#allocation43_spill] sm:$0xff]  ;;  %vm2611_vm13 = vcmp.eq.f32.partialorder %v5856_v62, %v2583_v35  ;;  %vm2612_vm14 = vcmp.eq.f32.partialorder %v5858_v43, %v2583_v35  ;;  %v3933_v10 = vadd.f32 -1.0, %v2847_v2  ;;  %v1338_v17 = vadd.f32 %v1322_v19, %v1202_v8  ;;  %v785_v35 = vld [vmem:[%s6719_s10 + $0x28] sm:$0xff] }
 0x2af   : > { %3412 = vmatmul.f32.gmra.mxu0 %v1565_v48  ;;  %3453 = vmatmul.f32.gmra.mxu1 %v1566_v33  ;;  %v1439_v47 = vsel %vm1391_vm10, %v7026_v24, 0.0  ;;  %v1440_v49 = vsel %vm1392_vm11, %v7026_v24, 0.0  ;;  %v1339_v32 = vadd.f32 %v1323_v39, %v1203_v45  ;;  %v2935_v2 = vsub.f32 1.0, %v5116_v55 }
 0x2b0   : > { %v6020_v41 = vpop.permute.xlu0 %1927  ;;  %840 = vmatmul.f32.gmra.mxu3 %v792_v22  ;;  %v1551_v53 = vadd.f32 %v1535_v37, %v1439_v47  ;;  %v1552_v12 = vadd.f32 %v1536_v58, %v1440_v49  ;;  %v7028_v37 = vsub.f32 1.0, %v5390_v5  ;;  %v2863_v58 = vmul.f32 0.5, %v3933_v10 }
 0x2b1   : > { %vm2356_vm15 = vcmp.eq.f32.partialorder %v5635_v21, %v5559_v63  ;;  %vm2357_vm1 = vcmp.eq.f32.partialorder %v5637_v56, %v5559_v63  ;;  %vm2484_vm2 = vcmp.eq.f32.partialorder %v5635_v21, %v5901_v29  ;;  %vm2485_vm3 = vcmp.eq.f32.partialorder %v5637_v56, %v5901_v29  ;;  %v786_v29 = vld [vmem:[%s6719_s10 + $0x30] sm:$0xff] }
 0x2b2   : > { %v6029_v23 = vpop.permute.xlu1 %2476  ;;  %v1567_v31 = vmul.f32 %v1551_v53, %v1338_v17  ;;  %v1568_v13 = vmul.f32 %v1552_v12, %v1339_v32  ;;  %v2871_v57 = vfloor.f32 %v2863_v58  ;;  %v2420_v19 = vsel %vm2356_vm15, %v5627_v11, 0.0  ;;  %v7029_v12 = vld [vmem:[#allocation58_spill] sm:$0xff]  ;;  %v7031_v17 = vld [vmem:[#allocation71_spill] sm:$0xff] }
 0x2b3   : > { %2527 = vperm.xlu2 %4025, %v5390_v5   ;;  %v771_v61 = vpop.f32.mrf.mxu2  ;;  %v2421_v39 = vsel %vm2357_vm1, %v5627_v11, 0.0  ;;  %vm1808_vm7 = vcmp.eq.f32.partialorder %v5896_v16, %v7029_v12  ;;  %v7030_v11 = vld [vmem:[#allocation85_spill] sm:$0xff]  ;;  %vm1696_vm8 = vcmp.eq.f32.partialorder %v5896_v16, %v7031_v17  ;;  %vm1907_vm5 = vcmp.eq.f32.partialorder %v5923_v50, %v5188_v0  ;;  %v7032_v32 = vld [vmem:[#allocation79_spill] sm:$0xff]  ;;  %v7038_v17 = vld [vmem:[#allocation66_spill] sm:$0xff] }
 0x2b4   : > { %v2631_v48 = vpop.permute.xlu2 %2630  ;;  %4026 = vset.pattern.permute.xlu1 %v6899_v36  ;;  %v793_v1 = vmul.f32 %v785_v35, %v771_v61  ;;  %v1856_v45 = vsel %vm1808_vm7, %v7030_v11, 0.0  ;;  %v7035_v11 = vld [vmem:[#allocation61_spill] sm:$0xff] }
 0x2b5   : > { %v6032_v33 = vsel %vm2611_vm13, %v2631_v48, 0.0  ;;  %v6034_v60 = vsel %vm2612_vm14, %v2631_v48, 0.0  ;;  %3187 = vperm.xlu1 %4026, %v5954_v38   ;;  %v1752_v48 = vsel %vm1696_vm8, %v7032_v32, 0.0  ;;  %vm1697_vm10 = vcmp.eq.f32.partialorder %v5896_v16, %v7035_v11  ;;  %v7039_v32 = vld [vmem:[#allocation113_spill] sm:$0xff]  ;;  %v7043_v11 = vld [vmem:[#allocation102_spill] sm:$0xff] }
 0x2b6   : > { %2646 = vperm.xlu0 %4053, %v7028_v37   ;;  %v1864_v61 = vadd.f32 %v1856_v45, %v1752_v48  ;;  %v7036_v45 = vld [vmem:[#allocation90_spill] sm:$0xff]  ;;  %vm1988_vm12 = vcmp.eq.f32.partialorder %v5923_v50, %v7039_v32  ;;  %vm1909_vm13 = vcmp.eq.f32.partialorder %v5923_v50, %v7043_v11 }
 0x2b7   : > { %3415 = vmatmul.f32.gmra.mxu0 %v1567_v31  ;;  %3456 = vmatmul.f32.gmra.mxu1 %v1568_v13  ;;  %v6077_v13 = vsub.f32 %v2863_v58, %v2871_v57  ;;  %vm1908_vm11 = vcmp.eq.f32.partialorder %v5923_v50, %v7036_v45  ;;  %v7044_v45 = vld [vmem:[#allocation76_spill] sm:$0xff] }
 0x2b8   : > { %v6048_v22 = vpop.permute.xlu0 %1939  ;;  %843 = vmatmul.f32.gmra.mxu3 %v793_v1  ;;  %vm1698_vm14 = vcmp.eq.f32.partialorder %v5896_v16, %v7044_v45 }
 0x2ba   : > { %v2503_v38 = vpop.permute.xlu1 %2502 }
 0x2bb   : > { %v2540_v24 = vsel %vm2484_vm2, %v2503_v38, 0.0  ;;  %v2541_v47 = vsel %vm2485_vm3, %v2503_v38, 0.0  ;;  %2945 = vperm.xlu2 %4025, %v2935_v2   ;;  %v787_v38 = vld [vmem:[%s6719_s10 + $0x38] sm:$0xff] }
 0x2bc   : > { %v6056_v49 = vadd.f32 %v2540_v24, %v2420_v19  ;;  %v6058_v63 = vadd.f32 %v2541_v47, %v2421_v39  ;;  %v6060_v9 = vpop.permute.xlu2 %2682  ;;  %v774_v8 = vpop.f32.mrf.mxu2  ;;  %v2996_v19 = vadd.f32 1.0, %v2871_v57  ;;  %v2940_v47 = vsub.f32 1.0, %v6077_v13 }
 0x2bd   : > { %2742 = vperm.xlu1 %4026, %v5390_v5   ;;  %v794_v53 = vmul.f32 %v786_v29, %v774_v8  ;;  %v1947_v5 = vsel %vm1907_vm5, %v5222_v42, 0.0  ;;  %v6102_v8 = vsub.f32 %v5122_v6, %v5130_v46  ;;  %v7034_v29 = vld [vmem:[#allocation86_spill] sm:$0xff]  ;;  %vm2709_vm15 = vcmp.eq.f32.partialorder %v5856_v62, %v6060_v9 }
 0x2be   : > { %3127 = vperm.xlu0 %4053, %v2871_v57   ;;  %vm1809_vm9 = vcmp.eq.f32.partialorder %v5896_v16, %v7034_v29  ;;  %vm2710_vm1 = vcmp.eq.f32.partialorder %v5858_v43, %v6060_v9  ;;  %v7047_v9 = vld [vmem:[#allocation107_spill] sm:$0xff] }
 0x2bf   : > { %v1857_v6 = vsel %vm1809_vm9, %v7038_v17, 0.0  ;;  %vm1989_vm8 = vcmp.eq.f32.partialorder %v5923_v50, %v7047_v9 }
 0x2c0   : > { %v1960_v10 = vpop.permute.xlu0 %1959  ;;  %846 = vmatmul.f32.gmra.mxu3 %v794_v53 }
 0x2c1   : > { %vm1987_vm6 = vcmp.eq.f32.partialorder %v5923_v50, %v1960_v10 }
 0x2c2   : > { %v2027_v31 = vsel %vm1987_vm6, %v5249_v25, 0.0 }
 0x2c3   : > { %v2035_v35 = vadd.f32 %v2027_v31, %v1947_v5  ;;  %4027 = vset.pattern.permute.xlu2 %v6899_v36  ;;  %v6080_v37 = vpop.permute.xlu1 %2722  ;;  %v7040_v5 = vld [vmem:[#allocation72_spill] sm:$0xff] }
 0x2c4   : > { %3227 = vperm.xlu2 %4027, %v5116_v55   ;;  %v2731_v1 = vpop.permute.xlu2 %2730  ;;  %v1753_v31 = vsel %vm1697_vm10, %v7040_v5, 0.0  ;;  %v7045_v5 = vld [vmem:[#allocation91_spill] sm:$0xff]  ;;  %vm2364_vm10 = vcmp.eq.f32.partialorder %v5635_v21, %v5679_v30 }
 0x2c5   : > { %v2043_v0 = vmul.f32 %v2035_v35, %v1864_v61  ;;  %3147 = vperm.xlu1 %4026, %v2935_v2   ;;  %v777_v42 = vpop.f32.mrf.mxu2  ;;  %v7033_v2 = vsub.f32 1.0, %v5397_v15  ;;  %v7041_v61 = vld [vmem:[#allocation100_spill] sm:$0xff]  ;;  %v2758_v32 = vsel %vm2710_vm1, %v2731_v1, 0.0 }
 0x2c6   : > { %3247 = vperm.xlu0 %4053, %v6077_v13   ;;  %v795_v25 = vmul.f32 %v787_v38, %v777_v42  ;;  %v1948_v35 = vsel %vm1908_vm11, %v7041_v61, 0.0  ;;  %v1865_v42 = vadd.f32 %v1857_v6, %v1753_v31  ;;  %v2757_v6 = vsel %vm2709_vm15, %v2731_v1, 0.0  ;;  %v7046_v61 = vld [vmem:[#allocation80_spill] sm:$0xff] }
 0x2c7   : > { %3479 = vmatmul.f32.gmra.mxu2 %v2043_v0  ;;  %vm1810_vm7 = vcmp.eq.f32.partialorder %v5896_v16, %v7046_v61  ;;  %v7055_v61 = vld [vmem:[#allocation82_spill] sm:$0xff]  ;;  %vm2492_vm15 = vcmp.eq.f32.partialorder %v5635_v21, %v5781_v54 }
 0x2c8   : > { %v6087_v58 = vpop.permute.xlu0 %1971  ;;  %849 = vmatmul.f32.gmra.mxu3 %v795_v25 }
 0x2c9   : > { %vm1990_vm5 = vcmp.eq.f32.partialorder %v5923_v50, %v6087_v58  ;;  %v7056_v58 = vld [vmem:[#allocation114_spill] sm:$0xff] }
 0x2cc   : > { %4029 = vset.pattern.permute.xlu2 %v6870_v4  ;;  %v6090_v39 = vpop.permute.xlu2 %2590  ;;  %v6092_v55 = vpop.permute.xlu1 %2507 }
 0x2cd   : > { %3026 = vperm.xlu2 %4029, %v2996_v19   ;;  %4028 = vset.pattern.permute.xlu1 %v6870_v4 }
 0x2ce   : > { %2650 = vperm.xlu0 %4053, %v7033_v2   ;;  %2914 = vperm.xlu1 %4028, %v2871_v57   ;;  %v7037_v57 = vld [vmem:[#allocation69_spill] sm:$0xff] }
 0x2cf   : > { %v2844_v10 = vmul.f32 8.0, %v7037_v57  ;;  %v7042_v2 = vld [vmem:[#allocation65_spill] sm:$0xff] }
 0x2d0   : > { %v6097_v24 = vpop.permute.xlu0 %1983  ;;  %v2849_v29 = vmul.f32 8.0, %v7042_v2 }
 0x2d1   : > { %v3930_v25 = vadd.f32 -1.0, %v2844_v10 }
 0x2d3   : > { %v2860_v31 = vmul.f32 0.5, %v3930_v25 }
 0x2d4   : > { %v6106_v53 = vpop.permute.xlu2 %2638 }
 0x2d5   : > { %2970 = vperm.xlu2 %4029, %v2940_v47   ;;  %v2587_v12 = vpop.permute.xlu1 %2586 }
 0x2d6   : > { %3231 = vperm.xlu0 %4053, %v6102_v8   ;;  %4030 = vset.pattern.permute.xlu1 %v6899_v36  ;;  %vm2613_vm2 = vcmp.eq.f32.partialorder %v5856_v62, %v2587_v12  ;;  %vm2614_vm3 = vcmp.eq.f32.partialorder %v5858_v43, %v2587_v12 }
 0x2d7   : > { %3207 = vperm.xlu1 %4030, %v2996_v19   ;;  %v1949_v19 = vsel %vm1909_vm13, %v6020_v41, 0.0 }
 0x2d8   : > { %v2004_v48 = vpop.permute.xlu0 %2003 }
 0x2d9   : > { %v2028_v0 = vsel %vm1988_vm12, %v2004_v48, 0.0  ;;  %vm2365_vm12 = vcmp.eq.f32.partialorder %v5637_v56, %v5679_v30 }
 0x2da   : > { %v2036_v38 = vadd.f32 %v2028_v0, %v1948_v35  ;;  %v7048_v0 = vld [vmem:[#allocation92_spill] sm:$0xff] }
 0x2dc   : > { %v2822_v57 = vpop.permute.xlu2 %2821  ;;  %v2044_v17 = vmul.f32 %v2036_v38, %v1865_v42  ;;  %v1858_v38 = vsel %vm1810_vm7, %v7048_v0, 0.0  ;;  %v7049_v42 = vld [vmem:[#allocation118_spill] sm:$0xff]  ;;  %vm1911_vm7 = vcmp.eq.f32.partialorder %v5923_v50, %v5875_v34 }
 0x2dd   : > { %2840 = vst.msk [vmem:[#allocation2 + $0x2b0] sm:$0xff] %vm2833_vm4, %v2822_v57  ;;  %4032 = vset.pattern.permute.xlu2 %v6899_v36  ;;  %v2635_v10 = vpop.permute.xlu1 %2634  ;;  %v2029_v2 = vsel %vm1989_vm8, %v7049_v42, 0.0  ;;  %v7050_v57 = vld [vmem:[#allocation54_spill] sm:$0xff]  ;;  %vm2490_vm8 = vcmp.eq.f32.partialorder %v5635_v21, %v5977_v26 }
 0x2de   : > { %v2661_v41 = vsel %vm2613_vm2, %v2635_v10, 0.0  ;;  %v2662_v48 = vsel %vm2614_vm3, %v2635_v10, 0.0  ;;  %3167 = vperm.xlu2 %4032, %v2940_v47   ;;  %3131 = vperm.xlu0 %4053, %v7045_v5   ;;  %v2037_v47 = vadd.f32 %v2029_v2, %v1949_v19  ;;  %v6158_v19 = vfloor.f32 %v2860_v31  ;;  %v7057_v42 = vld [vmem:[#allocation94_spill] sm:$0xff] }
 0x2df   : > { %v2773_v35 = vadd.f32 %v2757_v6, %v2661_v41  ;;  %v2774_v12 = vadd.f32 %v2758_v32, %v2662_v48  ;;  %3482 = vmatmul.f32.gmra.mxu2 %v2044_v17  ;;  %4031 = vset.pattern.permute.xlu1 %v6870_v4  ;;  %v1754_v17 = vsel %vm1698_vm14, %v7050_v57, 0.0  ;;  %v7051_v6 = vld [vmem:[#allocation73_spill] sm:$0xff]  ;;  %v7054_v41 = vld [vmem:[#allocation87_spill] sm:$0xff]  ;;  %vm1910_vm11 = vcmp.eq.f32.partialorder %v5923_v50, %v7057_v42 }
 0x2e0   : > { %v2016_v1 = vpop.permute.xlu0 %2015  ;;  %3074 = vperm.xlu1 %4031, %v6077_v13   ;;  %v6156_v10 = vadd.f32 1.0, %v7051_v6  ;;  %v7052_v13 = vld [vmem:[#allocation60_spill] sm:$0xff]  ;;  %v1866_v32 = vadd.f32 %v1858_v38, %v1754_v17  ;;  %v7058_v57 = vld [vmem:[#allocation109_spill] sm:$0xff]  ;;  %vm2493_vm3 = vcmp.eq.f32.partialorder %v5637_v56, %v5781_v54 }
 0x2e1   : > { %v6144_v25 = vmul.f32 %v2773_v35, %v5787_v40  ;;  %v6147_v11 = vmul.f32 %v2774_v12, %v5789_v28  ;;  %vm1811_vm6 = vcmp.eq.f32.partialorder %v5896_v16, %v7052_v13  ;;  %v3935_v40 = vadd.f32 -1.0, %v2849_v29  ;;  %v7053_v28 = vld [vmem:[#allocation64_spill] sm:$0xff] }
 0x2e2   : > { %vm1699_vm9 = vcmp.eq.f32.partialorder %v5896_v16, %v7053_v28  ;;  %v1859_v48 = vsel %vm1811_vm6, %v7054_v41, 0.0  ;;  %v2030_v35 = vsel %vm1990_vm5, %v7056_v58, 0.0  ;;  %v2045_v0 = vmul.f32 %v2037_v47, %v1866_v32  ;;  %v7059_v17 = vld [vmem:[#allocation88_spill] sm:$0xff] }
 0x2e3   : > { %v1755_v9 = vsel %vm1699_vm9, %v7055_v61, 0.0  ;;  %v6178_v29 = vsub.f32 %v2860_v31, %v6158_v19  ;;  %v6180_v38 = vmul.f32 0.5, %v3935_v40  ;;  %v1950_v47 = vsel %vm1910_vm11, %v7058_v57, 0.0  ;;  %v7060_v13 = vld [vmem:[#allocation108_spill] sm:$0xff] }
 0x2e4   : > { %v2816_v45 = vpop.permute.xlu2 %2815  ;;  %v1867_v2 = vadd.f32 %v1859_v48, %v1755_v9  ;;  %vm1812_vm13 = vcmp.eq.f32.partialorder %v5896_v16, %v7059_v17  ;;  %v2428_v32 = vsel %vm2364_vm10, %v7060_v13, 0.0  ;;  %v7061_v28 = vld [vmem:[#allocation116_spill] sm:$0xff]  ;;  %v2429_v40 = vsel %vm2365_vm12, %v7060_v13, 0.0  ;;  %v7066_v17 = vld [vmem:[#allocation77_spill] sm:$0xff] }
 0x2e5   : > { %2837 = vst.msk [vmem:[#allocation2 + $0x298] sm:$0xff] %vm2833_vm4, %v2816_v45  ;;  %v2824_v12 = vpop.permute.xlu1 %2823  ;;  %vm1991_vm14 = vcmp.eq.f32.partialorder %v5923_v50, %v7061_v28  ;;  %v2937_v48 = vsub.f32 1.0, %v6178_v29  ;;  %vm2491_vm5 = vcmp.eq.f32.partialorder %v5637_v56, %v5977_v26  ;;  %v7062_v28 = vld [vmem:[#allocation70_spill] sm:$0xff]  ;;  %vm2486_vm12 = vcmp.eq.f32.partialorder %v5635_v21, %v5732_v7 }
 0x2e6   : > { %2841 = vst.msk [vmem:[#allocation2 + $0x2b8] sm:$0xff] %vm2833_vm4, %v2824_v12  ;;  %2698 = vperm.xlu2 %4032, %v5487_v3   ;;  %2702 = vperm.xlu0 %4053, %v6156_v10   ;;  %v2038_v3 = vadd.f32 %v2030_v35, %v1950_v47  ;;  %v6215_v35 = vfloor.f32 %v6180_v38 }
 0x2e7   : > { %3485 = vmatmul.f32.gmra.mxu2 %v2045_v0 }
 0x2e8   : > { %v2675_v31 = vpop.permute.xlu0 %2674  ;;  %4033 = vset.pattern.permute.xlu1 %v6899_v36  ;;  %v2046_v58 = vmul.f32 %v2038_v3, %v1867_v2  ;;  %v2992_v3 = vadd.f32 1.0, %v5130_v46  ;;  %v6262_v34 = vadd.f32 1.0, %v6215_v35 }
 0x2e9   : > { %vm2705_vm1 = vcmp.eq.f32.partialorder %v5856_v62, %v2675_v31  ;;  %vm2706_vm2 = vcmp.eq.f32.partialorder %v5858_v43, %v2675_v31  ;;  %2602 = vperm.xlu1 %4033, %v4979_v18   ;;  %v1860_v31 = vsel %vm1812_vm13, %v7062_v28, 0.0 }
 0x2ea   : > { %v2753_v30 = vsel %vm2705_vm1, %v6080_v37, 0.0  ;;  %v2754_v41 = vsel %vm2706_vm2, %v6080_v37, 0.0  ;;  %v2031_v37 = vsel %vm1991_vm14, %v2016_v1, 0.0  ;;  %vm2487_vm14 = vcmp.eq.f32.partialorder %v5637_v56, %v5732_v7 }
 0x2eb   : > { %v2769_v45 = vadd.f32 %v2753_v30, %v5925_v51  ;;  %v2770_v61 = vadd.f32 %v2754_v41, %v5927_v14  ;;  %v7064_v41 = vld [vmem:[#allocation45_spill] sm:$0xff] }
 0x2ec   : > { %v2523_v18 = vpop.permute.xlu2 %2522  ;;  %v3395_v9 = vpop.f32.mrf.mxu0  ;;  %vm1700_vm6 = vcmp.eq.f32.partialorder %v5896_v16, %v7064_v41 }
 0x2ed   : > { %v2786_v12 = vmul.f32 %v2770_v61, %v6058_v63  ;;  %v2548_v51 = vsel %vm2492_vm15, %v2523_v18, 0.0  ;;  %v2549_v14 = vsel %vm2493_vm3, %v2523_v18, 0.0  ;;  %v3436_v0 = vpop.f32.mrf.mxu1  ;;  %v2518_v42 = vpop.permute.xlu1 %2517  ;;  %v2785_v1 = vmul.f32 %v2769_v45, %v6056_v49  ;;  %v3369_v57 = vld [vmem:[#allocation2 + $0x2b8] sm:$0xff] }
 0x2ee   : > { %v6225_v47 = vadd.f32 %v2548_v51, %v2428_v32  ;;  %v6227_v2 = vadd.f32 %v2549_v14, %v2429_v40  ;;  %v6229_v13 = vadd.f32 %v3436_v0, %v3395_v9  ;;  %v2546_v63 = vsel %vm2490_vm8, %v2518_v42, 0.0  ;;  %3111 = vperm.xlu2 %4032, %v5130_v46   ;;  %3155 = vperm.xlu0 %4053, %v2937_v48   ;;  %v3368_v32 = vld [vmem:[#allocation2 + $0x2b0] sm:$0xff]  ;;  %v7065_v46 = vld [vmem:[#allocation78_spill] sm:$0xff] }
 0x2ef   : > { %v2547_v54 = vsel %vm2491_vm5, %v2518_v42, 0.0  ;;  %v6241_v49 = vadd.f32 %v2546_v63, %v5652_v59  ;;  %3488 = vmatmul.f32.gmra.mxu2 %v2046_v58  ;;  %3517 = vmatmul.f32.vlgmr.msrb.gmra.mxu3 %v2785_v1  ;;  %v7063_v40 = vld [vmem:[#allocation103_spill] sm:$0xff]  ;;  %vm1701_vm9 = vcmp.eq.f32.partialorder %v5896_v16, %v7065_v46  ;;  %v1756_v61 = vsel %vm1700_vm6, %v7066_v17, 0.0  ;;  %v7067_v9 = vld [vmem:[#allocation62_spill] sm:$0xff] }
 0x2f0   : > { %v1951_v30 = vsel %vm1911_vm7, %v7063_v40, 0.0  ;;  %v6253_v26 = vadd.f32 %v2547_v54, %v5654_v20  ;;  %3558 = vmatmul.f32.vlgmr.msra.gmra.mxu0 %v2786_v12  ;;  %3591 = vmatpush.msra.mxu1 %v3369_v57  ;;  %v2679_v59 = vpop.permute.xlu0 %2678  ;;  %v3367_v20 = vld [vmem:[#allocation2 + $0x2a8] sm:$0xff]  ;;  %v1868_v18 = vadd.f32 %v1860_v31, %v1756_v61  ;;  %v2846_v58 = vmul.f32 8.0, %v7067_v9  ;;  %v7068_v12 = vld [vmem:[#allocation56_spill] sm:$0xff]  ;;  %v7069_v14 = vld [vmem:[#allocation83_spill] sm:$0xff] }
 0x2f1   : > { %v2039_v45 = vadd.f32 %v2031_v37, %v1951_v30  ;;  %3951 = vmatpush.msra.mxu2 %v3369_v57  ;;  %4034 = vset.pattern.permute.xlu1 %v6870_v4  ;;  %v1757_v51 = vsel %vm1701_vm9, %v7068_v12, 0.0  ;;  %vm1813_vm10 = vcmp.eq.f32.partialorder %v5896_v16, %v7069_v14  ;;  %v7070_v37 = vld [vmem:[#allocation101_spill] sm:$0xff]  ;;  %v7071_v42 = vld [vmem:[#allocation95_spill] sm:$0xff]  ;;  %v6284_v31 = vsub.f32 %v6180_v38, %v6215_v35  ;;  %v7073_v40 = vld [vmem:[#allocation106_spill] sm:$0xff] }
 0x2f2   : > { %3592 = vmatpush.msra.mxu1 %v3368_v32  ;;  %3006 = vperm.xlu1 %4034, %v2992_v3   ;;  %vm2358_vm11 = vcmp.eq.f32.partialorder %v5635_v21, %v7070_v37  ;;  %v1861_v1 = vsel %vm1813_vm10, %v7071_v42, 0.0  ;;  %v7072_v57 = vld [vmem:[#allocation105_spill] sm:$0xff]  ;;  %vm2359_vm15 = vcmp.eq.f32.partialorder %v5637_v56, %v7070_v37  ;;  %v2543_v30 = vsel %vm2487_vm14, %v6092_v55, 0.0  ;;  %v7075_v38 = vld [vmem:[#allocation119_spill] sm:$0xff] }
 0x2f3   : > { %3952 = vmatpush.msra.mxu2 %v3368_v32  ;;  %vm1912_vm13 = vcmp.eq.f32.partialorder %v5923_v50, %v7072_v57  ;;  %v2047_v63 = vmul.f32 %v2039_v45, %v1868_v18  ;;  %v2542_v32 = vsel %vm2486_vm12, %v6092_v55, 0.0  ;;  %v2422_v7 = vsel %vm2358_vm11, %v7073_v40, 0.0 }
 0x2f4   : > { %3593 = vmatpush.msra.mxu1 %v3367_v20  ;;  %v2814_v0 = vpop.permute.xlu2 %2813  ;;  %v1952_v54 = vsel %vm1912_vm13, %v6048_v22, 0.0  ;;  %v7074_v22 = vld [vmem:[#allocation110_spill] sm:$0xff]  ;;  %v2423_v41 = vsel %vm2359_vm15, %v7073_v40, 0.0  ;;  %vm2707_vm2 = vcmp.eq.f32.partialorder %v5856_v62, %v2679_v59  ;;  %vm2708_vm3 = vcmp.eq.f32.partialorder %v5858_v43, %v2679_v59  ;;  %v7080_v40 = vld [vmem:[#allocation97_spill] sm:$0xff] }
 0x2f5   : > { %3953 = vmatpush.msra.mxu2 %v3367_v20  ;;  %2836 = vst.msk [vmem:[#allocation2 + $0x290] sm:$0xff] %vm2833_vm4, %v2814_v0  ;;  %vm1992_vm1 = vcmp.eq.f32.partialorder %v5923_v50, %v7074_v22  ;;  %v2558_v61 = vadd.f32 %v2542_v32, %v2422_v7  ;;  %v2559_v9 = vadd.f32 %v2543_v30, %v2423_v41  ;;  %v2942_v14 = vsub.f32 1.0, %v6284_v31  ;;  %v7082_v22 = vld [vmem:[#allocation112_spill] sm:$0xff] }
 0x2f6   : > { %4036 = vset.pattern.permute.xlu2 %v6870_v4  ;;  %3215 = vperm.xlu0 %4053, %v6262_v34   ;;  %v2735_v28 = vpop.permute.xlu1 %2734  ;;  %v2032_v46 = vsel %vm1992_vm1, %v7075_v38, 0.0  ;;  %v1869_v37 = vadd.f32 %v1861_v1, %v1757_v51  ;;  %vm1993_vm7 = vcmp.eq.f32.partialorder %v5923_v50, %v6097_v24  ;;  %v2936_v57 = vsub.f32 1.0, %v6102_v8  ;;  %v7077_v51 = vld [vmem:[#allocation98_spill] sm:$0xff]  ;;  %v7078_v24 = vld [vmem:[#allocation96_spill] sm:$0xff]  ;;  %v7083_v38 = vld [vmem:[#allocation67_spill] sm:$0xff] }
 0x2f7   : > { %3491 = vmatmul.f32.gmra.mxu2 %v2047_v63  ;;  %2532 = vperm.xlu2 %4036, %v5397_v15   ;;  %v2040_v17 = vadd.f32 %v2032_v46, %v1952_v54  ;;  %v3932_v54 = vadd.f32 -1.0, %v2846_v58  ;;  %v6314_v1 = vsub.f32 %v7078_v24, %v7077_v51  ;;  %vm1913_vm5 = vcmp.eq.f32.partialorder %v5923_v50, %v7080_v40  ;;  %v7081_v58 = vld [vmem:[#allocation89_spill] sm:$0xff] }
 0x2f8   : > { %v2727_v45 = vpop.permute.xlu0 %2726  ;;  %v1953_v30 = vsel %vm1913_vm5, %v7082_v22, 0.0  ;;  %vm1702_vm6 = vcmp.eq.f32.partialorder %v5896_v16, %v7083_v38  ;;  %vm2615_vm11 = vcmp.eq.f32.partialorder %v5856_v62, %v6090_v39  ;;  %vm2616_vm12 = vcmp.eq.f32.partialorder %v5858_v43, %v6090_v39 }
 0x2f9   : > { %v2755_v20 = vsel %vm2707_vm2, %v2727_v45, 0.0  ;;  %v2756_v18 = vsel %vm2708_vm3, %v2727_v45, 0.0  ;;  %v2048_v63 = vmul.f32 %v2040_v17, %v1869_v37  ;;  %v2862_v45 = vmul.f32 0.5, %v3932_v54  ;;  %v7084_v17 = vld [vmem:[#allocation84_spill] sm:$0xff] }
 0x2fa   : > { %v2771_v12 = vadd.f32 %v2755_v20, %v6032_v33  ;;  %v2772_v55 = vadd.f32 %v2756_v18, %v6034_v60  ;;  %4035 = vset.pattern.permute.xlu1 %v6899_v36  ;;  %v7076_v33 = vld [vmem:[#allocation117_spill] sm:$0xff]  ;;  %v2938_v50 = vsub.f32 1.0, %v6314_v1  ;;  %v2997_v22 = vadd.f32 1.0, %v7045_v5 }
 0x2fb   : > { %3191 = vperm.xlu1 %4035, %v2992_v3   ;;  %v2033_v32 = vsel %vm1993_vm7, %v7076_v33, 0.0  ;;  %v7079_v3 = vld [vmem:[#allocation63_spill] sm:$0xff]  ;;  %v3365_v33 = vld [vmem:[#allocation2 + $0x298] sm:$0xff] }
 0x2fc   : > { %v6306_v59 = vpop.permute.xlu2 %2598  ;;  %v2787_v0 = vmul.f32 %v2771_v12, %v2558_v61  ;;  %v2788_v42 = vmul.f32 %v2772_v55, %v2559_v9  ;;  %vm1814_vm8 = vcmp.eq.f32.partialorder %v5896_v16, %v7079_v3  ;;  %v2041_v46 = vadd.f32 %v2033_v32, %v1953_v30 }
 0x2fd   : > { %v1862_v7 = vsel %vm1814_vm8, %v7081_v58, 0.0  ;;  %v1758_v61 = vsel %vm1702_vm6, %v7084_v17, 0.0  ;;  %vm2619_vm3 = vcmp.eq.f32.partialorder %v5856_v62, %v6306_v59  ;;  %vm2620_vm7 = vcmp.eq.f32.partialorder %v5858_v43, %v6306_v59 }
 0x2fe   : > { %3175 = vperm.xlu0 %4053, %v2942_v14   ;;  %3520 = vmatmul.f32.gmra.mxu3 %v2787_v0  ;;  %v2818_v60 = vpop.permute.xlu1 %2817  ;;  %v1870_v20 = vadd.f32 %v1862_v7, %v1758_v61  ;;  %v3363_v7 = vld [vmem:[#allocation2 + $0x288] sm:$0xff] }
 0x2ff   : > { %3494 = vmatmul.f32.gmra.mxu2 %v2048_v63  ;;  %3561 = vmatmul.f32.gmra.mxu0 %v2788_v42  ;;  %2838 = vst.msk [vmem:[#allocation2 + $0x2a0] sm:$0xff] %vm2833_vm4, %v2818_v60  ;;  %v6339_v63 = vfloor.f32 %v2862_v45  ;;  %v3364_v60 = vld [vmem:[#allocation2 + $0x290] sm:$0xff] }
 0x300   : > { %2950 = vperm.xlu2 %4036, %v2936_v57   ;;  %v2687_v41 = vpop.permute.xlu0 %2686  ;;  %v2049_v16 = vmul.f32 %v2041_v46, %v1870_v20 }
 0x301   : > { %vm2711_vm9 = vcmp.eq.f32.partialorder %v5856_v62, %v2687_v41  ;;  %vm2712_vm10 = vcmp.eq.f32.partialorder %v5858_v43, %v2687_v41  ;;  %v6348_v39 = vadd.f32 1.0, %v6339_v63  ;;  %v6361_v30 = vsub.f32 %v2862_v45, %v6339_v63 }
 0x302   : > { %v2759_v12 = vsel %vm2711_vm9, %v2735_v28, 0.0  ;;  %v2760_v0 = vsel %vm2712_vm10, %v2735_v28, 0.0  ;;  %v2664_v28 = vsel %vm2616_vm12, %v6106_v53, 0.0 }
 0x303   : > { %v3398_v18 = vpop.f32.mrf.mxu0  ;;  %2746 = vperm.xlu1 %4035, %v5397_v15   ;;  %v2663_v15 = vsel %vm2615_vm11, %v6106_v53, 0.0  ;;  %v2776_v24 = vadd.f32 %v2760_v0, %v2664_v28  ;;  %v2939_v61 = vsub.f32 1.0, %v6361_v30 }
 0x304   : > { %v3439_v9 = vpop.f32.mrf.mxu1 }
 0x305   : > { %v6330_v55 = vadd.f32 %v3439_v9, %v3398_v18  ;;  %v6332_v37 = vpop.permute.xlu2 %3001  ;;  %v2792_v58 = vmul.f32 %v2776_v24, %v6253_v26 }
 0x306   : > { %3159 = vperm.xlu0 %4053, %v2938_v50   ;;  %3523 = vmatmul.f32.gmra.mxu3 %v6144_v25  ;;  %v3366_v42 = vld [vmem:[#allocation2 + $0x2a0] sm:$0xff]  ;;  %v2691_v54 = vpop.permute.xlu1 %2690  ;;  %v2775_v25 = vadd.f32 %v2759_v12, %v2663_v15 }
 0x307   : > { %3497 = vmatmul.f32.gmra.mxu2 %v2049_v16  ;;  %3564 = vmatmul.f32.gmra.mxu0 %v6147_v11  ;;  %vm2713_vm13 = vcmp.eq.f32.partialorder %v5856_v62, %v2691_v54  ;;  %vm2714_vm14 = vcmp.eq.f32.partialorder %v5858_v43, %v2691_v54 }
 0x308   : > { %4038 = vset.pattern.permute.xlu2 %v6899_v36  ;;  %3594 = vmatpush.msra.mxu1 %v3366_v42  ;;  %v2595_v32 = vpop.permute.xlu0 %2594  ;;  %v2791_v53 = vmul.f32 %v2775_v25, %v6241_v49 }
 0x309   : > { %3151 = vperm.xlu2 %4038, %v2936_v57   ;;  %3954 = vmatpush.msra.mxu2 %v3366_v42  ;;  %vm2617_vm15 = vcmp.eq.f32.partialorder %v5856_v62, %v2595_v32  ;;  %vm2618_vm1 = vcmp.eq.f32.partialorder %v5858_v43, %v2595_v32  ;;  %v7085_v42 = vld [vmem:[#allocation93_spill] sm:$0xff] }
 0x30a   : > { %3595 = vmatpush.msra.mxu1 %v3365_v33  ;;  %v2941_v15 = vsub.f32 1.0, %v7085_v42 }
 0x30b   : > { %3955 = vmatpush.msra.mxu2 %v3365_v33  ;;  %v3401_v3 = vpop.f32.mrf.mxu0  ;;  %4037 = vset.pattern.permute.xlu1 %v6870_v4 }
 0x30c   : > { %v3442_v11 = vpop.f32.mrf.mxu1  ;;  %3596 = vmatpush.msra.mxu1 %v3364_v60  ;;  %3054 = vperm.xlu1 %4037, %v6102_v8  }
 0x30d   : > { %v6352_v40 = vadd.f32 %v3442_v11, %v3401_v3  ;;  %3956 = vmatpush.msra.mxu2 %v3364_v60  ;;  %v6355_v57 = vpop.permute.xlu2 %2527 }
 0x30e   : > { %3203 = vperm.xlu0 %4053, %v6348_v39   ;;  %3526 = vmatmul.f32.gmra.mxu3 %v2791_v53  ;;  %v2739_v8 = vpop.permute.xlu1 %2738 }
 0x30f   : > { %3567 = vmatmul.f32.gmra.mxu0 %v2792_v58  ;;  %3597 = vmatpush.msra.mxu1 %v3363_v7  ;;  %v2761_v49 = vsel %vm2713_vm13, %v2739_v8, 0.0  ;;  %v2762_v26 = vsel %vm2714_vm14, %v2739_v8, 0.0  ;;  %v6383_v60 = vpop.f32.mrf.mxu3  ;;  %v7086_v58 = vld [vmem:[#allocation115_spill] sm:$0xff] }
 0x310   : > { %3957 = vmatpush.msra.mxu2 %v3363_v7  ;;  %v2643_v41 = vpop.permute.xlu0 %2642  ;;  %vm2495_vm2 = vcmp.eq.f32.partialorder %v5637_v56, %v7086_v58 }
 0x311   : > { %4039 = vset.pattern.permute.xlu2 %v6870_v4  ;;  %v2665_v38 = vsel %vm2617_vm15, %v2643_v41, 0.0  ;;  %v2666_v46 = vsel %vm2618_vm1, %v2643_v41, 0.0  ;;  %v2993_v41 = vadd.f32 1.0, %v6158_v19  ;;  %vm2496_vm15 = vcmp.eq.f32.partialorder %v5635_v21, %v6029_v23 }
 0x312   : > { %v2777_v45 = vadd.f32 %v2761_v49, %v2665_v38  ;;  %v2778_v17 = vadd.f32 %v2762_v26, %v2666_v46  ;;  %3031 = vperm.xlu2 %4039, %v2997_v22   ;;  %vm2497_vm1 = vcmp.eq.f32.partialorder %v5637_v56, %v6029_v23 }
 0x313   : > { %v3404_v20 = vpop.f32.mrf.mxu0 }
 0x314   : > { %v3445_v18 = vpop.f32.mrf.mxu1  ;;  %v2793_v9 = vmul.f32 %v2777_v45, %v6225_v47  ;;  %v2794_v12 = vmul.f32 %v2778_v17, %v6227_v2  ;;  %2919 = vperm.xlu1 %4037, %v7045_v5  }
 0x315   : > { %v6371_v16 = vadd.f32 %v3445_v18, %v3404_v20  ;;  %v6374_v0 = vpop.permute.xlu2 %2945 }
 0x316   : > { %3163 = vperm.xlu0 %4053, %v2939_v61   ;;  %3529 = vmatmul.f32.gmra.mxu3 %v2793_v9  ;;  %v2810_v54 = vpop.permute.xlu1 %2809  ;;  %v6424_v9 = vld [vmem:[%s6726_s17] ss:$0 sm:$0xff] }
 0x317   : > { %3570 = vmatmul.f32.gmra.mxu0 %v2794_v12  ;;  %2834 = vst.msk [vmem:[#allocation2 + $0x280] sm:$0xff] %vm2833_vm4, %v2810_v54  ;;  %vm2494_vm4 = vcmp.eq.f32.partialorder %v5635_v21, %v7086_v58 }
 0x318   : > { %v2695_v33 = vpop.permute.xlu0 %2694  ;;  %v2550_v7 = vsel %vm2494_vm4, %v6355_v57, 0.0 }
 0x319   : > { %v2566_v49 = vadd.f32 %v2550_v7, %v5832_v44  ;;  %vm2715_vm8 = vcmp.eq.f32.partialorder %v5856_v62, %v2695_v33  ;;  %vm2716_vm5 = vcmp.eq.f32.partialorder %v5858_v43, %v2695_v33  ;;  %v7087_v33 = vld [vmem:[#allocation120_spill] sm:$0xff] }
 0x31a   : > { %2975 = vperm.xlu2 %4039, %v2941_v15  }
 0x31b   : > { %v3407_v47 = vpop.f32.mrf.mxu0  ;;  %v6390_v53 = vpop.f32.mrf.mxu3 }
 0x31c   : > { %v3448_v2 = vpop.f32.mrf.mxu1  ;;  %4040 = vset.pattern.permute.xlu1 %v6899_v36 }
 0x31d   : > { %v6380_v28 = vadd.f32 %v3448_v2, %v3407_v47  ;;  %3211 = vperm.xlu1 %4040, %v2997_v22  }
 0x31e   : > { %v3228_v5 = vpop.permute.xlu2 %3227  ;;  %v2890_v32 = vpop.permute.xlu1 %2889  ;;  %v3362_v25 = vld [vmem:[#allocation2 + $0x280] sm:$0xff] }
 0x31f   : > { %3598 = vmatpush.msra.mxu1 %v3362_v25  ;;  %3958 = vmatpush.msra.mxu2 %v3362_v25 }
 0x320   : > { %v3108_v24 = vpop.permute.xlu0 %3107 }
 0x321   : > { %vm3138_vm11 = vcmp.eq.f32.partialorder %v6424_v9, %v3108_v24 }
 0x322   : > { %4041 = vset.pattern.permute.xlu2 %v6899_v36 }
 0x323   : > { %3251 = vperm.xlu2 %4041, %v7085_v42  }
 0x325   : > { %3171 = vperm.xlu1 %4040, %v2941_v15   ;;  %v6426_v15 = vpop.f32.mrf.mxu3 }
 0x327   : > { %v6387_v3 = vpop.permute.xlu2 %3026  ;;  %v3188_v11 = vpop.permute.xlu1 %3187 }
 0x328   : > { %v2647_v22 = vpop.permute.xlu0 %2646  ;;  %vm3218_vm10 = vcmp.eq.f32.partialorder %v6424_v9, %v3188_v11  ;;  %v7088_v11 = vld [vmem:[#allocation74_spill] sm:$0xff] }
 0x329   : > { %v2667_v38 = vsel %vm2619_vm3, %v2647_v22, 0.0  ;;  %v2668_v46 = vsel %vm2620_vm7, %v2647_v22, 0.0  ;;  %v3258_v2 = vsel %vm3218_vm10, %v3228_v5, 0.0  ;;  %v7089_v22 = vsub.f32 1.0, %v7088_v11 }
 0x32b   : > { %2606 = vperm.xlu2 %4041, %v7051_v6   ;;  %v2551_v6 = vsel %vm2495_vm2, %v6355_v57, 0.0 }
 0x32c   : > { %v2567_v57 = vadd.f32 %v2551_v6, %v5834_v52 }
 0x32d   : > { %4042 = vset.pattern.permute.xlu1 %v6870_v4 }
 0x32e   : > { %2481 = vperm.xlu1 %4042, %v6156_v10   ;;  %v6413_v10 = vld [vmem:[%s6725_s16] ss:$0 sm:$0xff] }
 0x32f   : > { %v6404_v8 = vpop.permute.xlu2 %2970  ;;  %v2743_v26 = vpop.permute.xlu1 %2742  ;;  %vm2927_vm6 = vcmp.eq.f32.partialorder %v6413_v10, %v2890_v32  ;;  %vm3039_vm9 = vcmp.eq.f32.partialorder %v6413_v10, %v6332_v37  ;;  %vm3044_vm2 = vcmp.eq.f32.partialorder %v6413_v10, %v6387_v3 }
 0x330   : > { %v2763_v45 = vsel %vm2715_vm8, %v2743_v26, 0.0  ;;  %v2764_v17 = vsel %vm2716_vm5, %v2743_v26, 0.0  ;;  %v2983_v52 = vsel %vm2927_vm6, %v6374_v0, 0.0  ;;  %v3087_v47 = vsel %vm3039_vm9, %v7087_v33, 0.0  ;;  %v6437_v37 = vpop.f32.mrf.mxu3  ;;  %v3128_v5 = vpop.permute.xlu0 %3127 }
 0x331   : > { %v3477_v59 = vpop.f32.mrf.mxu2  ;;  %v2779_v44 = vadd.f32 %v2763_v45, %v2667_v38  ;;  %v2780_v20 = vadd.f32 %v2764_v17, %v2668_v46  ;;  %v3095_v25 = vadd.f32 %v3087_v47, %v2983_v52  ;;  %vm3143_vm3 = vcmp.eq.f32.partialorder %v6424_v9, %v3128_v5 }
 0x332   : > { %v6417_v18 = vadd.f32 %v3477_v59, %v6229_v13 }
 0x333   : > { %4043 = vset.pattern.permute.xlu2 %v6870_v4  ;;  %v2795_v12 = vmul.f32 %v2779_v44, %v2566_v49  ;;  %v2796_v42 = vmul.f32 %v2780_v20, %v2567_v57 }
 0x334   : > { %3011 = vperm.xlu2 %4043, %v2993_v41  }
 0x335   : > { %3532 = vmatmul.f32.gmra.mxu3 %v2795_v12  ;;  %3573 = vmatmul.f32.gmra.mxu0 %v2796_v42 }
 0x336   : > { %2899 = vperm.xlu1 %4042, %v6158_v19  }
 0x337   : > { %v3148_v13 = vpop.permute.xlu1 %3147 }
 0x338   : > { %v3168_v54 = vpop.permute.xlu2 %3167  ;;  %v3178_v32 = vsel %vm3138_vm11, %v3148_v13, 0.0  ;;  %v6447_v49 = vpop.f32.mrf.mxu3 }
 0x339   : > { %v3266_v58 = vadd.f32 %v3258_v2, %v3178_v32  ;;  %v3183_v42 = vsel %vm3143_vm3, %v3168_v54, 0.0  ;;  %v6476_v2 = vpop.f32.mrf.mxu0 }
 0x33b   : > { %v3274_v7 = vmul.f32 %v3266_v58, %v3095_v25 }
 0x33c   : > { %4045 = vset.pattern.permute.xlu2 %v6899_v36 }
 0x33d   : > { %3195 = vperm.xlu2 %4045, %v2993_v41   ;;  %3599 = vmatmul.f32.vlgmr.msra.gmra.mxu1 %v3274_v7 }
 0x33e   : > { %4044 = vset.pattern.permute.xlu1 %v6899_v36 }
 0x33f   : > { %3115 = vperm.xlu1 %4044, %v6158_v19   ;;  %v7090_v19 = vld [vmem:[#allocation104_spill] sm:$0xff] }
 0x340   : > { %v6440_v0 = vpop.permute.xlu2 %2698  ;;  %v2915_v24 = vpop.permute.xlu1 %2914  ;;  %vm2368_vm13 = vcmp.eq.f32.partialorder %v5635_v21, %v7090_v19  ;;  %vm2369_vm14 = vcmp.eq.f32.partialorder %v5637_v56, %v7090_v19 }
 0x341   : > { %v2432_v46 = vsel %vm2368_vm13, %v5685_v27, 0.0  ;;  %vm2932_vm4 = vcmp.eq.f32.partialorder %v6413_v10, %v2915_v24  ;;  %v2433_v17 = vsel %vm2369_vm14, %v5685_v27, 0.0  ;;  %v6473_v33 = vpop.f32.mrf.mxu3  ;;  %vm2717_vm5 = vcmp.eq.f32.partialorder %v5856_v62, %v6440_v0 }
 0x342   : > { %v2988_v52 = vsel %vm2932_vm4, %v6404_v8, 0.0  ;;  %v6484_v8 = vpop.f32.mrf.mxu0  ;;  %vm2718_vm6 = vcmp.eq.f32.partialorder %v5858_v43, %v6440_v0 }
 0x345   : > { %2750 = vperm.xlu2 %4045, %v7088_v11  }
 0x347   : > { %2654 = vperm.xlu1 %4044, %v7089_v22  }
 0x348   : > { %v6445_v6 = vpop.permute.xlu2 %3111 }
 0x349   : > { %v3208_v26 = vpop.permute.xlu1 %3207  ;;  %v6481_v54 = vpop.f32.mrf.mxu3  ;;  %vm3139_vm11 = vcmp.eq.f32.partialorder %v6424_v9, %v6445_v6 }
 0x34a   : > { %v3480_v41 = vpop.f32.mrf.mxu2  ;;  %vm3223_vm12 = vcmp.eq.f32.partialorder %v6424_v9, %v3208_v26  ;;  %v6500_v11 = vpop.f32.mrf.mxu0 }
 0x34b   : > { %v6450_v38 = vadd.f32 %v3480_v41, %v6330_v55  ;;  %v3248_v55 = vpop.permute.xlu0 %3247 }
 0x34c   : > { %v3263_v59 = vsel %vm3223_vm12, %v3248_v55, 0.0 }
 0x34d   : > { %4047 = vset.pattern.permute.xlu2 %v6870_v4 }
 0x34e   : > { %3059 = vperm.xlu2 %4047, %v6178_v29  }
 0x34f   : > { %4046 = vset.pattern.permute.xlu1 %v6870_v4 }
 0x350   : > { %2955 = vperm.xlu1 %4046, %v2937_v48   ;;  %v3271_v48 = vadd.f32 %v3263_v59, %v3183_v42 }
 0x351   : > { %v2533_v45 = vpop.permute.xlu2 %2532 }
 0x352   : > { %v2552_v57 = vsel %vm2496_vm15, %v2533_v45, 0.0  ;;  %v2553_v44 = vsel %vm2497_vm1, %v2533_v45, 0.0  ;;  %v3075_v23 = vpop.permute.xlu1 %3074 }
 0x353   : > { %v2568_v20 = vadd.f32 %v2552_v57, %v2432_v46  ;;  %v2569_v12 = vadd.f32 %v2553_v44, %v2433_v17  ;;  %v3092_v13 = vsel %vm3044_vm2, %v3075_v23, 0.0  ;;  %v2651_v22 = vpop.permute.xlu0 %2650  ;;  %v7091_v57 = vld [vmem:[#allocation99_spill] sm:$0xff] }
 0x354   : > { %v3100_v47 = vadd.f32 %v3092_v13, %v2988_v52  ;;  %v7092_v13 = vld [vmem:[#allocation121_spill] sm:$0xff] }
 0x355   : > { %vm2928_vm10 = vcmp.eq.f32.partialorder %v6413_v10, %v7092_v13 }
 0x356   : > { %2924 = vperm.xlu2 %4047, %v6215_v35   ;;  %v3279_v27 = vmul.f32 %v3271_v48, %v3100_v47 }
 0x358   : > { %4048 = vset.pattern.permute.xlu1 %v6899_v36  ;;  %3614 = vmatmul.f32.vlgmr.msra.gmra.mxu2 %v3279_v27 }
 0x359   : > { %3235 = vperm.xlu1 %4048, %v6178_v29   ;;  %v6493_v29 = vpop.f32.mrf.mxu3 }
 0x35a   : > { %v2951_v7 = vpop.permute.xlu2 %2950 }
 0x35b   : > { %v2603_v3 = vpop.permute.xlu1 %2602  ;;  %v3232_v23 = vpop.permute.xlu0 %3231 }
 0x35c   : > { %vm2621_vm7 = vcmp.eq.f32.partialorder %v5856_v62, %v2603_v3  ;;  %vm2622_vm8 = vcmp.eq.f32.partialorder %v5858_v43, %v2603_v3 }
 0x35d   : > { %v2670_v46 = vsel %vm2622_vm8, %v2651_v22, 0.0 }
 0x35e   : > { %4050 = vset.pattern.permute.xlu2 %v6899_v36 }
 0x35f   : > { %3135 = vperm.xlu2 %4050, %v6215_v35  }
 0x361   : > { %4049 = vset.pattern.permute.xlu1 %v6870_v4 }
 0x362   : > { %v3483_v32 = vpop.f32.mrf.mxu2  ;;  %3036 = vperm.xlu1 %4049, %v6262_v34  }
 0x363   : > { %v6488_v25 = vadd.f32 %v3483_v32, %v6352_v40 }
 0x364   : > { %v3007_v58 = vpop.permute.xlu1 %3006 }
 0x365   : > { %vm3040_vm12 = vcmp.eq.f32.partialorder %v6413_v10, %v3007_v58 }
 0x367   : > { %4051 = vset.pattern.permute.xlu2 %v6870_v4 }
 0x368   : > { %3084 = vperm.xlu2 %4051, %v6284_v31  }
 0x36a   : > { %v3486_v24 = vpop.f32.mrf.mxu2  ;;  %2980 = vperm.xlu1 %4049, %v2942_v14   ;;  %v3152_v14 = vpop.permute.xlu2 %3151 }
 0x36b   : > { %v6496_v35 = vadd.f32 %v3486_v24, %v6371_v16  ;;  %v3179_v48 = vsel %vm3139_vm11, %v3152_v14, 0.0 }
 0x36d   : > { %v3192_v40 = vpop.permute.xlu1 %3191  ;;  %v3559_v16 = vpop.f32.mrf.mxu0 }
 0x36e   : > { %vm3219_vm9 = vcmp.eq.f32.partialorder %v6424_v9, %v3192_v40 }
 0x36f   : > { %v3259_v52 = vsel %vm3219_vm9, %v3232_v23, 0.0 }
 0x370   : > { %2904 = vperm.xlu2 %4051, %v7077_v51   ;;  %v3267_v27 = vadd.f32 %v3259_v52, %v3179_v48 }
 0x372   : > { %v3489_v34 = vpop.f32.mrf.mxu2  ;;  %v3518_v5 = vpop.f32.mrf.mxu3  ;;  %4052 = vset.pattern.permute.xlu1 %v6899_v36 }
 0x373   : > { %v6504_v26 = vadd.f32 %v3489_v34, %v6380_v28  ;;  %v3519_v41 = vadd.f32 %v3518_v5, %v6417_v18  ;;  %3255 = vperm.xlu1 %4052, %v6284_v31   ;;  %v2669_v18 = vsel %vm2621_vm7, %v2651_v22, 0.0  ;;  %v3032_v42 = vpop.permute.xlu2 %3031 }
 0x374   : > { %vm3045_vm14 = vcmp.eq.f32.partialorder %v6413_v10, %v3032_v42 }
 0x375   : > { %v6511_v19 = vadd.f32 %v3559_v16, %v3519_v41  ;;  %v2747_v28 = vpop.permute.xlu1 %2746 }
 0x376   : > { %v2765_v55 = vsel %vm2717_vm5, %v2747_v28, 0.0  ;;  %v2766_v45 = vsel %vm2718_vm6, %v2747_v28, 0.0 }
 0x377   : > { %v2781_v17 = vadd.f32 %v2765_v55, %v2669_v18  ;;  %v2782_v59 = vadd.f32 %v2766_v45, %v2670_v46 }
 0x378   : > { %4054 = vset.pattern.permute.xlu2 %v6899_v36 }
 0x379   : > { %3199 = vperm.xlu2 %4054, %v7091_v57   ;;  %v2797_v31 = vmul.f32 %v2781_v17, %v2568_v20  ;;  %v2798_v44 = vmul.f32 %v2782_v59, %v2569_v12  ;;  %v2984_v12 = vsel %vm2928_vm10, %v2951_v7, 0.0 }
 0x37b   : > { %3119 = vperm.xlu1 %4052, %v7077_v51   ;;  %3535 = vmatmul.f32.gmra.mxu3 %v2797_v31  ;;  %v2976_v6 = vpop.permute.xlu2 %2975 }
 0x37c   : > { %v3562_v0 = vpop.f32.mrf.mxu0  ;;  %3576 = vmatmul.f32.gmra.mxu0 %v2798_v44 }
 0x37e   : > { %v3055_v20 = vpop.permute.xlu1 %3054 }
 0x37f   : > { %v3088_v47 = vsel %vm3040_vm12, %v3055_v20, 0.0  ;;  %v7094_v20 = vld [vmem:[#allocation22_spill] sm:$0xff] }
 0x380   : > { %v3096_v51 = vadd.f32 %v3088_v47, %v2984_v12  ;;  %vm2370_vm4 = vcmp.eq.f32.partialorder %v5635_v21, %v7094_v20  ;;  %vm2371_vm2 = vcmp.eq.f32.partialorder %v5637_v56, %v7094_v20  ;;  %v7095_v12 = vld [vmem:[#allocation111_spill] sm:$0xff] }
 0x381   : > { %4056 = vset.pattern.permute.xlu2 %v6870_v4  ;;  %v3521_v3 = vpop.f32.mrf.mxu3  ;;  %v2434_v48 = vsel %vm2370_vm4, %v7095_v12, 0.0 }
 0x382   : > { %3064 = vperm.xlu2 %4056, %v6314_v1   ;;  %v3522_v32 = vadd.f32 %v3521_v3, %v6450_v38  ;;  %v3275_v24 = vmul.f32 %v3267_v27, %v3096_v51 }
 0x383   : > { %4055 = vset.pattern.permute.xlu1 %v6870_v4  ;;  %v3252_v38 = vpop.permute.xlu2 %3251 }
 0x384   : > { %v6530_v40 = vadd.f32 %v3562_v0, %v3522_v32  ;;  %2960 = vperm.xlu1 %4055, %v2938_v50   ;;  %3602 = vmatmul.f32.gmra.mxu1 %v3275_v24  ;;  %v3565_v58 = vpop.f32.mrf.mxu0 }
 0x386   : > { %v2920_v7 = vpop.permute.xlu1 %2919 }
 0x387   : > { %vm2933_vm13 = vcmp.eq.f32.partialorder %v6413_v10, %v2920_v7 }
 0x389   : > { %v3524_v34 = vpop.f32.mrf.mxu3 }
 0x38a   : > { %2909 = vperm.xlu2 %4056, %v6339_v63   ;;  %v3525_v5 = vadd.f32 %v3524_v34, %v6488_v25  ;;  %v3132_v25 = vpop.permute.xlu0 %3131 }
 0x38b   : > { %vm3144_vm1 = vcmp.eq.f32.partialorder %v6424_v9, %v3132_v25  ;;  %v2607_v17 = vpop.permute.xlu2 %2606 }
 0x38c   : > { %v6536_v22 = vadd.f32 %v3565_v58, %v3525_v5  ;;  %4057 = vset.pattern.permute.xlu1 %v6899_v36  ;;  %v3568_v14 = vpop.f32.mrf.mxu0  ;;  %vm2623_vm6 = vcmp.eq.f32.partialorder %v5856_v62, %v2607_v17  ;;  %vm2624_vm9 = vcmp.eq.f32.partialorder %v5858_v43, %v2607_v17 }
 0x38d   : > { %3239 = vperm.xlu1 %4057, %v6314_v1   ;;  %v2989_v1 = vsel %vm2933_vm13, %v2976_v6, 0.0 }
 0x38f   : > { %v3212_v41 = vpop.permute.xlu1 %3211 }
 0x390   : > { %vm3224_vm15 = vcmp.eq.f32.partialorder %v6424_v9, %v3212_v41 }
 0x391   : > { %v3527_v16 = vpop.f32.mrf.mxu3 }
 0x392   : > { %4059 = vset.pattern.permute.xlu2 %v6899_v36  ;;  %v3528_v50 = vadd.f32 %v3527_v16, %v6496_v35  ;;  %v7093_v35 = vld [vmem:[#allocation122_spill] sm:$0xff] }
 0x393   : > { %3123 = vperm.xlu2 %4059, %v6339_v63   ;;  %v3093_v46 = vsel %vm3045_vm14, %v7093_v35, 0.0  ;;  %v3264_v63 = vsel %vm3224_vm15, %v3252_v38, 0.0  ;;  %v3012_v42 = vpop.permute.xlu2 %3011 }
 0x394   : > { %v6544_v28 = vadd.f32 %v3568_v14, %v3528_v50  ;;  %v3101_v59 = vadd.f32 %v3093_v46, %v2989_v1  ;;  %v3571_v44 = vpop.f32.mrf.mxu0  ;;  %vm3041_vm10 = vcmp.eq.f32.partialorder %v6413_v10, %v3012_v42 }
 0x395   : > { %4058 = vset.pattern.permute.xlu1 %v6870_v4 }
 0x396   : > { %3021 = vperm.xlu1 %4058, %v6348_v39  }
 0x397   : > { %v3172_v18 = vpop.permute.xlu1 %3171 }
 0x398   : > { %v3184_v55 = vsel %vm3144_vm1, %v3172_v18, 0.0 }
 0x399   : > { %v3530_v45 = vpop.f32.mrf.mxu3  ;;  %v3272_v57 = vadd.f32 %v3264_v63, %v3184_v55 }
 0x39a   : > { %v3531_v31 = vadd.f32 %v3530_v45, %v6504_v26 }
 0x39b   : > { %4060 = vset.pattern.permute.xlu2 %v6870_v4  ;;  %v3280_v23 = vmul.f32 %v3272_v57, %v3101_v59  ;;  %v3196_v26 = vpop.permute.xlu2 %3195  ;;  %v2703_v4 = vpop.permute.xlu0 %2702 }
 0x39c   : > { %3069 = vperm.xlu2 %4060, %v6361_v30   ;;  %v6555_v39 = vadd.f32 %v3571_v44, %v3531_v31  ;;  %vm2719_vm8 = vcmp.eq.f32.partialorder %v5856_v62, %v2703_v4  ;;  %vm2720_vm5 = vcmp.eq.f32.partialorder %v5858_v43, %v2703_v4  ;;  %vm3220_vm13 = vcmp.eq.f32.partialorder %v6424_v9, %v3196_v26 }
 0x39d   : > { %3617 = vmatmul.f32.gmra.mxu2 %v3280_v23 }
 0x39e   : > { %2965 = vperm.xlu1 %4058, %v2939_v61  }
 0x3a0   : > { %v2482_v0 = vpop.permute.xlu1 %2481 }
 0x3a1   : > { %vm2498_vm3 = vcmp.eq.f32.partialorder %v5635_v21, %v2482_v0  ;;  %vm2499_vm7 = vcmp.eq.f32.partialorder %v5637_v56, %v2482_v0 }
 0x3a3   : > { %v2751_v61 = vpop.permute.xlu2 %2750  ;;  %v3156_v62 = vpop.permute.xlu0 %3155 }
 0x3a4   : > { %v2767_v56 = vsel %vm2719_vm8, %v2751_v61, 0.0  ;;  %v2768_v51 = vsel %vm2720_vm5, %v2751_v61, 0.0 }
 0x3a6   : > { %4061 = vset.pattern.permute.xlu1 %v6899_v36  ;;  %v2435_v36 = vsel %vm2371_vm2, %v7095_v12, 0.0 }
 0x3a7   : > { %3243 = vperm.xlu1 %4061, %v6361_v30   ;;  %v7096_v30 = vld [vmem:[#allocation123_spill] sm:$0xff] }
 0x3a8   : > { %v2900_v52 = vpop.permute.xlu1 %2899  ;;  %v2554_v47 = vsel %vm2498_vm3, %v7096_v30, 0.0  ;;  %v2555_v27 = vsel %vm2499_vm7, %v7096_v30, 0.0  ;;  %v7097_v30 = vld [vmem:[#allocation124_spill] sm:$0xff] }
 0x3a9   : > { %v2570_v58 = vadd.f32 %v2554_v47, %v2434_v48  ;;  %v2571_v7 = vadd.f32 %v2555_v27, %v2435_v36  ;;  %vm2929_vm11 = vcmp.eq.f32.partialorder %v6413_v10, %v2900_v52  ;;  %vm3042_vm7 = vcmp.eq.f32.partialorder %v6413_v10, %v7097_v30 }
 0x3ab   : > { %v3060_v38 = vpop.permute.xlu2 %3059  ;;  %v3216_v45 = vpop.permute.xlu0 %3215 }
 0x3ac   : > { %v3089_v50 = vsel %vm3041_vm10, %v3060_v38, 0.0  ;;  %vm3225_vm4 = vcmp.eq.f32.partialorder %v6424_v9, %v3216_v45 }
 0x3b1   : > { %v3116_v13 = vpop.permute.xlu1 %3115 }
 0x3b2   : > { %vm3140_vm12 = vcmp.eq.f32.partialorder %v6424_v9, %v3116_v13 }
 0x3b3   : > { %v2925_v14 = vpop.permute.xlu2 %2924  ;;  %v3180_v25 = vsel %vm3140_vm12, %v3156_v62, 0.0  ;;  %v3176_v31 = vpop.permute.xlu0 %3175 }
 0x3b4   : > { %vm2934_vm14 = vcmp.eq.f32.partialorder %v6413_v10, %v2925_v14 }
 0x3b8   : > { %v3533_v45 = vpop.f32.mrf.mxu3 }
 0x3b9   : > { %v2655_v21 = vpop.permute.xlu1 %2654 }
 0x3ba   : > { %v2671_v3 = vsel %vm2623_vm6, %v2655_v21, 0.0  ;;  %v2672_v32 = vsel %vm2624_vm9, %v2655_v21, 0.0 }
 0x3bb   : > { %v2783_v24 = vadd.f32 %v2767_v56, %v2671_v3  ;;  %v2784_v6 = vadd.f32 %v2768_v51, %v2672_v32  ;;  %v3136_v55 = vpop.permute.xlu2 %3135  ;;  %v3160_v47 = vpop.permute.xlu0 %3159 }
 0x3bc   : > { %vm3145_vm15 = vcmp.eq.f32.partialorder %v6424_v9, %v3136_v55 }
 0x3bd   : > { %v2799_v34 = vmul.f32 %v2783_v24, %v2570_v58  ;;  %v2800_v5 = vmul.f32 %v2784_v6, %v2571_v7  ;;  %v3185_v23 = vsel %vm3145_vm15, %v3176_v31, 0.0 }
 0x3bf   : > { %3538 = vmatmul.f32.gmra.mxu3 %v2799_v34  ;;  %3579 = vmatmul.f32.gmra.mxu0 %v2800_v5 }
 0x3c2   : > { %v2956_v41 = vpop.permute.xlu1 %2955 }
 0x3c3   : > { %v2985_v43 = vsel %vm2929_vm11, %v2956_v41, 0.0  ;;  %v3085_v59 = vpop.permute.xlu2 %3084  ;;  %v3204_v7 = vpop.permute.xlu0 %3203  ;;  %vm3633_vm11 = vcmask 523264  }
 0x3c4   : > { %v3097_v18 = vadd.f32 %v3089_v50, %v2985_v43  ;;  %vm3222_vm10 = vcmp.eq.f32.partialorder %v6424_v9, %v3204_v7  ;;  %v3667_v7 = vld [vmem:[%s6722_s13 + $0x50] sm:$0xff] }
 0x3cb   : > { %v3236_v16 = vpop.permute.xlu1 %3235  ;;  %v2905_v52 = vpop.permute.xlu2 %2904 }
 0x3cc   : > { %v3260_v1 = vsel %vm3220_vm13, %v3236_v16, 0.0  ;;  %vm2930_vm2 = vcmp.eq.f32.partialorder %v6413_v10, %v2905_v52  ;;  %v3164_v62 = vpop.permute.xlu0 %3163 }
 0x3cd   : > { %v3268_v35 = vadd.f32 %v3260_v1, %v3180_v25 }
 0x3cf   : > { %v3276_v46 = vmul.f32 %v3268_v35, %v3097_v18  ;;  %v3492_v35 = vpop.f32.mrf.mxu2 }
 0x3d1   : > { %3605 = vmatmul.f32.gmra.mxu1 %v3276_v46 }
 0x3d3   : > { %v3200_v61 = vpop.permute.xlu2 %3199 }
 0x3d4   : > { %v3037_v63 = vpop.permute.xlu1 %3036  ;;  %vm3221_vm8 = vcmp.eq.f32.partialorder %v6424_v9, %v3200_v61 }
 0x3d5   : > { %vm3046_vm1 = vcmp.eq.f32.partialorder %v6413_v10, %v3037_v63  ;;  %v3451_v63 = vpop.f32.mrf.mxu1 }
 0x3d6   : > { %v3094_v0 = vsel %vm3046_vm1, %v3085_v59, 0.0  ;;  %v3452_v52 = vadd.f32 %v3451_v63, %v6476_v2 }
 0x3d7   : > { %v3495_v46 = vpop.f32.mrf.mxu2 }
 0x3dc   : > { %v2981_v17 = vpop.permute.xlu1 %2980  ;;  %v3065_v48 = vpop.permute.xlu2 %3064 }
 0x3dd   : > { %v2990_v57 = vsel %vm2934_vm14, %v2981_v17, 0.0  ;;  %v3090_v21 = vsel %vm3042_vm7, %v3065_v48, 0.0  ;;  %v3454_v17 = vpop.f32.mrf.mxu1 }
 0x3de   : > { %v3102_v26 = vadd.f32 %v3094_v0, %v2990_v57 }
 0x3df   : > { %v3498_v55 = vpop.f32.mrf.mxu2 }
 0x3e4   : > { %v2910_v6 = vpop.permute.xlu2 %2909 }
 0x3e5   : > { %v3256_v44 = vpop.permute.xlu1 %3255  ;;  %vm2931_vm5 = vcmp.eq.f32.partialorder %v6413_v10, %v2910_v6  ;;  %v3457_v31 = vpop.f32.mrf.mxu1  ;;  %v3671_v6 = vld [vmem:[%s6722_s13 + $0x70] sm:$0xff] }
 0x3e6   : > { %v3265_v42 = vsel %vm3225_vm4, %v3256_v44, 0.0  ;;  %v3455_v44 = vadd.f32 %v3454_v17, %v6484_v8 }
 0x3e7   : > { %v3273_v13 = vadd.f32 %v3265_v42, %v3185_v23  ;;  %v3615_v59 = vpop.f32.mrf.mxu2  ;;  %v3458_v23 = vadd.f32 %v3457_v31, %v6500_v11 }
 0x3e9   : > { %v3281_v20 = vmul.f32 %v3273_v13, %v3102_v26  ;;  %v3496_v26 = vadd.f32 %v3495_v46, %v3455_v44  ;;  %v3499_v13 = vadd.f32 %v3498_v55, %v3458_v23 }
 0x3eb   : > { %3620 = vmatmul.f32.gmra.mxu2 %v3281_v20  ;;  %v3493_v20 = vadd.f32 %v3492_v35, %v3452_v52  ;;  %v3660_v35 = vld [vmem:[%s6722_s13 + $0x18] sm:$0xff] }
 0x3ed   : > { %v3120_v4 = vpop.permute.xlu1 %3119  ;;  %v3124_v34 = vpop.permute.xlu2 %3123 }
 0x3ee   : > { %vm3141_vm3 = vcmp.eq.f32.partialorder %v6424_v9, %v3120_v4  ;;  %vm3142_vm6 = vcmp.eq.f32.partialorder %v6424_v9, %v3124_v34 }
 0x3ef   : > { %v3181_v56 = vsel %vm3141_vm3, %v3160_v47, 0.0  ;;  %v3182_v14 = vsel %vm3142_vm6, %v3164_v62, 0.0  ;;  %v3663_v62 = vld [vmem:[%s6722_s13 + $0x30] sm:$0xff] }
 0x3f6   : > { %v2961_v12 = vpop.permute.xlu1 %2960  ;;  %v3070_v38 = vpop.permute.xlu2 %3069 }
 0x3f7   : > { %v2986_v36 = vsel %vm2930_vm2, %v2961_v12, 0.0  ;;  %v3534_v12 = vadd.f32 %v3533_v45, %v3493_v20  ;;  %v3693_v45 = vld [vmem:[%s6715_s6] sm:$0xff] }
 0x3f8   : > { %v3098_v3 = vadd.f32 %v3090_v21, %v2986_v36 }
 0x3fe   : > { %v3536_v57 = vpop.f32.mrf.mxu3 }
 0x3ff   : > { %v3240_v27 = vpop.permute.xlu1 %3239  ;;  %v3537_v4 = vadd.f32 %v3536_v57, %v3496_v26 }
 0x400   : > { %v3261_v51 = vsel %vm3221_vm8, %v3240_v27, 0.0 }
 0x401   : > { %v3269_v32 = vadd.f32 %v3261_v51, %v3181_v56 }
 0x403   : > { %v3277_v24 = vmul.f32 %v3269_v32, %v3098_v3  ;;  %v3600_v3 = vpop.f32.mrf.mxu1 }
 0x404   : > { %v3601_v63 = vadd.f32 %v3600_v3, %v6511_v19  ;;  %v3694_v19 = vld [vmem:[%s6715_s6 + $0x8] sm:$0xff] }
 0x405   : > { %3608 = vmatmul.f32.gmra.mxu1 %v3277_v24  ;;  %v3672_v24 = vld [vmem:[%s6722_s13 + $0x78] sm:$0xff] }
 0x406   : > { %3673 = vmatpush.msra.mxu3 %v3672_v24  ;;  %v3624_v55 = vmul.f32 %v3601_v63, %v6383_v60  ;;  %v3695_v60 = vld [vmem:[%s6715_s6 + $0x10] sm:$0xff] }
 0x408   : > { %v3022_v58 = vpop.permute.xlu1 %3021  ;;  %3674 = vmatpush.msra.mxu3 %v3671_v6 }
 0x409   : > { %vm3043_vm9 = vcmp.eq.f32.partialorder %v6413_v10, %v3022_v58  ;;  %v3574_v10 = vpop.f32.mrf.mxu0 }
 0x40a   : > { %v3091_v16 = vsel %vm3043_vm9, %v3070_v38, 0.0  ;;  %v3575_v27 = vadd.f32 %v3574_v10, %v3534_v12  ;;  %v3665_v38 = vld [vmem:[%s6722_s13 + $0x40] sm:$0xff] }
 0x40b   : > { %v3603_v32 = vpop.f32.mrf.mxu1 }
 0x40c   : > { %v3616_v8 = vadd.f32 %v3615_v59, %v3575_v27  ;;  %v3604_v46 = vadd.f32 %v3603_v32, %v6530_v40  ;;  %v4067_v59 = vld [vmem:[%s6716_s7] ss:$0 sm:$0xff] }
 0x40e   : > { %v3629_v2 = vmul.f32 %v3616_v8, %v6473_v33  ;;  %v3669_v33 = vld [vmem:[%s6722_s13 + $0x60] sm:$0xff]  ;;  %v3625_v40 = vmul.f32 %v3604_v46, %v6390_v53  ;;  %v3696_v53 = vld [vmem:[%s6715_s6 + $0x18] sm:$0xff] }
 0x410   : > { %v2966_v5 = vpop.permute.xlu1 %2965 }
 0x411   : > { %v2987_v41 = vsel %vm2931_vm5, %v2966_v5, 0.0  ;;  %v3577_v9 = vpop.f32.mrf.mxu0  ;;  %v3666_v5 = vld [vmem:[%s6722_s13 + $0x48] sm:$0xff] }
 0x412   : > { %v3099_v25 = vadd.f32 %v3091_v16, %v2987_v41  ;;  %v3578_v36 = vadd.f32 %v3577_v9, %v3537_v4  ;;  %v3664_v41 = vld [vmem:[%s6722_s13 + $0x38] sm:$0xff]  ;;  %v4073_v9 = vld [vmem:[%s4319_s19] sm:$0xff] }
 0x419   : > { %v3244_v43 = vpop.permute.xlu1 %3243 }
 0x41a   : > { %v3262_v50 = vsel %vm3222_vm10, %v3244_v43, 0.0 }
 0x41b   : > { %v3270_v1 = vadd.f32 %v3262_v50, %v3182_v14  ;;  %v3662_v14 = vld [vmem:[%s6722_s13 + $0x28] sm:$0xff] }
 0x41d   : > { %v3278_v18 = vmul.f32 %v3270_v1, %v3099_v25  ;;  %v3661_v25 = vld [vmem:[%s6722_s13 + $0x20] sm:$0xff] }
 0x41f   : > { %3611 = vmatmul.f32.gmra.mxu1 %v3278_v18 }
 0x420   : > { %v3618_v0 = vpop.f32.mrf.mxu2 }
 0x421   : > { %v3619_v21 = vadd.f32 %v3618_v0, %v3578_v36 }
 0x423   : > { %v3630_v51 = vmul.f32 %v3619_v21, %v6481_v54  ;;  %v3670_v54 = vld [vmem:[%s6722_s13 + $0x68] sm:$0xff] }
 0x424   : > { %3675 = vmatpush.msra.mxu3 %v3670_v54 }
 0x426   : > { %3676 = vmatpush.msra.mxu3 %v3669_v33 }
 0x43c   : > { %v3580_v48 = vpop.f32.mrf.mxu0 }
 0x442   : > { %v3539_v42 = vpop.f32.mrf.mxu3 }
 0x443   : > { %v3540_v61 = vadd.f32 %v3539_v42, %v3499_v13 }
 0x445   : > { %v3581_v30 = vadd.f32 %v3580_v48, %v3540_v61 }
 0x44e   : > { %v3606_v58 = vpop.f32.mrf.mxu1 }
 0x44f   : > { %v3607_v1 = vadd.f32 %v3606_v58, %v6536_v22 }
 0x451   : > { %v3626_v22 = vmul.f32 %v3607_v1, %v6426_v15  ;;  %v3632_v15 = vld [vmem:[%s6721_s12] sm:$0xff] }
 0x46e   : > { %v3621_v47 = vpop.f32.mrf.mxu2 }
 0x46f   : > { %v3622_v56 = vadd.f32 %v3621_v47, %v3581_v30 }
 0x471   : > { %v3631_v11 = vmul.f32 %v3622_v56, %v6493_v29  ;;  %v3668_v29 = vld [vmem:[%s6722_s13 + $0x58] sm:$0xff] }
 0x472   : > { %3677 = vmatpush.msra.mxu3 %v3668_v29 }
 0x473   : > { %3645 = vmatpush.msrb.mxu2 %v3631_v11 }
 0x474   : > { %3678 = vmatpush.msra.mxu3 %v3667_v7 }
 0x475   : > { %3646 = vmatpush.msrb.mxu2 %v3630_v51 }
 0x476   : > { %3679 = vmatpush.msra.mxu3 %v3666_v5 }
 0x477   : > { %3647 = vmatpush.msrb.mxu2 %v3629_v2 }
 0x478   : > { %3680 = vmatpush.msra.mxu3 %v3665_v38 }
 0x47a   : > { %3681 = vmatpush.msra.mxu3 %v3664_v41 }
 0x47c   : > { %3682 = vmatpush.msra.mxu3 %v3663_v62 }
 0x47e   : > { %3683 = vmatpush.msra.mxu3 %v3662_v14 }
 0x480   : > { %3684 = vmatpush.msra.mxu3 %v3661_v25 }
 0x482   : > { %v3609_v34 = vpop.f32.mrf.mxu1  ;;  %3685 = vmatpush.msra.mxu3 %v3660_v35 }
 0x483   : > { %v3610_v16 = vadd.f32 %v3609_v34, %v6544_v28 }
 0x485   : > { %v3627_v28 = vmul.f32 %v3610_v16, %v6437_v37  ;;  %v3657_v37 = vld [vmem:[%s6722_s13] sm:$0xff] }
 0x49c   : > { %v3612_v43 = vpop.f32.mrf.mxu1 }
 0x49d   : > { %v3613_v50 = vadd.f32 %v3612_v43, %v6555_v39  ;;  %v3659_v39 = vld [vmem:[%s6722_s13 + $0x10] sm:$0xff] }
 0x49e   : > { %3686 = vmatpush.msra.mxu3 %v3659_v39 }
 0x49f   : > { %v3628_v18 = vmul.f32 %v3613_v50, %v6447_v49  ;;  %v3658_v49 = vld [vmem:[%s6722_s13 + $0x8] sm:$0xff] }
 0x4a0   : > { %3687 = vmatpush.msra.mxu3 %v3658_v49 }
 0x4a1   : > { %3648 = vmatpush.msrb.mxu2 %v3628_v18 }
 0x4a2   : > { %3688 = vmatpush.msra.mxu3 %v3657_v37 }
 0x4a3   : > { %3649 = vmatpush.msrb.mxu2 %v3627_v28 }
 0x4a5   : > { %3650 = vmatpush.msrb.mxu2 %v3626_v22 }
 0x4a7   : > { %3651 = vmatpush.msrb.mxu2 %v3625_v40 }
 0x4a9   : > { %3652 = vmatpush.msrb.mxu2 %v3624_v55 }
 0x4aa   : > { %3936 = vmatmul.msk.f32.vlgmr.msrb.gmra.mxu2 %vm3633_vm11, %v3632_v15 }
 0x4ab   : > { %3716 = vmatpush.msra.mxu2 %v3696_v53 }
 0x4ad   : > { %3717 = vmatpush.msra.mxu2 %v3695_v60 }
 0x4af   : > { %3718 = vmatpush.msra.mxu2 %v3694_v19 }
 0x4b1   : > { %3719 = vmatpush.msra.mxu2 %v3693_v45 }
 0x52d   : > { %v3654_v17 = vpop.f32.mrf.mxu2 }
 0x52e   : > { %3689 = vmatmul.f32.vlgmr.msra.gmra.mxu3 %v3654_v17 }
 0x5b1   : > { %v3690_v10 = vpop.f32.mrf.mxu3 }
 0x5b2   : > { %3937 = vmatmul.msk.f32.vlgmr.msra.gmra.mxu2 %vm639_vm0, %v3690_v10 }
 0x635   : > { %v3721_v57 = vpop.f32.mrf.mxu2 }
 0x636   : > { %v3722_v31 = vadd.f32 %v4067_v59, %v3721_v57 }
 0x638   : > { %v3724_v44 = vadd.f32 %v4073_v9, %v3722_v31 }
 0x63a   : > { %3725 = vst.msk [vmem:[%s609_s1] sm:$0xff] %vm639_vm0, %v3724_v44 }
 0x63b   : > { %4101 = shalt.err (!%p4098_p3)
}
 0x63c   : > { %3960 = dma.vmem_to_hbm [thread:$0]  (%p4277_p5), %s3740_s25, 128, %s3742_s3, %s3727_s0  }
 0x63d PF: > { %s7098_s19 = sld [smem:[#allocation6_spill]]  ;;  %p3966_p4 = scmp.ge.s32.totalorder %s4136_s30, 2 }
 0x63f   : > { %p3963_p7 = pnand %p3966_p4, %p4281_p6 }
 0x641   : > { %p3964_p8 = pneg %p3963_p7 }
 0x643   : > { %s3753_s22 = sand.u32 1, %s7098_s19  }
 0x644   : > { %s3754_s1 = scalar_lea.sflag [#allocation4], %s3753_s22 }
 0x645   : > { %4119 = dma.done.wait (%p3964_p8), %s3754_s1, 128  }
 0x646   : > { %4121 = vsyncadd (%p3964_p8), %s3754_s1, 4294967168  ;;  %s7100_s30 = sld [smem:[#allocation8_spill]]  ;;  %s7103_s27 = smov %s4128_s28 }
 0x647   : > { %s7101_s4 = sld [smem:[#allocation7_spill]] }
 0x648   : > { %s7102_s29 = sld [smem:[#allocation9_spill]] }
 0x64c   : > { %p28_p9 = scmp.ge.s32.totalorder %s7100_s30, 4  }
 0x64d   : > { %s7104_s28 = smov %s7101_s4 }
 0x64e   :  { %30 = sbr.rel (!%p28_p9) target bundleno = 9 (0x9), region = 138 }
 0x653   :  { %3760 = vsyncpa [#allocation4], 1 }
 0x654   :  { %3762 = vsyncpa [#allocation4 + $0x1], 1 }

</bundles_post_ra>
